<compile_context>
chip_gen: v6e
topology: v6e:2x2x1
jax: 0.10.0
libtpu: 0.0.40
codegen_flags: <defaults>
</compile_context>

<pallas_src>
import functools
import math

import jax
import jax.numpy as jnp
from jax import lax
from jax.experimental import pallas as pl
from jax.experimental.pallas import tpu as pltpu


# --------------------------------- helpers --------------------------------- #

def _round_up(x, m):
    return ((x + m - 1) // m) * m


def _pick_tile(dim, align, cap):
    """Pad `dim` to `align`; pick the largest tile (multiple of `align`) that divides
    the padded dim and is <= cap.  Returns (tile, padded_dim)."""
    padded = _round_up(dim, align)
    if padded <= cap:
        return padded, padded
    best, t = align, align
    while t <= cap:
        if padded % t == 0:
            best = t
        t += align
    return best, padded


def _split_for_two_cores(tm, mp, n_parallel_blocks):
    """If the parallel (M, N) grid has a single block, split M so v7x's two
    TensorCores both get work (harmless extra grid step on single-TC v5e/v6e)."""
    if n_parallel_blocks >= 2 or tm < 16:
        return tm
    best, t = None, 8
    while t <= tm // 2:
        if mp % t == 0:
            best = t
        t += 8
    return best if best is not None else tm


@functools.lru_cache(maxsize=None)
def _vmem_limit_bytes():
    cap = 64 * 1024 * 1024                     # conservative default (v7x: 64 MiB/TC)
    try:
        info = pltpu.get_tpu_info()
        cap = int(getattr(info, "vmem_capacity_bytes", cap))
    except Exception:
        pass
    # ~75% of physical: ~48 MiB on v7x, ~96 MiB on 128-MiB v5e/v6e parts.
    return max(32 * 1024 * 1024, min(cap * 3 // 4, 100 * 1024 * 1024))


# --------------------------- fused matmul kernel ---------------------------- #
# out = [ReLU(A*scale + shift)] @ B + bias [+ residual]     (bf16 MXU / f32 acc)
# Optionally also emits per-row-block column sums and sums-of-squares of the f32
# result so the NEXT BatchNorm's batch statistics come for free from the epilogue.

def _make_fused_matmul_kernel(has_prologue, has_residual, compute_stats, tm, m_actual, mp):
    needs_row_mask = compute_stats and (mp != m_actual)

    def kernel(*refs):
        idx = 0
        a_ref = refs[idx]; idx += 1
        b_ref = refs[idx]; idx += 1
        if has_prologue:
            scale_ref, shift_ref = refs[idx], refs[idx + 1]; idx += 2
        bias_ref = refs[idx]; idx += 1
        if has_residual:
            res_ref = refs[idx]; idx += 1
        o_ref = refs[idx]; idx += 1
        if compute_stats:
            sum_ref, sq_ref = refs[idx], refs[idx + 1]; idx += 2
        acc_ref = refs[idx]

        k = pl.program_id(2)

        @pl.when(k == 0)
        def _init():
            acc_ref[...] = jnp.zeros_like(acc_ref)

        a = a_ref[...]
        if has_prologue:
            # fused BatchNorm (batch stats, gamma=1/beta=0) + ReLU, in bf16.
            # Padded K columns have scale=shift=0 -> contribute exactly 0.
            a = jnp.maximum(a * scale_ref[...] + shift_ref[...], 0.0)
        acc_ref[...] += jnp.dot(a, b_ref[...], preferred_element_type=jnp.float32)

        @pl.when(k == pl.num_programs(2) - 1)
        def _epilogue():
            out = acc_ref[...] + bias_ref[...]                 # bias once, in f32
            if has_residual:
                out = out + res_ref[...].astype(jnp.float32)   # bf16 residual read
            if compute_stats:
                if needs_row_mask:                             # drop padded-M garbage rows
                    rows = (lax.broadcasted_iota(jnp.int32, (tm, 1), 0)
                            + pl.program_id(0) * tm)
                    out = jnp.where(rows < m_actual, out, 0.0)
                csum = jnp.sum(out, axis=0, keepdims=True)               # (1, tn)
                csq = jnp.sum(out * out, axis=0, keepdims=True)
                sum_ref[...] = jnp.broadcast_to(csum, (8, csum.shape[-1]))
                sq_ref[...] = jnp.broadcast_to(csq, (8, csq.shape[-1]))
            o_ref[...] = out.astype(o_ref.dtype)

    return kernel


def fused_matmul(a, b, bias, *, scale=None, shift=None, residual=None,
                 out_dtype=jnp.bfloat16, compute_stats=False):
    """(M,K)@(K,N)+bias with optional fused BN+ReLU prologue on A, fused residual add,
    and optional fused batch-statistics outputs of the result."""
    M, K = a.shape
    K2, N = b.shape
    assert K == K2
    has_prologue = scale is not None
    has_residual = residual is not None

    tm, Mp = _pick_tile(M, 8, 256)
    tk, Kp = _pick_tile(K, 128, 1024)
    tn, Np = _pick_tile(N, 128, 512)
    tm = _split_for_two_cores(tm, Mp, (Mp // tm) * (Np // tn))

    a_p = jnp.pad(a.astype(jnp.bfloat16), ((0, Mp - M), (0, Kp - K)))
    b_p = jnp.pad(b.astype(jnp.bfloat16), ((0, Kp - K), (0, Np - N)))
    bias_p = jnp.pad(bias.astype(jnp.float32), (0, Np - N)).reshape(1, Np)

    operands = [a_p, b_p]
    in_specs = [
        pl.BlockSpec((tm, tk), lambda i, j, k: (i, k)),
        pl.BlockSpec((tk, tn), lambda i, j, k: (k, j)),
    ]
    if has_prologue:
        scale_p = jnp.pad(scale.astype(jnp.bfloat16), (0, Kp - K)).reshape(1, Kp)
        shift_p = jnp.pad(shift.astype(jnp.bfloat16), (0, Kp - K)).reshape(1, Kp)
        operands += [scale_p, shift_p]
        in_specs += [pl.BlockSpec((1, tk), lambda i, j, k: (0, k)),
                     pl.BlockSpec((1, tk), lambda i, j, k: (0, k))]
    operands.append(bias_p)
    in_specs.append(pl.BlockSpec((1, tn), lambda i, j, k: (0, j)))
    if has_residual:
        res_p = jnp.pad(residual.astype(jnp.bfloat16), ((0, Mp - M), (0, Np - N)))
        operands.append(res_p)
        in_specs.append(pl.BlockSpec((tm, tn), lambda i, j, k: (i, j)))

    gi = Mp // tm
    out_shape = jax.ShapeDtypeStruct((Mp, Np), out_dtype)
    out_specs = pl.BlockSpec((tm, tn), lambda i, j, k: (i, j))
    if compute_stats:
        stat_shape = jax.ShapeDtypeStruct((gi * 8, Np), jnp.float32)
        stat_spec = pl.BlockSpec((8, tn), lambda i, j, k: (i, j))
        out_shape = (out_shape, stat_shape, stat_shape)
        out_specs = (out_specs, stat_spec, stat_spec)

    result = pl.pallas_call(
        _make_fused_matmul_kernel(has_prologue, has_residual, compute_stats, tm, M, Mp),
        out_shape=out_shape,
        grid_spec=pltpu.PrefetchScalarGridSpec(
            num_scalar_prefetch=0,
            grid=(Mp // tm, Np // tn, Kp // tk),
            in_specs=in_specs,
            out_specs=out_specs,
            scratch_shapes=[pltpu.VMEM((tm, tn), jnp.float32)],
        ),
        compiler_params=pltpu.CompilerParams(
            dimension_semantics=("parallel", "parallel", "arbitrary"),
            vmem_limit_bytes=_vmem_limit_bytes(),
        ),
    )(*operands)

    if compute_stats:
        out, sums, sqs = result
        return out[:M, :N], sums, sqs
    return result[:M, :N]


def _stats_to_bn_affine(sums, sqs, count, channels, eps=1e-5):
    """Finish the fused BN-statistics reduction and fold into per-channel scale/shift
    (gamma=1, beta=0), returned in bf16 for the in-kernel prologue."""
    npad = sums.shape[-1]
    s1 = sums.reshape(-1, 8, npad)[:, 0, :].sum(axis=0)[:channels]
    s2 = sqs.reshape(-1, 8, npad)[:, 0, :].sum(axis=0)[:channels]
    mean = s1 / count
    var = jnp.maximum(s2 / count - mean * mean, 0.0)
    scale = lax.rsqrt(var + eps)
    shift = -mean * scale
    return scale.astype(jnp.bfloat16), shift.astype(jnp.bfloat16)


# --------------------------------- convs ----------------------------------- #

def conv2d_3x3(x_nhwc, w_mat, bias, stride, scale=None, shift=None,
               residual=None, with_stats=False):
    """3x3 conv (padding=1) via bf16 im2col + the fused Pallas matmul.

    BN+ReLU of the *input* (per-channel scale/shift, bf16) and the residual add are
    fused into the kernel; with_stats additionally returns the batch statistics of
    the conv output (for the next BatchNorm) straight from the epilogue.
    """
    # TODO(synk): stream the 9 taps straight from the padded NHWC tensor inside the
    # kernel (tap folded into the K grid axis / manual DMA) to eliminate the
    # materialized 9x im2col copy entirely.
    N, H, W, Cin = x_nhwc.shape
    Cout = w_mat.shape[1]
    kh = kw = 3
    xp = jnp.pad(x_nhwc.astype(jnp.bfloat16), ((0, 0), (1, 1), (1, 1), (0, 0)))
    Ho = (H + 2 - kh) // stride + 1
    Wo = (W + 2 - kw) // stride + 1
    taps = [
        xp[:, i:i + stride * (Ho - 1) + 1:stride,
              j:j + stride * (Wo - 1) + 1:stride, :]
        for i in range(kh) for j in range(kw)
    ]
    a = jnp.concatenate(taps, axis=-1).reshape(N * Ho * Wo, kh * kw * Cin)
    scale_k = None if scale is None else jnp.tile(scale, kh * kw)   # per-channel, per tap
    shift_k = None if shift is None else jnp.tile(shift, kh * kw)
    res2d = None if residual is None else residual.reshape(N * Ho * Wo, Cout)
    out = fused_matmul(a, w_mat, bias, scale=scale_k, shift=shift_k,
                       residual=res2d, compute_stats=with_stats)
    if with_stats:
        y, sums, sqs = out
        bn_scale, bn_shift = _stats_to_bn_affine(sums, sqs, N * Ho * Wo, Cout)
        return y.reshape(N, Ho, Wo, Cout), bn_scale, bn_shift
    return out.reshape(N, Ho, Wo, Cout)


def conv2d_1x1(x_nhwc, w_mat, bias, stride):
    """1x1 conv: no im2col — a strided-view row matmul on the raw NHWC tensor."""
    N, H, W, Cin = x_nhwc.shape
    Cout = w_mat.shape[1]
    xs = x_nhwc[:, ::stride, ::stride, :]
    Ho, Wo = xs.shape[1], xs.shape[2]
    a = xs.reshape(N * Ho * Wo, Cin)
    return fused_matmul(a, w_mat, bias).reshape(N, Ho, Wo, Cout)


# ------------------------------ parameter init ------------------------------ #

def _xavier_uniform_conv_mat(key, cout, cin, kh, kw, gain):
    """Xavier-uniform conv weight, pre-packed into the (kh*kw*Cin, Cout) bf16 matmul
    layout (matches the im2col tap-major K ordering) so no per-call transpose."""
    fan_in = cin * kh * kw
    fan_out = cout * kh * kw
    bound = gain * math.sqrt(6.0 / (fan_in + fan_out))
    w = jax.random.uniform(key, (cout, cin, kh, kw), jnp.float32, -bound, bound)
    return jnp.transpose(w, (2, 3, 1, 0)).reshape(kh * kw * cin, cout).astype(jnp.bfloat16)


def init_wrn_params(key, num_blocks, widen_factor, input_dim, num_classes):
    gain = math.sqrt(2.0)
    num_filters = [16, 16 * widen_factor, 32 * widen_factor, 64 * widen_factor]
    strides = [1, 2, 2]

    keys = iter(jax.random.split(key, 9 * num_blocks + 3))
    params = {}

    # stem conv: Conv2d(input_dim[0], 16, k=3, s=1, p=1)
    params["stem_w"] = _xavier_uniform_conv_mat(next(keys), 16, input_dim[0], 3, 3, gain)
    params["stem_b"] = jnp.zeros((16,), jnp.float32)

    blocks = []
    for nf_1, nf, stride in zip(num_filters[:-1], num_filters[1:], strides):
        stage = [(nf_1, nf, stride)] + [(nf, nf, 1)] * (num_blocks - 1)
        for c_in, c_out, s in stage:
            blocks.append({
                "stride": s,
                "w1": _xavier_uniform_conv_mat(next(keys), c_out, c_in, 3, 3, gain),
                "b1": jnp.zeros((c_out,), jnp.float32),
                "w2": _xavier_uniform_conv_mat(next(keys), c_out, c_out, 3, 3, gain),
                "b2": jnp.zeros((c_out,), jnp.float32),
                "wsc": _xavier_uniform_conv_mat(next(keys), c_out, c_in, 1, 1, gain),
                "bsc": jnp.zeros((c_out,), jnp.float32),
            })
    params["blocks"] = blocks

    # classifier: nn.Linear(64*widen_factor, num_classes), PyTorch default init,
    # stored pre-transposed as (feat, num_classes).
    feat = num_filters[-1]
    bound = 1.0 / math.sqrt(feat)
    params["cls_w_t"] = jax.random.uniform(
        next(keys), (feat, num_classes), jnp.float32, -bound, bound)
    params["cls_b"] = jax.random.uniform(
        next(keys), (num_classes,), jnp.float32, -bound, bound)
    return params


# --------------------------------- forward ---------------------------------- #

def wrn_block_forward(x, bn_scale, bn_shift, p, need_out_stats):
    # c33 branch: BN(x)+ReLU fused into conv1 (dropout=0.0 -> omitted), BN(h)+ReLU
    # fused into conv2. c11 shortcut consumes raw x (as in the reference) and is
    # computed first so the residual add lands in conv2's epilogue.
    h, s2, b2 = conv2d_3x3(x, p["w1"], p["b1"], stride=p["stride"],
                           scale=bn_scale, shift=bn_shift, with_stats=True)
    sc = conv2d_1x1(x, p["wsc"], p["bsc"], stride=p["stride"])
    return conv2d_3x3(h, p["w2"], p["b2"], stride=1, scale=s2, shift=b2,
                      residual=sc, with_stats=need_out_stats)


def wrn_forward(x_nchw, params):
    x = jnp.transpose(x_nchw, (0, 2, 3, 1)).astype(jnp.bfloat16)   # NCHW f32 -> NHWC bf16
    # Stem conv (no BN before it); its fused epilogue already yields block0's BN stats.
    x, bn_s, bn_b = conv2d_3x3(x, params["stem_w"], params["stem_b"],
                               stride=1, with_stats=True)
    blocks = params["blocks"]
    for idx, blk in enumerate(blocks):
        last = idx == len(blocks) - 1
        out = wrn_block_forward(x, bn_s, bn_b, blk, need_out_stats=not last)
        if last:
            x = out
        else:
            x, bn_s, bn_b = out
    # AdaptiveAvgPool2d((1,1)) == global mean over H, W (tiny reduction, XLA glue)
    pooled = jnp.mean(x.astype(jnp.float32), axis=(1, 2))           # (N, C)
    # Classifier: (batch, feat)@(feat, classes) is sub-microsecond; a pallas_call plus
    # padding to (8,128) tiles would cost more than it saves -> plain jnp.dot.
    return jnp.dot(pooled, params["cls_w_t"]) + params["cls_b"]


# ----------------------------------- main ------------------------------------ #

if __name__ == "__main__":
    num_blocks = 1
    widen_factor = 1
    input_dim = (3, 16, 16)        # (C, H, W) — small synthetic config
    num_classes = 10

    pkey, xkey = jax.random.split(jax.random.PRNGKey(0))
    params = init_wrn_params(pkey, num_blocks, widen_factor, input_dim, num_classes)
    x = jax.random.normal(xkey, (2,) + input_dim, jnp.float32)      # NCHW like PyTorch

    fwd = jax.jit(lambda inp: wrn_forward(inp, params))
    logits = fwd(x)
    jax.block_until_ready(logits)
    assert logits.shape == (2, num_classes), logits.shape
    print("KERNEL_OK")
</pallas_src>

<mosaic_0001>
module attributes {stable_mosaic.version = 11 : i64} {
  func.func @kernel(%arg0: i32, %arg1: i32, %arg2: i32, %arg3: memref<256x128xbf16, #tpu.memory_space<vmem>>, %arg4: memref<128x128xbf16, #tpu.memory_space<vmem>>, %arg5: memref<1x128xf32, #tpu.memory_space<vmem>>, %arg6: memref<256x128xbf16, #tpu.memory_space<vmem>>, %arg7: memref<8x128xf32, #tpu.memory_space<vmem>>, %arg8: memref<8x128xf32, #tpu.memory_space<vmem>>, %arg9: memref<256x128xf32, #tpu.memory_space<vmem>>) attributes {dimension_semantics = [#tpu.dimension_semantics<parallel>, #tpu.dimension_semantics<parallel>, #tpu.dimension_semantics<arbitrary>], iteration_bounds = array<i64: 2, 1, 1>, scalar_prefetch = 0 : i64, scratch_operands = 1 : i64, tpu.core_type = #tpu.core_type<tc>, window_params = [{transform_indices = @transform_0, window_bounds = array<i64: 256, 128>}, {transform_indices = @transform_1, window_bounds = array<i64: 128, 128>}, {transform_indices = @transform_2, window_bounds = array<i64: 1, 128>}, {transform_indices = @transform_3, window_bounds = array<i64: 256, 128>}, {transform_indices = @transform_4, window_bounds = array<i64: 8, 128>}, {transform_indices = @transform_5, window_bounds = array<i64: 8, 128>}]} {
    %c0_i32 = arith.constant 0 : i32
    %0 = arith.cmpi eq, %arg2, %c0_i32 : i32
    %1 = arith.extui %0 : i1 to i32
    %c0_i32_0 = arith.constant 0 : i32
    %2 = arith.cmpi ne, %1, %c0_i32_0 : i32
    scf.if %2 {
      %cst_10 = arith.constant 0.000000e+00 : f32
      %12 = vector.broadcast %cst_10 : f32 to vector<256x128xf32>
      %c0_11 = arith.constant 0 : index
      %c0_12 = arith.constant 0 : index
      %13 = vector.load %arg9[%c0_11, %c0_12] : memref<256x128xf32, #tpu.memory_space<vmem>>, vector<256x128xf32>
      tpu.vector_store %arg9[%c0_11, %c0_12], %12 {strides = array<i32>} : memref<256x128xf32, #tpu.memory_space<vmem>>, vector<256x128xf32>,
    } else {
    }
    %c0 = arith.constant 0 : index
    %c0_1 = arith.constant 0 : index
    %3 = vector.load %arg3[%c0, %c0_1] : memref<256x128xbf16, #tpu.memory_space<vmem>>, vector<256x128xbf16>
    %c0_2 = arith.constant 0 : index
    %c0_3 = arith.constant 0 : index
    %4 = vector.load %arg9[%c0_2, %c0_3] : memref<256x128xf32, #tpu.memory_space<vmem>>, vector<256x128xf32>
    %c0_4 = arith.constant 0 : index
    %c0_5 = arith.constant 0 : index
    %5 = vector.load %arg4[%c0_4, %c0_5] : memref<128x128xbf16, #tpu.memory_space<vmem>>, vector<128x128xbf16>
    %cst = arith.constant dense<0.000000e+00> : vector<256x128xf32>
    %6 = tpu.matmul %3, %5, %cst {dimension_numbers = #tpu.dot_dimension_numbers<[1], [0], [0], [1], [0, 0, 1, 1], [], []>} : vector<256x128xbf16>, vector<128x128xbf16>, vector<256x128xf32> -> vector<256x128xf32>
    %7 = arith.addf %4, %6 : vector<256x128xf32>
    %c0_6 = arith.constant 0 : index
    %c0_7 = arith.constant 0 : index
    %8 = vector.load %arg9[%c0_6, %c0_7] : memref<256x128xf32, #tpu.memory_space<vmem>>, vector<256x128xf32>
    tpu.vector_store %arg9[%c0_6, %c0_7], %7 {strides = array<i32>} : memref<256x128xf32, #tpu.memory_space<vmem>>, vector<256x128xf32>,
    %c0_i32_8 = arith.constant 0 : i32
    %9 = arith.cmpi eq, %arg2, %c0_i32_8 : i32
    %10 = arith.extui %9 : i1 to i32
    %c0_i32_9 = arith.constant 0 : i32
    %11 = arith.cmpi ne, %10, %c0_i32_9 : i32
    scf.if %11 {
      %c0_10 = arith.constant 0 : index
      %c0_11 = arith.constant 0 : index
      %12 = vector.load %arg9[%c0_10, %c0_11] : memref<256x128xf32, #tpu.memory_space<vmem>>, vector<256x128xf32>
      %c0_12 = arith.constant 0 : index
      %c0_13 = arith.constant 0 : index
      %13 = vector.load %arg5[%c0_12, %c0_13] : memref<1x128xf32, #tpu.memory_space<vmem>>, vector<1x128xf32>
      %14 = vector.broadcast %13 : vector<1x128xf32> to vector<256x128xf32>
      %15 = arith.addf %12, %14 : vector<256x128xf32>
      %cst_14 = arith.constant dense<0.000000e+00> : vector<128xf32>
      %16 = vector.multi_reduction <add>, %15, %cst_14 [0] : vector<256x128xf32> to vector<128xf32>
      %17 = vector.shape_cast %16 : vector<128xf32> to vector<1x128xf32>
      %18 = arith.mulf %15, %15 : vector<256x128xf32>
      %cst_15 = arith.constant dense<0.000000e+00> : vector<128xf32>
      %19 = vector.multi_reduction <add>, %18, %cst_15 [0] : vector<256x128xf32> to vector<128xf32>
      %20 = vector.shape_cast %19 : vector<128xf32> to vector<1x128xf32>
      %21 = vector.shape_cast %17 : vector<1x128xf32> to vector<1x128xf32>
      %22 = vector.broadcast %21 : vector<1x128xf32> to vector<8x128xf32>
      %c0_16 = arith.constant 0 : index
      %c0_17 = arith.constant 0 : index
      %23 = vector.load %arg7[%c0_16, %c0_17] : memref<8x128xf32, #tpu.memory_space<vmem>>, vector<8x128xf32>
      tpu.vector_store %arg7[%c0_16, %c0_17], %22 {strides = array<i32>} : memref<8x128xf32, #tpu.memory_space<vmem>>, vector<8x128xf32>,
      %24 = vector.shape_cast %20 : vector<1x128xf32> to vector<1x128xf32>
      %25 = vector.broadcast %24 : vector<1x128xf32> to vector<8x128xf32>
      %c0_18 = arith.constant 0 : index
      %c0_19 = arith.constant 0 : index
      %26 = vector.load %arg8[%c0_18, %c0_19] : memref<8x128xf32, #tpu.memory_space<vmem>>, vector<8x128xf32>
      tpu.vector_store %arg8[%c0_18, %c0_19], %25 {strides = array<i32>} : memref<8x128xf32, #tpu.memory_space<vmem>>, vector<8x128xf32>,
      %27 = arith.truncf %15 : vector<256x128xf32> to vector<256x128xbf16>
      %c0_20 = arith.constant 0 : index
      %c0_21 = arith.constant 0 : index
      %28 = vector.load %arg6[%c0_20, %c0_21] : memref<256x128xbf16, #tpu.memory_space<vmem>>, vector<256x128xbf16>
      tpu.vector_store %arg6[%c0_20, %c0_21], %27 {strides = array<i32>} : memref<256x128xbf16, #tpu.memory_space<vmem>>, vector<256x128xbf16>,
    } else {
    }
    return
  }
  func.func @transform_0(%arg0: i32, %arg1: i32, %arg2: i32) -> (i32, i32) {
    %c0_i32 = arith.constant 0 : i32
    return %arg0, %arg2 : i32, i32
  }
  func.func @transform_1(%arg0: i32, %arg1: i32, %arg2: i32) -> (i32, i32) {
    %c0_i32 = arith.constant 0 : i32
    return %arg2, %arg1 : i32, i32
  }
  func.func @transform_2(%arg0: i32, %arg1: i32, %arg2: i32) -> (i32, i32) {
    %c0_i32 = arith.constant 0 : i32
    %c0_i32_0 = arith.constant 0 : i32
    return %c0_i32, %arg1 : i32, i32
  }
  func.func @transform_3(%arg0: i32, %arg1: i32, %arg2: i32) -> (i32, i32) {
    %c0_i32 = arith.constant 0 : i32
    return %arg0, %arg1 : i32, i32
  }
  func.func @transform_4(%arg0: i32, %arg1: i32, %arg2: i32) -> (i32, i32) {
    %c0_i32 = arith.constant 0 : i32
    return %arg0, %arg1 : i32, i32
  }
  func.func @transform_5(%arg0: i32, %arg1: i32, %arg2: i32) -> (i32, i32) {
    %c0_i32 = arith.constant 0 : i32
    return %arg0, %arg1 : i32, i32
  }
}

module attributes {stable_mosaic.version = 11 : i64} {
  func.func @kernel(%arg0: i32, %arg1: i32, %arg2: i32, %arg3: memref<256x256xbf16, #tpu.memory_space<vmem>>, %arg4: memref<256x128xbf16, #tpu.memory_space<vmem>>, %arg5: memref<1x256xbf16, #tpu.memory_space<vmem>>, %arg6: memref<1x256xbf16, #tpu.memory_space<vmem>>, %arg7: memref<1x128xf32, #tpu.memory_space<vmem>>, %arg8: memref<256x128xbf16, #tpu.memory_space<vmem>>, %arg9: memref<8x128xf32, #tpu.memory_space<vmem>>, %arg10: memref<8x128xf32, #tpu.memory_space<vmem>>, %arg11: memref<256x128xf32, #tpu.memory_space<vmem>>) attributes {dimension_semantics = [#tpu.dimension_semantics<parallel>, #tpu.dimension_semantics<parallel>, #tpu.dimension_semantics<arbitrary>], iteration_bounds = array<i64: 2, 1, 1>, scalar_prefetch = 0 : i64, scratch_operands = 1 : i64, tpu.core_type = #tpu.core_type<tc>, window_params = [{transform_indices = @transform_0, window_bounds = array<i64: 256, 256>}, {transform_indices = @transform_1, window_bounds = array<i64: 256, 128>}, {transform_indices = @transform_2, window_bounds = array<i64: 1, 256>}, {transform_indices = @transform_3, window_bounds = array<i64: 1, 256>}, {transform_indices = @transform_4, window_bounds = array<i64: 1, 128>}, {transform_indices = @transform_5, window_bounds = array<i64: 256, 128>}, {transform_indices = @transform_6, window_bounds = array<i64: 8, 128>}, {transform_indices = @transform_7, window_bounds = array<i64: 8, 128>}]} {
    %c0_i32 = arith.constant 0 : i32
    %0 = arith.cmpi eq, %arg2, %c0_i32 : i32
    %1 = arith.extui %0 : i1 to i32
    %c0_i32_0 = arith.constant 0 : i32
    %2 = arith.cmpi ne, %1, %c0_i32_0 : i32
    scf.if %2 {
      %cst_15 = arith.constant 0.000000e+00 : f32
      %20 = vector.broadcast %cst_15 : f32 to vector<256x128xf32>
      %c0_16 = arith.constant 0 : index
      %c0_17 = arith.constant 0 : index
      %21 = vector.load %arg11[%c0_16, %c0_17] : memref<256x128xf32, #tpu.memory_space<vmem>>, vector<256x128xf32>
      tpu.vector_store %arg11[%c0_16, %c0_17], %20 {strides = array<i32>} : memref<256x128xf32, #tpu.memory_space<vmem>>, vector<256x128xf32>,
    } else {
    }
    %c0 = arith.constant 0 : index
    %c0_1 = arith.constant 0 : index
    %3 = vector.load %arg3[%c0, %c0_1] : memref<256x256xbf16, #tpu.memory_space<vmem>>, vector<256x256xbf16>
    %c0_2 = arith.constant 0 : index
    %c0_3 = arith.constant 0 : index
    %4 = vector.load %arg5[%c0_2, %c0_3] : memref<1x256xbf16, #tpu.memory_space<vmem>>, vector<1x256xbf16>
    %5 = vector.broadcast %4 : vector<1x256xbf16> to vector<256x256xbf16>
    %6 = arith.mulf %3, %5 : vector<256x256xbf16>
    %c0_4 = arith.constant 0 : index
    %c0_5 = arith.constant 0 : index
    %7 = vector.load %arg6[%c0_4, %c0_5] : memref<1x256xbf16, #tpu.memory_space<vmem>>, vector<1x256xbf16>
    %8 = vector.broadcast %7 : vector<1x256xbf16> to vector<256x256xbf16>
    %9 = arith.addf %6, %8 : vector<256x256xbf16>
    %cst = arith.constant 0.000000e+00 : bf16
    %10 = vector.broadcast %cst : bf16 to vector<256x256xbf16>
    %11 = arith.maximumf %9, %10 : vector<256x256xbf16>
    %c0_6 = arith.constant 0 : index
    %c0_7 = arith.constant 0 : index
    %12 = vector.load %arg11[%c0_6, %c0_7] : memref<256x128xf32, #tpu.memory_space<vmem>>, vector<256x128xf32>
    %c0_8 = arith.constant 0 : index
    %c0_9 = arith.constant 0 : index
    %13 = vector.load %arg4[%c0_8, %c0_9] : memref<256x128xbf16, #tpu.memory_space<vmem>>, vector<256x128xbf16>
    %cst_10 = arith.constant dense<0.000000e+00> : vector<256x128xf32>
    %14 = tpu.matmul %11, %13, %cst_10 {dimension_numbers = #tpu.dot_dimension_numbers<[1], [0], [0], [1], [0, 0, 1, 1], [], []>} : vector<256x256xbf16>, vector<256x128xbf16>, vector<256x128xf32> -> vector<256x128xf32>
    %15 = arith.addf %12, %14 : vector<256x128xf32>
    %c0_11 = arith.constant 0 : index
    %c0_12 = arith.constant 0 : index
    %16 = vector.load %arg11[%c0_11, %c0_12] : memref<256x128xf32, #tpu.memory_space<vmem>>, vector<256x128xf32>
    tpu.vector_store %arg11[%c0_11, %c0_12], %15 {strides = array<i32>} : memref<256x128xf32, #tpu.memory_space<vmem>>, vector<256x128xf32>,
    %c0_i32_13 = arith.constant 0 : i32
    %17 = arith.cmpi eq, %arg2, %c0_i32_13 : i32
    %18 = arith.extui %17 : i1 to i32
    %c0_i32_14 = arith.constant 0 : i32
    %19 = arith.cmpi ne, %18, %c0_i32_14 : i32
    scf.if %19 {
      %c0_15 = arith.constant 0 : index
      %c0_16 = arith.constant 0 : index
      %20 = vector.load %arg11[%c0_15, %c0_16] : memref<256x128xf32, #tpu.memory_space<vmem>>, vector<256x128xf32>
      %c0_17 = arith.constant 0 : index
      %c0_18 = arith.constant 0 : index
      %21 = vector.load %arg7[%c0_17, %c0_18] : memref<1x128xf32, #tpu.memory_space<vmem>>, vector<1x128xf32>
      %22 = vector.broadcast %21 : vector<1x128xf32> to vector<256x128xf32>
      %23 = arith.addf %20, %22 : vector<256x128xf32>
      %cst_19 = arith.constant dense<0.000000e+00> : vector<128xf32>
      %24 = vector.multi_reduction <add>, %23, %cst_19 [0] : vector<256x128xf32> to vector<128xf32>
      %25 = vector.shape_cast %24 : vector<128xf32> to vector<1x128xf32>
      %26 = arith.mulf %23, %23 : vector<256x128xf32>
      %cst_20 = arith.constant dense<0.000000e+00> : vector<128xf32>
      %27 = vector.multi_reduction <add>, %26, %cst_20 [0] : vector<256x128xf32> to vector<128xf32>
      %28 = vector.shape_cast %27 : vector<128xf32> to vector<1x128xf32>
      %29 = vector.shape_cast %25 : vector<1x128xf32> to vector<1x128xf32>
      %30 = vector.broadcast %29 : vector<1x128xf32> to vector<8x128xf32>
      %c0_21 = arith.constant 0 : index
      %c0_22 = arith.constant 0 : index
      %31 = vector.load %arg9[%c0_21, %c0_22] : memref<8x128xf32, #tpu.memory_space<vmem>>, vector<8x128xf32>
      tpu.vector_store %arg9[%c0_21, %c0_22], %30 {strides = array<i32>} : memref<8x128xf32, #tpu.memory_space<vmem>>, vector<8x128xf32>,
      %32 = vector.shape_cast %28 : vector<1x128xf32> to vector<1x128xf32>
      %33 = vector.broadcast %32 : vector<1x128xf32> to vector<8x128xf32>
      %c0_23 = arith.constant 0 : index
      %c0_24 = arith.constant 0 : index
      %34 = vector.load %arg10[%c0_23, %c0_24] : memref<8x128xf32, #tpu.memory_space<vmem>>, vector<8x128xf32>
      tpu.vector_store %arg10[%c0_23, %c0_24], %33 {strides = array<i32>} : memref<8x128xf32, #tpu.memory_space<vmem>>, vector<8x128xf32>,
      %35 = arith.truncf %23 : vector<256x128xf32> to vector<256x128xbf16>
      %c0_25 = arith.constant 0 : index
      %c0_26 = arith.constant 0 : index
      %36 = vector.load %arg8[%c0_25, %c0_26] : memref<256x128xbf16, #tpu.memory_space<vmem>>, vector<256x128xbf16>
      tpu.vector_store %arg8[%c0_25, %c0_26], %35 {strides = array<i32>} : memref<256x128xbf16, #tpu.memory_space<vmem>>, vector<256x128xbf16>,
    } else {
    }
    return
  }
  func.func @transform_0(%arg0: i32, %arg1: i32, %arg2: i32) -> (i32, i32) {
    %c0_i32 = arith.constant 0 : i32
    return %arg0, %arg2 : i32, i32
  }
  func.func @transform_1(%arg0: i32, %arg1: i32, %arg2: i32) -> (i32, i32) {
    %c0_i32 = arith.constant 0 : i32
    return %arg2, %arg1 : i32, i32
  }
  func.func @transform_2(%arg0: i32, %arg1: i32, %arg2: i32) -> (i32, i32) {
    %c0_i32 = arith.constant 0 : i32
    %c0_i32_0 = arith.constant 0 : i32
    return %c0_i32, %arg2 : i32, i32
  }
  func.func @transform_3(%arg0: i32, %arg1: i32, %arg2: i32) -> (i32, i32) {
    %c0_i32 = arith.constant 0 : i32
    %c0_i32_0 = arith.constant 0 : i32
    return %c0_i32, %arg2 : i32, i32
  }
  func.func @transform_4(%arg0: i32, %arg1: i32, %arg2: i32) -> (i32, i32) {
    %c0_i32 = arith.constant 0 : i32
    %c0_i32_0 = arith.constant 0 : i32
    return %c0_i32, %arg1 : i32, i32
  }
  func.func @transform_5(%arg0: i32, %arg1: i32, %arg2: i32) -> (i32, i32) {
    %c0_i32 = arith.constant 0 : i32
    return %arg0, %arg1 : i32, i32
  }
  func.func @transform_6(%arg0: i32, %arg1: i32, %arg2: i32) -> (i32, i32) {
    %c0_i32 = arith.constant 0 : i32
    return %arg0, %arg1 : i32, i32
  }
  func.func @transform_7(%arg0: i32, %arg1: i32, %arg2: i32) -> (i32, i32) {
    %c0_i32 = arith.constant 0 : i32
    return %arg0, %arg1 : i32, i32
  }
}

module attributes {stable_mosaic.version = 11 : i64} {
  func.func @kernel(%arg0: i32, %arg1: i32, %arg2: i32, %arg3: memref<256x128xbf16, #tpu.memory_space<vmem>>, %arg4: memref<128x128xbf16, #tpu.memory_space<vmem>>, %arg5: memref<1x128xf32, #tpu.memory_space<vmem>>, %arg6: memref<256x128xbf16, #tpu.memory_space<vmem>>, %arg7: memref<256x128xf32, #tpu.memory_space<vmem>>) attributes {dimension_semantics = [#tpu.dimension_semantics<parallel>, #tpu.dimension_semantics<parallel>, #tpu.dimension_semantics<arbitrary>], iteration_bounds = array<i64: 2, 1, 1>, scalar_prefetch = 0 : i64, scratch_operands = 1 : i64, tpu.core_type = #tpu.core_type<tc>, window_params = [{transform_indices = @transform_0, window_bounds = array<i64: 256, 128>}, {transform_indices = @transform_1, window_bounds = array<i64: 128, 128>}, {transform_indices = @transform_2, window_bounds = array<i64: 1, 128>}, {transform_indices = @transform_3, window_bounds = array<i64: 256, 128>}]} {
    %c0_i32 = arith.constant 0 : i32
    %0 = arith.cmpi eq, %arg2, %c0_i32 : i32
    %1 = arith.extui %0 : i1 to i32
    %c0_i32_0 = arith.constant 0 : i32
    %2 = arith.cmpi ne, %1, %c0_i32_0 : i32
    scf.if %2 {
      %cst_10 = arith.constant 0.000000e+00 : f32
      %12 = vector.broadcast %cst_10 : f32 to vector<256x128xf32>
      %c0_11 = arith.constant 0 : index
      %c0_12 = arith.constant 0 : index
      %13 = vector.load %arg7[%c0_11, %c0_12] : memref<256x128xf32, #tpu.memory_space<vmem>>, vector<256x128xf32>
      tpu.vector_store %arg7[%c0_11, %c0_12], %12 {strides = array<i32>} : memref<256x128xf32, #tpu.memory_space<vmem>>, vector<256x128xf32>,
    } else {
    }
    %c0 = arith.constant 0 : index
    %c0_1 = arith.constant 0 : index
    %3 = vector.load %arg3[%c0, %c0_1] : memref<256x128xbf16, #tpu.memory_space<vmem>>, vector<256x128xbf16>
    %c0_2 = arith.constant 0 : index
    %c0_3 = arith.constant 0 : index
    %4 = vector.load %arg7[%c0_2, %c0_3] : memref<256x128xf32, #tpu.memory_space<vmem>>, vector<256x128xf32>
    %c0_4 = arith.constant 0 : index
    %c0_5 = arith.constant 0 : index
    %5 = vector.load %arg4[%c0_4, %c0_5] : memref<128x128xbf16, #tpu.memory_space<vmem>>, vector<128x128xbf16>
    %cst = arith.constant dense<0.000000e+00> : vector<256x128xf32>
    %6 = tpu.matmul %3, %5, %cst {dimension_numbers = #tpu.dot_dimension_numbers<[1], [0], [0], [1], [0, 0, 1, 1], [], []>} : vector<256x128xbf16>, vector<128x128xbf16>, vector<256x128xf32> -> vector<256x128xf32>
    %7 = arith.addf %4, %6 : vector<256x128xf32>
    %c0_6 = arith.constant 0 : index
    %c0_7 = arith.constant 0 : index
    %8 = vector.load %arg7[%c0_6, %c0_7] : memref<256x128xf32, #tpu.memory_space<vmem>>, vector<256x128xf32>
    tpu.vector_store %arg7[%c0_6, %c0_7], %7 {strides = array<i32>} : memref<256x128xf32, #tpu.memory_space<vmem>>, vector<256x128xf32>,
    %c0_i32_8 = arith.constant 0 : i32
    %9 = arith.cmpi eq, %arg2, %c0_i32_8 : i32
    %10 = arith.extui %9 : i1 to i32
    %c0_i32_9 = arith.constant 0 : i32
    %11 = arith.cmpi ne, %10, %c0_i32_9 : i32
    scf.if %11 {
      %c0_10 = arith.constant 0 : index
      %c0_11 = arith.constant 0 : index
      %12 = vector.load %arg7[%c0_10, %c0_11] : memref<256x128xf32, #tpu.memory_space<vmem>>, vector<256x128xf32>
      %c0_12 = arith.constant 0 : index
      %c0_13 = arith.constant 0 : index
      %13 = vector.load %arg5[%c0_12, %c0_13] : memref<1x128xf32, #tpu.memory_space<vmem>>, vector<1x128xf32>
      %14 = vector.broadcast %13 : vector<1x128xf32> to vector<256x128xf32>
      %15 = arith.addf %12, %14 : vector<256x128xf32>
      %16 = arith.truncf %15 : vector<256x128xf32> to vector<256x128xbf16>
      %c0_14 = arith.constant 0 : index
      %c0_15 = arith.constant 0 : index
      %17 = vector.load %arg6[%c0_14, %c0_15] : memref<256x128xbf16, #tpu.memory_space<vmem>>, vector<256x128xbf16>
      tpu.vector_store %arg6[%c0_14, %c0_15], %16 {strides = array<i32>} : memref<256x128xbf16, #tpu.memory_space<vmem>>, vector<256x128xbf16>,
    } else {
    }
    return
  }
  func.func @transform_0(%arg0: i32, %arg1: i32, %arg2: i32) -> (i32, i32) {
    %c0_i32 = arith.constant 0 : i32
    return %arg0, %arg2 : i32, i32
  }
  func.func @transform_1(%arg0: i32, %arg1: i32, %arg2: i32) -> (i32, i32) {
    %c0_i32 = arith.constant 0 : i32
    return %arg2, %arg1 : i32, i32
  }
  func.func @transform_2(%arg0: i32, %arg1: i32, %arg2: i32) -> (i32, i32) {
    %c0_i32 = arith.constant 0 : i32
    %c0_i32_0 = arith.constant 0 : i32
    return %c0_i32, %arg1 : i32, i32
  }
  func.func @transform_3(%arg0: i32, %arg1: i32, %arg2: i32) -> (i32, i32) {
    %c0_i32 = arith.constant 0 : i32
    return %arg0, %arg1 : i32, i32
  }
}

module attributes {stable_mosaic.version = 11 : i64} {
  func.func @kernel(%arg0: i32, %arg1: i32, %arg2: i32, %arg3: memref<256x256xbf16, #tpu.memory_space<vmem>>, %arg4: memref<256x128xbf16, #tpu.memory_space<vmem>>, %arg5: memref<1x256xbf16, #tpu.memory_space<vmem>>, %arg6: memref<1x256xbf16, #tpu.memory_space<vmem>>, %arg7: memref<1x128xf32, #tpu.memory_space<vmem>>, %arg8: memref<256x128xbf16, #tpu.memory_space<vmem>>, %arg9: memref<256x128xbf16, #tpu.memory_space<vmem>>, %arg10: memref<8x128xf32, #tpu.memory_space<vmem>>, %arg11: memref<8x128xf32, #tpu.memory_space<vmem>>, %arg12: memref<256x128xf32, #tpu.memory_space<vmem>>) attributes {dimension_semantics = [#tpu.dimension_semantics<parallel>, #tpu.dimension_semantics<parallel>, #tpu.dimension_semantics<arbitrary>], iteration_bounds = array<i64: 2, 1, 1>, scalar_prefetch = 0 : i64, scratch_operands = 1 : i64, tpu.core_type = #tpu.core_type<tc>, window_params = [{transform_indices = @transform_0, window_bounds = array<i64: 256, 256>}, {transform_indices = @transform_1, window_bounds = array<i64: 256, 128>}, {transform_indices = @transform_2, window_bounds = array<i64: 1, 256>}, {transform_indices = @transform_3, window_bounds = array<i64: 1, 256>}, {transform_indices = @transform_4, window_bounds = array<i64: 1, 128>}, {transform_indices = @transform_5, window_bounds = array<i64: 256, 128>}, {transform_indices = @transform_6, window_bounds = array<i64: 256, 128>}, {transform_indices = @transform_7, window_bounds = array<i64: 8, 128>}, {transform_indices = @transform_8, window_bounds = array<i64: 8, 128>}]} {
    %c0_i32 = arith.constant 0 : i32
    %0 = arith.cmpi eq, %arg2, %c0_i32 : i32
    %1 = arith.extui %0 : i1 to i32
    %c0_i32_0 = arith.constant 0 : i32
    %2 = arith.cmpi ne, %1, %c0_i32_0 : i32
    scf.if %2 {
      %cst_15 = arith.constant 0.000000e+00 : f32
      %20 = vector.broadcast %cst_15 : f32 to vector<256x128xf32>
      %c0_16 = arith.constant 0 : index
      %c0_17 = arith.constant 0 : index
      %21 = vector.load %arg12[%c0_16, %c0_17] : memref<256x128xf32, #tpu.memory_space<vmem>>, vector<256x128xf32>
      tpu.vector_store %arg12[%c0_16, %c0_17], %20 {strides = array<i32>} : memref<256x128xf32, #tpu.memory_space<vmem>>, vector<256x128xf32>,
    } else {
    }
    %c0 = arith.constant 0 : index
    %c0_1 = arith.constant 0 : index
    %3 = vector.load %arg3[%c0, %c0_1] : memref<256x256xbf16, #tpu.memory_space<vmem>>, vector<256x256xbf16>
    %c0_2 = arith.constant 0 : index
    %c0_3 = arith.constant 0 : index
    %4 = vector.load %arg5[%c0_2, %c0_3] : memref<1x256xbf16, #tpu.memory_space<vmem>>, vector<1x256xbf16>
    %5 = vector.broadcast %4 : vector<1x256xbf16> to vector<256x256xbf16>
    %6 = arith.mulf %3, %5 : vector<256x256xbf16>
    %c0_4 = arith.constant 0 : index
    %c0_5 = arith.constant 0 : index
    %7 = vector.load %arg6[%c0_4, %c0_5] : memref<1x256xbf16, #tpu.memory_space<vmem>>, vector<1x256xbf16>
    %8 = vector.broadcast %7 : vector<1x256xbf16> to vector<256x256xbf16>
    %9 = arith.addf %6, %8 : vector<256x256xbf16>
    %cst = arith.constant 0.000000e+00 : bf16
    %10 = vector.broadcast %cst : bf16 to vector<256x256xbf16>
    %11 = arith.maximumf %9, %10 : vector<256x256xbf16>
    %c0_6 = arith.constant 0 : index
    %c0_7 = arith.constant 0 : index
    %12 = vector.load %arg12[%c0_6, %c0_7] : memref<256x128xf32, #tpu.memory_space<vmem>>, vector<256x128xf32>
    %c0_8 = arith.constant 0 : index
    %c0_9 = arith.constant 0 : index
    %13 = vector.load %arg4[%c0_8, %c0_9] : memref<256x128xbf16, #tpu.memory_space<vmem>>, vector<256x128xbf16>
    %cst_10 = arith.constant dense<0.000000e+00> : vector<256x128xf32>
    %14 = tpu.matmul %11, %13, %cst_10 {dimension_numbers = #tpu.dot_dimension_numbers<[1], [0], [0], [1], [0, 0, 1, 1], [], []>} : vector<256x256xbf16>, vector<256x128xbf16>, vector<256x128xf32> -> vector<256x128xf32>
    %15 = arith.addf %12, %14 : vector<256x128xf32>
    %c0_11 = arith.constant 0 : index
    %c0_12 = arith.constant 0 : index
    %16 = vector.load %arg12[%c0_11, %c0_12] : memref<256x128xf32, #tpu.memory_space<vmem>>, vector<256x128xf32>
    tpu.vector_store %arg12[%c0_11, %c0_12], %15 {strides = array<i32>} : memref<256x128xf32, #tpu.memory_space<vmem>>, vector<256x128xf32>,
    %c0_i32_13 = arith.constant 0 : i32
    %17 = arith.cmpi eq, %arg2, %c0_i32_13 : i32
    %18 = arith.extui %17 : i1 to i32
    %c0_i32_14 = arith.constant 0 : i32
    %19 = arith.cmpi ne, %18, %c0_i32_14 : i32
    scf.if %19 {
      %c0_15 = arith.constant 0 : index
      %c0_16 = arith.constant 0 : index
      %20 = vector.load %arg12[%c0_15, %c0_16] : memref<256x128xf32, #tpu.memory_space<vmem>>, vector<256x128xf32>
      %c0_17 = arith.constant 0 : index
      %c0_18 = arith.constant 0 : index
      %21 = vector.load %arg7[%c0_17, %c0_18] : memref<1x128xf32, #tpu.memory_space<vmem>>, vector<1x128xf32>
      %22 = vector.broadcast %21 : vector<1x128xf32> to vector<256x128xf32>
      %23 = arith.addf %20, %22 : vector<256x128xf32>
      %c0_19 = arith.constant 0 : index
      %c0_20 = arith.constant 0 : index
      %24 = vector.load %arg8[%c0_19, %c0_20] : memref<256x128xbf16, #tpu.memory_space<vmem>>, vector<256x128xbf16>
      %25 = arith.extf %24 : vector<256x128xbf16> to vector<256x128xf32>
      %26 = arith.addf %23, %25 : vector<256x128xf32>
      %cst_21 = arith.constant dense<0.000000e+00> : vector<128xf32>
      %27 = vector.multi_reduction <add>, %26, %cst_21 [0] : vector<256x128xf32> to vector<128xf32>
      %28 = vector.shape_cast %27 : vector<128xf32> to vector<1x128xf32>
      %29 = arith.mulf %26, %26 : vector<256x128xf32>
      %cst_22 = arith.constant dense<0.000000e+00> : vector<128xf32>
      %30 = vector.multi_reduction <add>, %29, %cst_22 [0] : vector<256x128xf32> to vector<128xf32>
      %31 = vector.shape_cast %30 : vector<128xf32> to vector<1x128xf32>
      %32 = vector.shape_cast %28 : vector<1x128xf32> to vector<1x128xf32>
      %33 = vector.broadcast %32 : vector<1x128xf32> to vector<8x128xf32>
      %c0_23 = arith.constant 0 : index
      %c0_24 = arith.constant 0 : index
      %34 = vector.load %arg10[%c0_23, %c0_24] : memref<8x128xf32, #tpu.memory_space<vmem>>, vector<8x128xf32>
      tpu.vector_store %arg10[%c0_23, %c0_24], %33 {strides = array<i32>} : memref<8x128xf32, #tpu.memory_space<vmem>>, vector<8x128xf32>,
      %35 = vector.shape_cast %31 : vector<1x128xf32> to vector<1x128xf32>
      %36 = vector.broadcast %35 : vector<1x128xf32> to vector<8x128xf32>
      %c0_25 = arith.constant 0 : index
      %c0_26 = arith.constant 0 : index
      %37 = vector.load %arg11[%c0_25, %c0_26] : memref<8x128xf32, #tpu.memory_space<vmem>>, vector<8x128xf32>
      tpu.vector_store %arg11[%c0_25, %c0_26], %36 {strides = array<i32>} : memref<8x128xf32, #tpu.memory_space<vmem>>, vector<8x128xf32>,
      %38 = arith.truncf %26 : vector<256x128xf32> to vector<256x128xbf16>
      %c0_27 = arith.constant 0 : index
      %c0_28 = arith.constant 0 : index
      %39 = vector.load %arg9[%c0_27, %c0_28] : memref<256x128xbf16, #tpu.memory_space<vmem>>, vector<256x128xbf16>
      tpu.vector_store %arg9[%c0_27, %c0_28], %38 {strides = array<i32>} : memref<256x128xbf16, #tpu.memory_space<vmem>>, vector<256x128xbf16>,
    } else {
    }
    return
  }
  func.func @transform_0(%arg0: i32, %arg1: i32, %arg2: i32) -> (i32, i32) {
    %c0_i32 = arith.constant 0 : i32
    return %arg0, %arg2 : i32, i32
  }
  func.func @transform_1(%arg0: i32, %arg1: i32, %arg2: i32) -> (i32, i32) {
    %c0_i32 = arith.constant 0 : i32
    return %arg2, %arg1 : i32, i32
  }
  func.func @transform_2(%arg0: i32, %arg1: i32, %arg2: i32) -> (i32, i32) {
    %c0_i32 = arith.constant 0 : i32
    %c0_i32_0 = arith.constant 0 : i32
    return %c0_i32, %arg2 : i32, i32
  }
  func.func @transform_3(%arg0: i32, %arg1: i32, %arg2: i32) -> (i32, i32) {
    %c0_i32 = arith.constant 0 : i32
    %c0_i32_0 = arith.constant 0 : i32
    return %c0_i32, %arg2 : i32, i32
  }
  func.func @transform_4(%arg0: i32, %arg1: i32, %arg2: i32) -> (i32, i32) {
    %c0_i32 = arith.constant 0 : i32
    %c0_i32_0 = arith.constant 0 : i32
    return %c0_i32, %arg1 : i32, i32
  }
  func.func @transform_5(%arg0: i32, %arg1: i32, %arg2: i32) -> (i32, i32) {
    %c0_i32 = arith.constant 0 : i32
    return %arg0, %arg1 : i32, i32
  }
  func.func @transform_6(%arg0: i32, %arg1: i32, %arg2: i32) -> (i32, i32) {
    %c0_i32 = arith.constant 0 : i32
    return %arg0, %arg1 : i32, i32
  }
  func.func @transform_7(%arg0: i32, %arg1: i32, %arg2: i32) -> (i32, i32) {
    %c0_i32 = arith.constant 0 : i32
    return %arg0, %arg1 : i32, i32
  }
  func.func @transform_8(%arg0: i32, %arg1: i32, %arg2: i32) -> (i32, i32) {
    %c0_i32 = arith.constant 0 : i32
    return %arg0, %arg1 : i32, i32
  }
}

module attributes {stable_mosaic.version = 11 : i64} {
  func.func @kernel(%arg0: i32, %arg1: i32, %arg2: i32, %arg3: memref<64x256xbf16, #tpu.memory_space<vmem>>, %arg4: memref<256x128xbf16, #tpu.memory_space<vmem>>, %arg5: memref<1x256xbf16, #tpu.memory_space<vmem>>, %arg6: memref<1x256xbf16, #tpu.memory_space<vmem>>, %arg7: memref<1x128xf32, #tpu.memory_space<vmem>>, %arg8: memref<64x128xbf16, #tpu.memory_space<vmem>>, %arg9: memref<8x128xf32, #tpu.memory_space<vmem>>, %arg10: memref<8x128xf32, #tpu.memory_space<vmem>>, %arg11: memref<64x128xf32, #tpu.memory_space<vmem>>) attributes {dimension_semantics = [#tpu.dimension_semantics<parallel>, #tpu.dimension_semantics<parallel>, #tpu.dimension_semantics<arbitrary>], iteration_bounds = array<i64: 2, 1, 1>, scalar_prefetch = 0 : i64, scratch_operands = 1 : i64, tpu.core_type = #tpu.core_type<tc>, window_params = [{transform_indices = @transform_0, window_bounds = array<i64: 64, 256>}, {transform_indices = @transform_1, window_bounds = array<i64: 256, 128>}, {transform_indices = @transform_2, window_bounds = array<i64: 1, 256>}, {transform_indices = @transform_3, window_bounds = array<i64: 1, 256>}, {transform_indices = @transform_4, window_bounds = array<i64: 1, 128>}, {transform_indices = @transform_5, window_bounds = array<i64: 64, 128>}, {transform_indices = @transform_6, window_bounds = array<i64: 8, 128>}, {transform_indices = @transform_7, window_bounds = array<i64: 8, 128>}]} {
    %c0_i32 = arith.constant 0 : i32
    %0 = arith.cmpi eq, %arg2, %c0_i32 : i32
    %1 = arith.extui %0 : i1 to i32
    %c0_i32_0 = arith.constant 0 : i32
    %2 = arith.cmpi ne, %1, %c0_i32_0 : i32
    scf.if %2 {
      %cst_15 = arith.constant 0.000000e+00 : f32
      %20 = vector.broadcast %cst_15 : f32 to vector<64x128xf32>
      %c0_16 = arith.constant 0 : index
      %c0_17 = arith.constant 0 : index
      %21 = vector.load %arg11[%c0_16, %c0_17] : memref<64x128xf32, #tpu.memory_space<vmem>>, vector<64x128xf32>
      tpu.vector_store %arg11[%c0_16, %c0_17], %20 {strides = array<i32>} : memref<64x128xf32, #tpu.memory_space<vmem>>, vector<64x128xf32>,
    } else {
    }
    %c0 = arith.constant 0 : index
    %c0_1 = arith.constant 0 : index
    %3 = vector.load %arg3[%c0, %c0_1] : memref<64x256xbf16, #tpu.memory_space<vmem>>, vector<64x256xbf16>
    %c0_2 = arith.constant 0 : index
    %c0_3 = arith.constant 0 : index
    %4 = vector.load %arg5[%c0_2, %c0_3] : memref<1x256xbf16, #tpu.memory_space<vmem>>, vector<1x256xbf16>
    %5 = vector.broadcast %4 : vector<1x256xbf16> to vector<64x256xbf16>
    %6 = arith.mulf %3, %5 : vector<64x256xbf16>
    %c0_4 = arith.constant 0 : index
    %c0_5 = arith.constant 0 : index
    %7 = vector.load %arg6[%c0_4, %c0_5] : memref<1x256xbf16, #tpu.memory_space<vmem>>, vector<1x256xbf16>
    %8 = vector.broadcast %7 : vector<1x256xbf16> to vector<64x256xbf16>
    %9 = arith.addf %6, %8 : vector<64x256xbf16>
    %cst = arith.constant 0.000000e+00 : bf16
    %10 = vector.broadcast %cst : bf16 to vector<64x256xbf16>
    %11 = arith.maximumf %9, %10 : vector<64x256xbf16>
    %c0_6 = arith.constant 0 : index
    %c0_7 = arith.constant 0 : index
    %12 = vector.load %arg11[%c0_6, %c0_7] : memref<64x128xf32, #tpu.memory_space<vmem>>, vector<64x128xf32>
    %c0_8 = arith.constant 0 : index
    %c0_9 = arith.constant 0 : index
    %13 = vector.load %arg4[%c0_8, %c0_9] : memref<256x128xbf16, #tpu.memory_space<vmem>>, vector<256x128xbf16>
    %cst_10 = arith.constant dense<0.000000e+00> : vector<64x128xf32>
    %14 = tpu.matmul %11, %13, %cst_10 {dimension_numbers = #tpu.dot_dimension_numbers<[1], [0], [0], [1], [0, 0, 1, 1], [], []>} : vector<64x256xbf16>, vector<256x128xbf16>, vector<64x128xf32> -> vector<64x128xf32>
    %15 = arith.addf %12, %14 : vector<64x128xf32>
    %c0_11 = arith.constant 0 : index
    %c0_12 = arith.constant 0 : index
    %16 = vector.load %arg11[%c0_11, %c0_12] : memref<64x128xf32, #tpu.memory_space<vmem>>, vector<64x128xf32>
    tpu.vector_store %arg11[%c0_11, %c0_12], %15 {strides = array<i32>} : memref<64x128xf32, #tpu.memory_space<vmem>>, vector<64x128xf32>,
    %c0_i32_13 = arith.constant 0 : i32
    %17 = arith.cmpi eq, %arg2, %c0_i32_13 : i32
    %18 = arith.extui %17 : i1 to i32
    %c0_i32_14 = arith.constant 0 : i32
    %19 = arith.cmpi ne, %18, %c0_i32_14 : i32
    scf.if %19 {
      %c0_15 = arith.constant 0 : index
      %c0_16 = arith.constant 0 : index
      %20 = vector.load %arg11[%c0_15, %c0_16] : memref<64x128xf32, #tpu.memory_space<vmem>>, vector<64x128xf32>
      %c0_17 = arith.constant 0 : index
      %c0_18 = arith.constant 0 : index
      %21 = vector.load %arg7[%c0_17, %c0_18] : memref<1x128xf32, #tpu.memory_space<vmem>>, vector<1x128xf32>
      %22 = vector.broadcast %21 : vector<1x128xf32> to vector<64x128xf32>
      %23 = arith.addf %20, %22 : vector<64x128xf32>
      %cst_19 = arith.constant dense<0.000000e+00> : vector<128xf32>
      %24 = vector.multi_reduction <add>, %23, %cst_19 [0] : vector<64x128xf32> to vector<128xf32>
      %25 = vector.shape_cast %24 : vector<128xf32> to vector<1x128xf32>
      %26 = arith.mulf %23, %23 : vector<64x128xf32>
      %cst_20 = arith.constant dense<0.000000e+00> : vector<128xf32>
      %27 = vector.multi_reduction <add>, %26, %cst_20 [0] : vector<64x128xf32> to vector<128xf32>
      %28 = vector.shape_cast %27 : vector<128xf32> to vector<1x128xf32>
      %29 = vector.shape_cast %25 : vector<1x128xf32> to vector<1x128xf32>
      %30 = vector.broadcast %29 : vector<1x128xf32> to vector<8x128xf32>
      %c0_21 = arith.constant 0 : index
      %c0_22 = arith.constant 0 : index
      %31 = vector.load %arg9[%c0_21, %c0_22] : memref<8x128xf32, #tpu.memory_space<vmem>>, vector<8x128xf32>
      tpu.vector_store %arg9[%c0_21, %c0_22], %30 {strides = array<i32>} : memref<8x128xf32, #tpu.memory_space<vmem>>, vector<8x128xf32>,
      %32 = vector.shape_cast %28 : vector<1x128xf32> to vector<1x128xf32>
      %33 = vector.broadcast %32 : vector<1x128xf32> to vector<8x128xf32>
      %c0_23 = arith.constant 0 : index
      %c0_24 = arith.constant 0 : index
      %34 = vector.load %arg10[%c0_23, %c0_24] : memref<8x128xf32, #tpu.memory_space<vmem>>, vector<8x128xf32>
      tpu.vector_store %arg10[%c0_23, %c0_24], %33 {strides = array<i32>} : memref<8x128xf32, #tpu.memory_space<vmem>>, vector<8x128xf32>,
      %35 = arith.truncf %23 : vector<64x128xf32> to vector<64x128xbf16>
      %c0_25 = arith.constant 0 : index
      %c0_26 = arith.constant 0 : index
      %36 = vector.load %arg8[%c0_25, %c0_26] : memref<64x128xbf16, #tpu.memory_space<vmem>>, vector<64x128xbf16>
      tpu.vector_store %arg8[%c0_25, %c0_26], %35 {strides = array<i32>} : memref<64x128xbf16, #tpu.memory_space<vmem>>, vector<64x128xbf16>,
    } else {
    }
    return
  }
  func.func @transform_0(%arg0: i32, %arg1: i32, %arg2: i32) -> (i32, i32) {
    %c0_i32 = arith.constant 0 : i32
    return %arg0, %arg2 : i32, i32
  }
  func.func @transform_1(%arg0: i32, %arg1: i32, %arg2: i32) -> (i32, i32) {
    %c0_i32 = arith.constant 0 : i32
    return %arg2, %arg1 : i32, i32
  }
  func.func @transform_2(%arg0: i32, %arg1: i32, %arg2: i32) -> (i32, i32) {
    %c0_i32 = arith.constant 0 : i32
    %c0_i32_0 = arith.constant 0 : i32
    return %c0_i32, %arg2 : i32, i32
  }
  func.func @transform_3(%arg0: i32, %arg1: i32, %arg2: i32) -> (i32, i32) {
    %c0_i32 = arith.constant 0 : i32
    %c0_i32_0 = arith.constant 0 : i32
    return %c0_i32, %arg2 : i32, i32
  }
  func.func @transform_4(%arg0: i32, %arg1: i32, %arg2: i32) -> (i32, i32) {
    %c0_i32 = arith.constant 0 : i32
    %c0_i32_0 = arith.constant 0 : i32
    return %c0_i32, %arg1 : i32, i32
  }
  func.func @transform_5(%arg0: i32, %arg1: i32, %arg2: i32) -> (i32, i32) {
    %c0_i32 = arith.constant 0 : i32
    return %arg0, %arg1 : i32, i32
  }
  func.func @transform_6(%arg0: i32, %arg1: i32, %arg2: i32) -> (i32, i32) {
    %c0_i32 = arith.constant 0 : i32
    return %arg0, %arg1 : i32, i32
  }
  func.func @transform_7(%arg0: i32, %arg1: i32, %arg2: i32) -> (i32, i32) {
    %c0_i32 = arith.constant 0 : i32
    return %arg0, %arg1 : i32, i32
  }
}

module attributes {stable_mosaic.version = 11 : i64} {
  func.func @kernel(%arg0: i32, %arg1: i32, %arg2: i32, %arg3: memref<64x128xbf16, #tpu.memory_space<vmem>>, %arg4: memref<128x128xbf16, #tpu.memory_space<vmem>>, %arg5: memref<1x128xf32, #tpu.memory_space<vmem>>, %arg6: memref<64x128xbf16, #tpu.memory_space<vmem>>, %arg7: memref<64x128xf32, #tpu.memory_space<vmem>>) attributes {dimension_semantics = [#tpu.dimension_semantics<parallel>, #tpu.dimension_semantics<parallel>, #tpu.dimension_semantics<arbitrary>], iteration_bounds = array<i64: 2, 1, 1>, scalar_prefetch = 0 : i64, scratch_operands = 1 : i64, tpu.core_type = #tpu.core_type<tc>, window_params = [{transform_indices = @transform_0, window_bounds = array<i64: 64, 128>}, {transform_indices = @transform_1, window_bounds = array<i64: 128, 128>}, {transform_indices = @transform_2, window_bounds = array<i64: 1, 128>}, {transform_indices = @transform_3, window_bounds = array<i64: 64, 128>}]} {
    %c0_i32 = arith.constant 0 : i32
    %0 = arith.cmpi eq, %arg2, %c0_i32 : i32
    %1 = arith.extui %0 : i1 to i32
    %c0_i32_0 = arith.constant 0 : i32
    %2 = arith.cmpi ne, %1, %c0_i32_0 : i32
    scf.if %2 {
      %cst_10 = arith.constant 0.000000e+00 : f32
      %12 = vector.broadcast %cst_10 : f32 to vector<64x128xf32>
      %c0_11 = arith.constant 0 : index
      %c0_12 = arith.constant 0 : index
      %13 = vector.load %arg7[%c0_11, %c0_12] : memref<64x128xf32, #tpu.memory_space<vmem>>, vector<64x128xf32>
      tpu.vector_store %arg7[%c0_11, %c0_12], %12 {strides = array<i32>} : memref<64x128xf32, #tpu.memory_space<vmem>>, vector<64x128xf32>,
    } else {
    }
    %c0 = arith.constant 0 : index
    %c0_1 = arith.constant 0 : index
    %3 = vector.load %arg3[%c0, %c0_1] : memref<64x128xbf16, #tpu.memory_space<vmem>>, vector<64x128xbf16>
    %c0_2 = arith.constant 0 : index
    %c0_3 = arith.constant 0 : index
    %4 = vector.load %arg7[%c0_2, %c0_3] : memref<64x128xf32, #tpu.memory_space<vmem>>, vector<64x128xf32>
    %c0_4 = arith.constant 0 : index
    %c0_5 = arith.constant 0 : index
    %5 = vector.load %arg4[%c0_4, %c0_5] : memref<128x128xbf16, #tpu.memory_space<vmem>>, vector<128x128xbf16>
    %cst = arith.constant dense<0.000000e+00> : vector<64x128xf32>
    %6 = tpu.matmul %3, %5, %cst {dimension_numbers = #tpu.dot_dimension_numbers<[1], [0], [0], [1], [0, 0, 1, 1], [], []>} : vector<64x128xbf16>, vector<128x128xbf16>, vector<64x128xf32> -> vector<64x128xf32>
    %7 = arith.addf %4, %6 : vector<64x128xf32>
    %c0_6 = arith.constant 0 : index
    %c0_7 = arith.constant 0 : index
    %8 = vector.load %arg7[%c0_6, %c0_7] : memref<64x128xf32, #tpu.memory_space<vmem>>, vector<64x128xf32>
    tpu.vector_store %arg7[%c0_6, %c0_7], %7 {strides = array<i32>} : memref<64x128xf32, #tpu.memory_space<vmem>>, vector<64x128xf32>,
    %c0_i32_8 = arith.constant 0 : i32
    %9 = arith.cmpi eq, %arg2, %c0_i32_8 : i32
    %10 = arith.extui %9 : i1 to i32
    %c0_i32_9 = arith.constant 0 : i32
    %11 = arith.cmpi ne, %10, %c0_i32_9 : i32
    scf.if %11 {
      %c0_10 = arith.constant 0 : index
      %c0_11 = arith.constant 0 : index
      %12 = vector.load %arg7[%c0_10, %c0_11] : memref<64x128xf32, #tpu.memory_space<vmem>>, vector<64x128xf32>
      %c0_12 = arith.constant 0 : index
      %c0_13 = arith.constant 0 : index
      %13 = vector.load %arg5[%c0_12, %c0_13] : memref<1x128xf32, #tpu.memory_space<vmem>>, vector<1x128xf32>
      %14 = vector.broadcast %13 : vector<1x128xf32> to vector<64x128xf32>
      %15 = arith.addf %12, %14 : vector<64x128xf32>
      %16 = arith.truncf %15 : vector<64x128xf32> to vector<64x128xbf16>
      %c0_14 = arith.constant 0 : index
      %c0_15 = arith.constant 0 : index
      %17 = vector.load %arg6[%c0_14, %c0_15] : memref<64x128xbf16, #tpu.memory_space<vmem>>, vector<64x128xbf16>
      tpu.vector_store %arg6[%c0_14, %c0_15], %16 {strides = array<i32>} : memref<64x128xbf16, #tpu.memory_space<vmem>>, vector<64x128xbf16>,
    } else {
    }
    return
  }
  func.func @transform_0(%arg0: i32, %arg1: i32, %arg2: i32) -> (i32, i32) {
    %c0_i32 = arith.constant 0 : i32
    return %arg0, %arg2 : i32, i32
  }
  func.func @transform_1(%arg0: i32, %arg1: i32, %arg2: i32) -> (i32, i32) {
    %c0_i32 = arith.constant 0 : i32
    return %arg2, %arg1 : i32, i32
  }
  func.func @transform_2(%arg0: i32, %arg1: i32, %arg2: i32) -> (i32, i32) {
    %c0_i32 = arith.constant 0 : i32
    %c0_i32_0 = arith.constant 0 : i32
    return %c0_i32, %arg1 : i32, i32
  }
  func.func @transform_3(%arg0: i32, %arg1: i32, %arg2: i32) -> (i32, i32) {
    %c0_i32 = arith.constant 0 : i32
    return %arg0, %arg1 : i32, i32
  }
}

module attributes {stable_mosaic.version = 11 : i64} {
  func.func @kernel(%arg0: i32, %arg1: i32, %arg2: i32, %arg3: memref<64x384xbf16, #tpu.memory_space<vmem>>, %arg4: memref<384x128xbf16, #tpu.memory_space<vmem>>, %arg5: memref<1x384xbf16, #tpu.memory_space<vmem>>, %arg6: memref<1x384xbf16, #tpu.memory_space<vmem>>, %arg7: memref<1x128xf32, #tpu.memory_space<vmem>>, %arg8: memref<64x128xbf16, #tpu.memory_space<vmem>>, %arg9: memref<64x128xbf16, #tpu.memory_space<vmem>>, %arg10: memref<8x128xf32, #tpu.memory_space<vmem>>, %arg11: memref<8x128xf32, #tpu.memory_space<vmem>>, %arg12: memref<64x128xf32, #tpu.memory_space<vmem>>) attributes {dimension_semantics = [#tpu.dimension_semantics<parallel>, #tpu.dimension_semantics<parallel>, #tpu.dimension_semantics<arbitrary>], iteration_bounds = array<i64: 2, 1, 1>, scalar_prefetch = 0 : i64, scratch_operands = 1 : i64, tpu.core_type = #tpu.core_type<tc>, window_params = [{transform_indices = @transform_0, window_bounds = array<i64: 64, 384>}, {transform_indices = @transform_1, window_bounds = array<i64: 384, 128>}, {transform_indices = @transform_2, window_bounds = array<i64: 1, 384>}, {transform_indices = @transform_3, window_bounds = array<i64: 1, 384>}, {transform_indices = @transform_4, window_bounds = array<i64: 1, 128>}, {transform_indices = @transform_5, window_bounds = array<i64: 64, 128>}, {transform_indices = @transform_6, window_bounds = array<i64: 64, 128>}, {transform_indices = @transform_7, window_bounds = array<i64: 8, 128>}, {transform_indices = @transform_8, window_bounds = array<i64: 8, 128>}]} {
    %c0_i32 = arith.constant 0 : i32
    %0 = arith.cmpi eq, %arg2, %c0_i32 : i32
    %1 = arith.extui %0 : i1 to i32
    %c0_i32_0 = arith.constant 0 : i32
    %2 = arith.cmpi ne, %1, %c0_i32_0 : i32
    scf.if %2 {
      %cst_15 = arith.constant 0.000000e+00 : f32
      %20 = vector.broadcast %cst_15 : f32 to vector<64x128xf32>
      %c0_16 = arith.constant 0 : index
      %c0_17 = arith.constant 0 : index
      %21 = vector.load %arg12[%c0_16, %c0_17] : memref<64x128xf32, #tpu.memory_space<vmem>>, vector<64x128xf32>
      tpu.vector_store %arg12[%c0_16, %c0_17], %20 {strides = array<i32>} : memref<64x128xf32, #tpu.memory_space<vmem>>, vector<64x128xf32>,
    } else {
    }
    %c0 = arith.constant 0 : index
    %c0_1 = arith.constant 0 : index
    %3 = vector.load %arg3[%c0, %c0_1] : memref<64x384xbf16, #tpu.memory_space<vmem>>, vector<64x384xbf16>
    %c0_2 = arith.constant 0 : index
    %c0_3 = arith.constant 0 : index
    %4 = vector.load %arg5[%c0_2, %c0_3] : memref<1x384xbf16, #tpu.memory_space<vmem>>, vector<1x384xbf16>
    %5 = vector.broadcast %4 : vector<1x384xbf16> to vector<64x384xbf16>
    %6 = arith.mulf %3, %5 : vector<64x384xbf16>
    %c0_4 = arith.constant 0 : index
    %c0_5 = arith.constant 0 : index
    %7 = vector.load %arg6[%c0_4, %c0_5] : memref<1x384xbf16, #tpu.memory_space<vmem>>, vector<1x384xbf16>
    %8 = vector.broadcast %7 : vector<1x384xbf16> to vector<64x384xbf16>
    %9 = arith.addf %6, %8 : vector<64x384xbf16>
    %cst = arith.constant 0.000000e+00 : bf16
    %10 = vector.broadcast %cst : bf16 to vector<64x384xbf16>
    %11 = arith.maximumf %9, %10 : vector<64x384xbf16>
    %c0_6 = arith.constant 0 : index
    %c0_7 = arith.constant 0 : index
    %12 = vector.load %arg12[%c0_6, %c0_7] : memref<64x128xf32, #tpu.memory_space<vmem>>, vector<64x128xf32>
    %c0_8 = arith.constant 0 : index
    %c0_9 = arith.constant 0 : index
    %13 = vector.load %arg4[%c0_8, %c0_9] : memref<384x128xbf16, #tpu.memory_space<vmem>>, vector<384x128xbf16>
    %cst_10 = arith.constant dense<0.000000e+00> : vector<64x128xf32>
    %14 = tpu.matmul %11, %13, %cst_10 {dimension_numbers = #tpu.dot_dimension_numbers<[1], [0], [0], [1], [0, 0, 1, 1], [], []>} : vector<64x384xbf16>, vector<384x128xbf16>, vector<64x128xf32> -> vector<64x128xf32>
    %15 = arith.addf %12, %14 : vector<64x128xf32>
    %c0_11 = arith.constant 0 : index
    %c0_12 = arith.constant 0 : index
    %16 = vector.load %arg12[%c0_11, %c0_12] : memref<64x128xf32, #tpu.memory_space<vmem>>, vector<64x128xf32>
    tpu.vector_store %arg12[%c0_11, %c0_12], %15 {strides = array<i32>} : memref<64x128xf32, #tpu.memory_space<vmem>>, vector<64x128xf32>,
    %c0_i32_13 = arith.constant 0 : i32
    %17 = arith.cmpi eq, %arg2, %c0_i32_13 : i32
    %18 = arith.extui %17 : i1 to i32
    %c0_i32_14 = arith.constant 0 : i32
    %19 = arith.cmpi ne, %18, %c0_i32_14 : i32
    scf.if %19 {
      %c0_15 = arith.constant 0 : index
      %c0_16 = arith.constant 0 : index
      %20 = vector.load %arg12[%c0_15, %c0_16] : memref<64x128xf32, #tpu.memory_space<vmem>>, vector<64x128xf32>
      %c0_17 = arith.constant 0 : index
      %c0_18 = arith.constant 0 : index
      %21 = vector.load %arg7[%c0_17, %c0_18] : memref<1x128xf32, #tpu.memory_space<vmem>>, vector<1x128xf32>
      %22 = vector.broadcast %21 : vector<1x128xf32> to vector<64x128xf32>
      %23 = arith.addf %20, %22 : vector<64x128xf32>
      %c0_19 = arith.constant 0 : index
      %c0_20 = arith.constant 0 : index
      %24 = vector.load %arg8[%c0_19, %c0_20] : memref<64x128xbf16, #tpu.memory_space<vmem>>, vector<64x128xbf16>
      %25 = arith.extf %24 : vector<64x128xbf16> to vector<64x128xf32>
      %26 = arith.addf %23, %25 : vector<64x128xf32>
      %cst_21 = arith.constant dense<0.000000e+00> : vector<128xf32>
      %27 = vector.multi_reduction <add>, %26, %cst_21 [0] : vector<64x128xf32> to vector<128xf32>
      %28 = vector.shape_cast %27 : vector<128xf32> to vector<1x128xf32>
      %29 = arith.mulf %26, %26 : vector<64x128xf32>
      %cst_22 = arith.constant dense<0.000000e+00> : vector<128xf32>
      %30 = vector.multi_reduction <add>, %29, %cst_22 [0] : vector<64x128xf32> to vector<128xf32>
      %31 = vector.shape_cast %30 : vector<128xf32> to vector<1x128xf32>
      %32 = vector.shape_cast %28 : vector<1x128xf32> to vector<1x128xf32>
      %33 = vector.broadcast %32 : vector<1x128xf32> to vector<8x128xf32>
      %c0_23 = arith.constant 0 : index
      %c0_24 = arith.constant 0 : index
      %34 = vector.load %arg10[%c0_23, %c0_24] : memref<8x128xf32, #tpu.memory_space<vmem>>, vector<8x128xf32>
      tpu.vector_store %arg10[%c0_23, %c0_24], %33 {strides = array<i32>} : memref<8x128xf32, #tpu.memory_space<vmem>>, vector<8x128xf32>,
      %35 = vector.shape_cast %31 : vector<1x128xf32> to vector<1x128xf32>
      %36 = vector.broadcast %35 : vector<1x128xf32> to vector<8x128xf32>
      %c0_25 = arith.constant 0 : index
      %c0_26 = arith.constant 0 : index
      %37 = vector.load %arg11[%c0_25, %c0_26] : memref<8x128xf32, #tpu.memory_space<vmem>>, vector<8x128xf32>
      tpu.vector_store %arg11[%c0_25, %c0_26], %36 {strides = array<i32>} : memref<8x128xf32, #tpu.memory_space<vmem>>, vector<8x128xf32>,
      %38 = arith.truncf %26 : vector<64x128xf32> to vector<64x128xbf16>
      %c0_27 = arith.constant 0 : index
      %c0_28 = arith.constant 0 : index
      %39 = vector.load %arg9[%c0_27, %c0_28] : memref<64x128xbf16, #tpu.memory_space<vmem>>, vector<64x128xbf16>
      tpu.vector_store %arg9[%c0_27, %c0_28], %38 {strides = array<i32>} : memref<64x128xbf16, #tpu.memory_space<vmem>>, vector<64x128xbf16>,
    } else {
    }
    return
  }
  func.func @transform_0(%arg0: i32, %arg1: i32, %arg2: i32) -> (i32, i32) {
    %c0_i32 = arith.constant 0 : i32
    return %arg0, %arg2 : i32, i32
  }
  func.func @transform_1(%arg0: i32, %arg1: i32, %arg2: i32) -> (i32, i32) {
    %c0_i32 = arith.constant 0 : i32
    return %arg2, %arg1 : i32, i32
  }
  func.func @transform_2(%arg0: i32, %arg1: i32, %arg2: i32) -> (i32, i32) {
    %c0_i32 = arith.constant 0 : i32
    %c0_i32_0 = arith.constant 0 : i32
    return %c0_i32, %arg2 : i32, i32
  }
  func.func @transform_3(%arg0: i32, %arg1: i32, %arg2: i32) -> (i32, i32) {
    %c0_i32 = arith.constant 0 : i32
    %c0_i32_0 = arith.constant 0 : i32
    return %c0_i32, %arg2 : i32, i32
  }
  func.func @transform_4(%arg0: i32, %arg1: i32, %arg2: i32) -> (i32, i32) {
    %c0_i32 = arith.constant 0 : i32
    %c0_i32_0 = arith.constant 0 : i32
    return %c0_i32, %arg1 : i32, i32
  }
  func.func @transform_5(%arg0: i32, %arg1: i32, %arg2: i32) -> (i32, i32) {
    %c0_i32 = arith.constant 0 : i32
    return %arg0, %arg1 : i32, i32
  }
  func.func @transform_6(%arg0: i32, %arg1: i32, %arg2: i32) -> (i32, i32) {
    %c0_i32 = arith.constant 0 : i32
    return %arg0, %arg1 : i32, i32
  }
  func.func @transform_7(%arg0: i32, %arg1: i32, %arg2: i32) -> (i32, i32) {
    %c0_i32 = arith.constant 0 : i32
    return %arg0, %arg1 : i32, i32
  }
  func.func @transform_8(%arg0: i32, %arg1: i32, %arg2: i32) -> (i32, i32) {
    %c0_i32 = arith.constant 0 : i32
    return %arg0, %arg1 : i32, i32
  }
}

module attributes {stable_mosaic.version = 11 : i64} {
  func.func @kernel(%arg0: i32, %arg1: i32, %arg2: i32, %arg3: memref<16x384xbf16, #tpu.memory_space<vmem>>, %arg4: memref<384x128xbf16, #tpu.memory_space<vmem>>, %arg5: memref<1x384xbf16, #tpu.memory_space<vmem>>, %arg6: memref<1x384xbf16, #tpu.memory_space<vmem>>, %arg7: memref<1x128xf32, #tpu.memory_space<vmem>>, %arg8: memref<16x128xbf16, #tpu.memory_space<vmem>>, %arg9: memref<8x128xf32, #tpu.memory_space<vmem>>, %arg10: memref<8x128xf32, #tpu.memory_space<vmem>>, %arg11: memref<16x128xf32, #tpu.memory_space<vmem>>) attributes {dimension_semantics = [#tpu.dimension_semantics<parallel>, #tpu.dimension_semantics<parallel>, #tpu.dimension_semantics<arbitrary>], iteration_bounds = array<i64: 2, 1, 1>, scalar_prefetch = 0 : i64, scratch_operands = 1 : i64, tpu.core_type = #tpu.core_type<tc>, window_params = [{transform_indices = @transform_0, window_bounds = array<i64: 16, 384>}, {transform_indices = @transform_1, window_bounds = array<i64: 384, 128>}, {transform_indices = @transform_2, window_bounds = array<i64: 1, 384>}, {transform_indices = @transform_3, window_bounds = array<i64: 1, 384>}, {transform_indices = @transform_4, window_bounds = array<i64: 1, 128>}, {transform_indices = @transform_5, window_bounds = array<i64: 16, 128>}, {transform_indices = @transform_6, window_bounds = array<i64: 8, 128>}, {transform_indices = @transform_7, window_bounds = array<i64: 8, 128>}]} {
    %c0_i32 = arith.constant 0 : i32
    %0 = arith.cmpi eq, %arg2, %c0_i32 : i32
    %1 = arith.extui %0 : i1 to i32
    %c0_i32_0 = arith.constant 0 : i32
    %2 = arith.cmpi ne, %1, %c0_i32_0 : i32
    scf.if %2 {
      %cst_15 = arith.constant 0.000000e+00 : f32
      %20 = vector.broadcast %cst_15 : f32 to vector<16x128xf32>
      %c0_16 = arith.constant 0 : index
      %c0_17 = arith.constant 0 : index
      %21 = vector.load %arg11[%c0_16, %c0_17] : memref<16x128xf32, #tpu.memory_space<vmem>>, vector<16x128xf32>
      tpu.vector_store %arg11[%c0_16, %c0_17], %20 {strides = array<i32>} : memref<16x128xf32, #tpu.memory_space<vmem>>, vector<16x128xf32>,
    } else {
    }
    %c0 = arith.constant 0 : index
    %c0_1 = arith.constant 0 : index
    %3 = vector.load %arg3[%c0, %c0_1] : memref<16x384xbf16, #tpu.memory_space<vmem>>, vector<16x384xbf16>
    %c0_2 = arith.constant 0 : index
    %c0_3 = arith.constant 0 : index
    %4 = vector.load %arg5[%c0_2, %c0_3] : memref<1x384xbf16, #tpu.memory_space<vmem>>, vector<1x384xbf16>
    %5 = vector.broadcast %4 : vector<1x384xbf16> to vector<16x384xbf16>
    %6 = arith.mulf %3, %5 : vector<16x384xbf16>
    %c0_4 = arith.constant 0 : index
    %c0_5 = arith.constant 0 : index
    %7 = vector.load %arg6[%c0_4, %c0_5] : memref<1x384xbf16, #tpu.memory_space<vmem>>, vector<1x384xbf16>
    %8 = vector.broadcast %7 : vector<1x384xbf16> to vector<16x384xbf16>
    %9 = arith.addf %6, %8 : vector<16x384xbf16>
    %cst = arith.constant 0.000000e+00 : bf16
    %10 = vector.broadcast %cst : bf16 to vector<16x384xbf16>
    %11 = arith.maximumf %9, %10 : vector<16x384xbf16>
    %c0_6 = arith.constant 0 : index
    %c0_7 = arith.constant 0 : index
    %12 = vector.load %arg11[%c0_6, %c0_7] : memref<16x128xf32, #tpu.memory_space<vmem>>, vector<16x128xf32>
    %c0_8 = arith.constant 0 : index
    %c0_9 = arith.constant 0 : index
    %13 = vector.load %arg4[%c0_8, %c0_9] : memref<384x128xbf16, #tpu.memory_space<vmem>>, vector<384x128xbf16>
    %cst_10 = arith.constant dense<0.000000e+00> : vector<16x128xf32>
    %14 = tpu.matmul %11, %13, %cst_10 {dimension_numbers = #tpu.dot_dimension_numbers<[1], [0], [0], [1], [0, 0, 1, 1], [], []>} : vector<16x384xbf16>, vector<384x128xbf16>, vector<16x128xf32> -> vector<16x128xf32>
    %15 = arith.addf %12, %14 : vector<16x128xf32>
    %c0_11 = arith.constant 0 : index
    %c0_12 = arith.constant 0 : index
    %16 = vector.load %arg11[%c0_11, %c0_12] : memref<16x128xf32, #tpu.memory_space<vmem>>, vector<16x128xf32>
    tpu.vector_store %arg11[%c0_11, %c0_12], %15 {strides = array<i32>} : memref<16x128xf32, #tpu.memory_space<vmem>>, vector<16x128xf32>,
    %c0_i32_13 = arith.constant 0 : i32
    %17 = arith.cmpi eq, %arg2, %c0_i32_13 : i32
    %18 = arith.extui %17 : i1 to i32
    %c0_i32_14 = arith.constant 0 : i32
    %19 = arith.cmpi ne, %18, %c0_i32_14 : i32
    scf.if %19 {
      %c0_15 = arith.constant 0 : index
      %c0_16 = arith.constant 0 : index
      %20 = vector.load %arg11[%c0_15, %c0_16] : memref<16x128xf32, #tpu.memory_space<vmem>>, vector<16x128xf32>
      %c0_17 = arith.constant 0 : index
      %c0_18 = arith.constant 0 : index
      %21 = vector.load %arg7[%c0_17, %c0_18] : memref<1x128xf32, #tpu.memory_space<vmem>>, vector<1x128xf32>
      %22 = vector.broadcast %21 : vector<1x128xf32> to vector<16x128xf32>
      %23 = arith.addf %20, %22 : vector<16x128xf32>
      %cst_19 = arith.constant dense<0.000000e+00> : vector<128xf32>
      %24 = vector.multi_reduction <add>, %23, %cst_19 [0] : vector<16x128xf32> to vector<128xf32>
      %25 = vector.shape_cast %24 : vector<128xf32> to vector<1x128xf32>
      %26 = arith.mulf %23, %23 : vector<16x128xf32>
      %cst_20 = arith.constant dense<0.000000e+00> : vector<128xf32>
      %27 = vector.multi_reduction <add>, %26, %cst_20 [0] : vector<16x128xf32> to vector<128xf32>
      %28 = vector.shape_cast %27 : vector<128xf32> to vector<1x128xf32>
      %29 = vector.shape_cast %25 : vector<1x128xf32> to vector<1x128xf32>
      %30 = vector.broadcast %29 : vector<1x128xf32> to vector<8x128xf32>
      %c0_21 = arith.constant 0 : index
      %c0_22 = arith.constant 0 : index
      %31 = vector.load %arg9[%c0_21, %c0_22] : memref<8x128xf32, #tpu.memory_space<vmem>>, vector<8x128xf32>
      tpu.vector_store %arg9[%c0_21, %c0_22], %30 {strides = array<i32>} : memref<8x128xf32, #tpu.memory_space<vmem>>, vector<8x128xf32>,
      %32 = vector.shape_cast %28 : vector<1x128xf32> to vector<1x128xf32>
      %33 = vector.broadcast %32 : vector<1x128xf32> to vector<8x128xf32>
      %c0_23 = arith.constant 0 : index
      %c0_24 = arith.constant 0 : index
      %34 = vector.load %arg10[%c0_23, %c0_24] : memref<8x128xf32, #tpu.memory_space<vmem>>, vector<8x128xf32>
      tpu.vector_store %arg10[%c0_23, %c0_24], %33 {strides = array<i32>} : memref<8x128xf32, #tpu.memory_space<vmem>>, vector<8x128xf32>,
      %35 = arith.truncf %23 : vector<16x128xf32> to vector<16x128xbf16>
      %c0_25 = arith.constant 0 : index
      %c0_26 = arith.constant 0 : index
      %36 = vector.load %arg8[%c0_25, %c0_26] : memref<16x128xbf16, #tpu.memory_space<vmem>>, vector<16x128xbf16>
      tpu.vector_store %arg8[%c0_25, %c0_26], %35 {strides = array<i32>} : memref<16x128xbf16, #tpu.memory_space<vmem>>, vector<16x128xbf16>,
    } else {
    }
    return
  }
  func.func @transform_0(%arg0: i32, %arg1: i32, %arg2: i32) -> (i32, i32) {
    %c0_i32 = arith.constant 0 : i32
    return %arg0, %arg2 : i32, i32
  }
  func.func @transform_1(%arg0: i32, %arg1: i32, %arg2: i32) -> (i32, i32) {
    %c0_i32 = arith.constant 0 : i32
    return %arg2, %arg1 : i32, i32
  }
  func.func @transform_2(%arg0: i32, %arg1: i32, %arg2: i32) -> (i32, i32) {
    %c0_i32 = arith.constant 0 : i32
    %c0_i32_0 = arith.constant 0 : i32
    return %c0_i32, %arg2 : i32, i32
  }
  func.func @transform_3(%arg0: i32, %arg1: i32, %arg2: i32) -> (i32, i32) {
    %c0_i32 = arith.constant 0 : i32
    %c0_i32_0 = arith.constant 0 : i32
    return %c0_i32, %arg2 : i32, i32
  }
  func.func @transform_4(%arg0: i32, %arg1: i32, %arg2: i32) -> (i32, i32) {
    %c0_i32 = arith.constant 0 : i32
    %c0_i32_0 = arith.constant 0 : i32
    return %c0_i32, %arg1 : i32, i32
  }
  func.func @transform_5(%arg0: i32, %arg1: i32, %arg2: i32) -> (i32, i32) {
    %c0_i32 = arith.constant 0 : i32
    return %arg0, %arg1 : i32, i32
  }
  func.func @transform_6(%arg0: i32, %arg1: i32, %arg2: i32) -> (i32, i32) {
    %c0_i32 = arith.constant 0 : i32
    return %arg0, %arg1 : i32, i32
  }
  func.func @transform_7(%arg0: i32, %arg1: i32, %arg2: i32) -> (i32, i32) {
    %c0_i32 = arith.constant 0 : i32
    return %arg0, %arg1 : i32, i32
  }
}

module attributes {stable_mosaic.version = 11 : i64} {
  func.func @kernel(%arg0: i32, %arg1: i32, %arg2: i32, %arg3: memref<16x640xbf16, #tpu.memory_space<vmem>>, %arg4: memref<640x128xbf16, #tpu.memory_space<vmem>>, %arg5: memref<1x640xbf16, #tpu.memory_space<vmem>>, %arg6: memref<1x640xbf16, #tpu.memory_space<vmem>>, %arg7: memref<1x128xf32, #tpu.memory_space<vmem>>, %arg8: memref<16x128xbf16, #tpu.memory_space<vmem>>, %arg9: memref<16x128xbf16, #tpu.memory_space<vmem>>, %arg10: memref<16x128xf32, #tpu.memory_space<vmem>>) attributes {dimension_semantics = [#tpu.dimension_semantics<parallel>, #tpu.dimension_semantics<parallel>, #tpu.dimension_semantics<arbitrary>], iteration_bounds = array<i64: 2, 1, 1>, scalar_prefetch = 0 : i64, scratch_operands = 1 : i64, tpu.core_type = #tpu.core_type<tc>, window_params = [{transform_indices = @transform_0, window_bounds = array<i64: 16, 640>}, {transform_indices = @transform_1, window_bounds = array<i64: 640, 128>}, {transform_indices = @transform_2, window_bounds = array<i64: 1, 640>}, {transform_indices = @transform_3, window_bounds = array<i64: 1, 640>}, {transform_indices = @transform_4, window_bounds = array<i64: 1, 128>}, {transform_indices = @transform_5, window_bounds = array<i64: 16, 128>}, {transform_indices = @transform_6, window_bounds = array<i64: 16, 128>}]} {
    %c0_i32 = arith.constant 0 : i32
    %0 = arith.cmpi eq, %arg2, %c0_i32 : i32
    %1 = arith.extui %0 : i1 to i32
    %c0_i32_0 = arith.constant 0 : i32
    %2 = arith.cmpi ne, %1, %c0_i32_0 : i32
    scf.if %2 {
      %cst_15 = arith.constant 0.000000e+00 : f32
      %20 = vector.broadcast %cst_15 : f32 to vector<16x128xf32>
      %c0_16 = arith.constant 0 : index
      %c0_17 = arith.constant 0 : index
      %21 = vector.load %arg10[%c0_16, %c0_17] : memref<16x128xf32, #tpu.memory_space<vmem>>, vector<16x128xf32>
      tpu.vector_store %arg10[%c0_16, %c0_17], %20 {strides = array<i32>} : memref<16x128xf32, #tpu.memory_space<vmem>>, vector<16x128xf32>,
    } else {
    }
    %c0 = arith.constant 0 : index
    %c0_1 = arith.constant 0 : index
    %3 = vector.load %arg3[%c0, %c0_1] : memref<16x640xbf16, #tpu.memory_space<vmem>>, vector<16x640xbf16>
    %c0_2 = arith.constant 0 : index
    %c0_3 = arith.constant 0 : index
    %4 = vector.load %arg5[%c0_2, %c0_3] : memref<1x640xbf16, #tpu.memory_space<vmem>>, vector<1x640xbf16>
    %5 = vector.broadcast %4 : vector<1x640xbf16> to vector<16x640xbf16>
    %6 = arith.mulf %3, %5 : vector<16x640xbf16>
    %c0_4 = arith.constant 0 : index
    %c0_5 = arith.constant 0 : index
    %7 = vector.load %arg6[%c0_4, %c0_5] : memref<1x640xbf16, #tpu.memory_space<vmem>>, vector<1x640xbf16>
    %8 = vector.broadcast %7 : vector<1x640xbf16> to vector<16x640xbf16>
    %9 = arith.addf %6, %8 : vector<16x640xbf16>
    %cst = arith.constant 0.000000e+00 : bf16
    %10 = vector.broadcast %cst : bf16 to vector<16x640xbf16>
    %11 = arith.maximumf %9, %10 : vector<16x640xbf16>
    %c0_6 = arith.constant 0 : index
    %c0_7 = arith.constant 0 : index
    %12 = vector.load %arg10[%c0_6, %c0_7] : memref<16x128xf32, #tpu.memory_space<vmem>>, vector<16x128xf32>
    %c0_8 = arith.constant 0 : index
    %c0_9 = arith.constant 0 : index
    %13 = vector.load %arg4[%c0_8, %c0_9] : memref<640x128xbf16, #tpu.memory_space<vmem>>, vector<640x128xbf16>
    %cst_10 = arith.constant dense<0.000000e+00> : vector<16x128xf32>
    %14 = tpu.matmul %11, %13, %cst_10 {dimension_numbers = #tpu.dot_dimension_numbers<[1], [0], [0], [1], [0, 0, 1, 1], [], []>} : vector<16x640xbf16>, vector<640x128xbf16>, vector<16x128xf32> -> vector<16x128xf32>
    %15 = arith.addf %12, %14 : vector<16x128xf32>
    %c0_11 = arith.constant 0 : index
    %c0_12 = arith.constant 0 : index
    %16 = vector.load %arg10[%c0_11, %c0_12] : memref<16x128xf32, #tpu.memory_space<vmem>>, vector<16x128xf32>
    tpu.vector_store %arg10[%c0_11, %c0_12], %15 {strides = array<i32>} : memref<16x128xf32, #tpu.memory_space<vmem>>, vector<16x128xf32>,
    %c0_i32_13 = arith.constant 0 : i32
    %17 = arith.cmpi eq, %arg2, %c0_i32_13 : i32
    %18 = arith.extui %17 : i1 to i32
    %c0_i32_14 = arith.constant 0 : i32
    %19 = arith.cmpi ne, %18, %c0_i32_14 : i32
    scf.if %19 {
      %c0_15 = arith.constant 0 : index
      %c0_16 = arith.constant 0 : index
      %20 = vector.load %arg10[%c0_15, %c0_16] : memref<16x128xf32, #tpu.memory_space<vmem>>, vector<16x128xf32>
      %c0_17 = arith.constant 0 : index
      %c0_18 = arith.constant 0 : index
      %21 = vector.load %arg7[%c0_17, %c0_18] : memref<1x128xf32, #tpu.memory_space<vmem>>, vector<1x128xf32>
      %22 = vector.broadcast %21 : vector<1x128xf32> to vector<16x128xf32>
      %23 = arith.addf %20, %22 : vector<16x128xf32>
      %c0_19 = arith.constant 0 : index
      %c0_20 = arith.constant 0 : index
      %24 = vector.load %arg8[%c0_19, %c0_20] : memref<16x128xbf16, #tpu.memory_space<vmem>>, vector<16x128xbf16>
      %25 = arith.extf %24 : vector<16x128xbf16> to vector<16x128xf32>
      %26 = arith.addf %23, %25 : vector<16x128xf32>
      %27 = arith.truncf %26 : vector<16x128xf32> to vector<16x128xbf16>
      %c0_21 = arith.constant 0 : index
      %c0_22 = arith.constant 0 : index
      %28 = vector.load %arg9[%c0_21, %c0_22] : memref<16x128xbf16, #tpu.memory_space<vmem>>, vector<16x128xbf16>
      tpu.vector_store %arg9[%c0_21, %c0_22], %27 {strides = array<i32>} : memref<16x128xbf16, #tpu.memory_space<vmem>>, vector<16x128xbf16>,
    } else {
    }
    return
  }
  func.func @transform_0(%arg0: i32, %arg1: i32, %arg2: i32) -> (i32, i32) {
    %c0_i32 = arith.constant 0 : i32
    return %arg0, %arg2 : i32, i32
  }
  func.func @transform_1(%arg0: i32, %arg1: i32, %arg2: i32) -> (i32, i32) {
    %c0_i32 = arith.constant 0 : i32
    return %arg2, %arg1 : i32, i32
  }
  func.func @transform_2(%arg0: i32, %arg1: i32, %arg2: i32) -> (i32, i32) {
    %c0_i32 = arith.constant 0 : i32
    %c0_i32_0 = arith.constant 0 : i32
    return %c0_i32, %arg2 : i32, i32
  }
  func.func @transform_3(%arg0: i32, %arg1: i32, %arg2: i32) -> (i32, i32) {
    %c0_i32 = arith.constant 0 : i32
    %c0_i32_0 = arith.constant 0 : i32
    return %c0_i32, %arg2 : i32, i32
  }
  func.func @transform_4(%arg0: i32, %arg1: i32, %arg2: i32) -> (i32, i32) {
    %c0_i32 = arith.constant 0 : i32
    %c0_i32_0 = arith.constant 0 : i32
    return %c0_i32, %arg1 : i32, i32
  }
  func.func @transform_5(%arg0: i32, %arg1: i32, %arg2: i32) -> (i32, i32) {
    %c0_i32 = arith.constant 0 : i32
    return %arg0, %arg1 : i32, i32
  }
  func.func @transform_6(%arg0: i32, %arg1: i32, %arg2: i32) -> (i32, i32) {
    %c0_i32 = arith.constant 0 : i32
    return %arg0, %arg1 : i32, i32
  }
}

module attributes {stable_mosaic.version = 11 : i64} {
  func.func @kernel(%arg0: i32, %arg1: i32, %arg2: i32, %arg3: memref<16x128xbf16, #tpu.memory_space<vmem>>, %arg4: memref<128x128xbf16, #tpu.memory_space<vmem>>, %arg5: memref<1x128xf32, #tpu.memory_space<vmem>>, %arg6: memref<16x128xbf16, #tpu.memory_space<vmem>>, %arg7: memref<16x128xf32, #tpu.memory_space<vmem>>) attributes {dimension_semantics = [#tpu.dimension_semantics<parallel>, #tpu.dimension_semantics<parallel>, #tpu.dimension_semantics<arbitrary>], iteration_bounds = array<i64: 2, 1, 1>, scalar_prefetch = 0 : i64, scratch_operands = 1 : i64, tpu.core_type = #tpu.core_type<tc>, window_params = [{transform_indices = @transform_0, window_bounds = array<i64: 16, 128>}, {transform_indices = @transform_1, window_bounds = array<i64: 128, 128>}, {transform_indices = @transform_2, window_bounds = array<i64: 1, 128>}, {transform_indices = @transform_3, window_bounds = array<i64: 16, 128>}]} {
    %c0_i32 = arith.constant 0 : i32
    %0 = arith.cmpi eq, %arg2, %c0_i32 : i32
    %1 = arith.extui %0 : i1 to i32
    %c0_i32_0 = arith.constant 0 : i32
    %2 = arith.cmpi ne, %1, %c0_i32_0 : i32
    scf.if %2 {
      %cst_10 = arith.constant 0.000000e+00 : f32
      %12 = vector.broadcast %cst_10 : f32 to vector<16x128xf32>
      %c0_11 = arith.constant 0 : index
      %c0_12 = arith.constant 0 : index
      %13 = vector.load %arg7[%c0_11, %c0_12] : memref<16x128xf32, #tpu.memory_space<vmem>>, vector<16x128xf32>
      tpu.vector_store %arg7[%c0_11, %c0_12], %12 {strides = array<i32>} : memref<16x128xf32, #tpu.memory_space<vmem>>, vector<16x128xf32>,
    } else {
    }
    %c0 = arith.constant 0 : index
    %c0_1 = arith.constant 0 : index
    %3 = vector.load %arg3[%c0, %c0_1] : memref<16x128xbf16, #tpu.memory_space<vmem>>, vector<16x128xbf16>
    %c0_2 = arith.constant 0 : index
    %c0_3 = arith.constant 0 : index
    %4 = vector.load %arg7[%c0_2, %c0_3] : memref<16x128xf32, #tpu.memory_space<vmem>>, vector<16x128xf32>
    %c0_4 = arith.constant 0 : index
    %c0_5 = arith.constant 0 : index
    %5 = vector.load %arg4[%c0_4, %c0_5] : memref<128x128xbf16, #tpu.memory_space<vmem>>, vector<128x128xbf16>
    %cst = arith.constant dense<0.000000e+00> : vector<16x128xf32>
    %6 = tpu.matmul %3, %5, %cst {dimension_numbers = #tpu.dot_dimension_numbers<[1], [0], [0], [1], [0, 0, 1, 1], [], []>} : vector<16x128xbf16>, vector<128x128xbf16>, vector<16x128xf32> -> vector<16x128xf32>
    %7 = arith.addf %4, %6 : vector<16x128xf32>
    %c0_6 = arith.constant 0 : index
    %c0_7 = arith.constant 0 : index
    %8 = vector.load %arg7[%c0_6, %c0_7] : memref<16x128xf32, #tpu.memory_space<vmem>>, vector<16x128xf32>
    tpu.vector_store %arg7[%c0_6, %c0_7], %7 {strides = array<i32>} : memref<16x128xf32, #tpu.memory_space<vmem>>, vector<16x128xf32>,
    %c0_i32_8 = arith.constant 0 : i32
    %9 = arith.cmpi eq, %arg2, %c0_i32_8 : i32
    %10 = arith.extui %9 : i1 to i32
    %c0_i32_9 = arith.constant 0 : i32
    %11 = arith.cmpi ne, %10, %c0_i32_9 : i32
    scf.if %11 {
      %c0_10 = arith.constant 0 : index
      %c0_11 = arith.constant 0 : index
      %12 = vector.load %arg7[%c0_10, %c0_11] : memref<16x128xf32, #tpu.memory_space<vmem>>, vector<16x128xf32>
      %c0_12 = arith.constant 0 : index
      %c0_13 = arith.constant 0 : index
      %13 = vector.load %arg5[%c0_12, %c0_13] : memref<1x128xf32, #tpu.memory_space<vmem>>, vector<1x128xf32>
      %14 = vector.broadcast %13 : vector<1x128xf32> to vector<16x128xf32>
      %15 = arith.addf %12, %14 : vector<16x128xf32>
      %16 = arith.truncf %15 : vector<16x128xf32> to vector<16x128xbf16>
      %c0_14 = arith.constant 0 : index
      %c0_15 = arith.constant 0 : index
      %17 = vector.load %arg6[%c0_14, %c0_15] : memref<16x128xbf16, #tpu.memory_space<vmem>>, vector<16x128xbf16>
      tpu.vector_store %arg6[%c0_14, %c0_15], %16 {strides = array<i32>} : memref<16x128xbf16, #tpu.memory_space<vmem>>, vector<16x128xbf16>,
    } else {
    }
    return
  }
  func.func @transform_0(%arg0: i32, %arg1: i32, %arg2: i32) -> (i32, i32) {
    %c0_i32 = arith.constant 0 : i32
    return %arg0, %arg2 : i32, i32
  }
  func.func @transform_1(%arg0: i32, %arg1: i32, %arg2: i32) -> (i32, i32) {
    %c0_i32 = arith.constant 0 : i32
    return %arg2, %arg1 : i32, i32
  }
  func.func @transform_2(%arg0: i32, %arg1: i32, %arg2: i32) -> (i32, i32) {
    %c0_i32 = arith.constant 0 : i32
    %c0_i32_0 = arith.constant 0 : i32
    return %c0_i32, %arg1 : i32, i32
  }
  func.func @transform_3(%arg0: i32, %arg1: i32, %arg2: i32) -> (i32, i32) {
    %c0_i32 = arith.constant 0 : i32
    return %arg0, %arg1 : i32, i32
  }
}

</mosaic_0001>

<bundles_post_ra>
// kernel: _lambda_.10
= control target key start
LH: loop header
LB: loop body
LE: loop exit
PB: predicated region body
PF: predicated region fallthrough
CT: control target
= control target key end

     0   :  { %s1760_s18 = smov 0   ;;  %s1762_s19 = smov 0   ;;  %s1992_s0 = inlined_call_operand.vmem [shape: bf16[512,128], index: 0, kind: input, shape index: {}]   ;;  %s1993_s1 = inlined_call_operand.vmem [shape: bf16[128,128], index: 1, kind: input, shape index: {}]   ;;  %s1994_s2 = inlined_call_operand.vmem [shape: f32[1,128], index: 2, kind: input, shape index: {}]   ;;  %s1995_s3 = inlined_call_operand.vmem [shape: bf16[512,128], index: 3, kind: output, shape index: {0}]   ;;  %s1996_s4 = inlined_call_operand.vmem [shape: f32[16,128], index: 4, kind: output, shape index: {1}]   ;;  %s1997_s5 = inlined_call_operand.vmem [shape: f32[16,128], index: 5, kind: output, shape index: {2}]  }
   0x1   :  { %s1764_s20 = smov 0  }
   0x2 LB: > { %s35_s21 = sadd.s32 1, %s1724_s19  ;;  %p1377_p0 = scmp.ge.s32.totalorder %s1728_s20, 1  ;;  %s1728_s20 = sphi %s1764_s20, %s16_s20   ;;  %s1724_s19 = sphi %s1762_s19, %s1999_s19   ;;  %s1720_s18 = sphi %s1760_s18, %s1998_s18  }
   0x3   : > { %p37_p1 = scmp.ge.s32.totalorder %s35_s21, 2  ;;  %p247_p2 = scmp.lt.s32.totalorder %s1728_s20, 3 }
   0x5   : > { %s2001_s21 = smov (%p37_p1, %s35_s21), 0  ;;  %p248_p3 = pnand %p1377_p0, %p247_p2 }
   0x6   : > { %s1378_s24 = sshll.u32 (!%p248_p3), %s1720_s18, 5  ;;  %p336_p5 = scmp.lt.s32.totalorder (!%p248_p3), %s1720_s18, 1 }
   0x7   : > { %251 = sbr.rel (%p248_p3) target bundleno = 323 (0x143), region = 32  ;;  %p307_p4 = scmp.lt.s32.totalorder (!%p248_p3), %s1378_s24, 63 }
   0xc   : > { %v1682_v0 = vld [vmem:[%s1993_s1 + $0x38] sm:$0xff]   ;;  %v1683_v1 = vld [vmem:[%s1993_s1 + $0x30] sm:$0xff]   ;;  %s2003_s24 = smov (!%p307_p4, %s1378_s24), 63  ;;  %v1684_v2 = vld [vmem:[%s1993_s1 + $0x28] sm:$0xff]   ;;  %s2005_s18 = smov (!%p336_p5, %s1720_s18), 1 }
   0xd   : > { %1594 = vmatprep.subr.bf16.mxu0 %v1682_v0  ;;  %1642 = vmatprep.subr.bf16.mxu1 %v1682_v0  ;;  %s1379_s29 = sshll.u32 %s2003_s24, 2  ;;  %v1685_v3 = vld [vmem:[%s1993_s1 + $0x20] sm:$0xff]   ;;  %v1686_v5 = vld [vmem:[%s1993_s1 + $0x18] sm:$0xff]   ;;  %v1687_v6 = vld [vmem:[%s1993_s1 + $0x10] sm:$0xff]   ;;  %s1382_s24 = sshll.u32 %s2005_s18, 3 }
   0xe   : > { %1595 = vmatpush3.bf16.msra.mxu0 %v1682_v0  ;;  %1650 = vmatpush3.bf16.msra.mxu1 %v1682_v0  ;;  %s1798_s7 = scalar_lea.vmem %s1992_s0, %s1379_s29  ;;  %v1688_v8 = vld [vmem:[%s1993_s1 + $0x8] sm:$0xff]   ;;  %v1689_v9 = vld [vmem:[%s1993_s1] sm:$0xff]   ;;  %s1850_s27 = scalar_lea.vmem %s1995_s3, %s1379_s29 }
   0xf   : > { %1596 = vmatprep.subr.bf16.mxu0 %v1683_v1  ;;  %1643 = vmatprep.subr.bf16.mxu1 %v1683_v1  ;;  %v1690_v4 = vld [vmem:[%s1798_s7] sm:$0xff]   ;;  %v1691_v10 = vld [vmem:[%s1798_s7 + $0x8] sm:$0xff]   ;;  %v1692_v12 = vld [vmem:[%s1798_s7 + $0x10] sm:$0xff]   ;;  %s342_s30 = scalar_lea.vmem %s1996_s4, %s1382_s24  ;;  %s349_s8 = scalar_lea.vmem %s1997_s5, %s1382_s24 }
  0x10   : > { %1610 = vmatprep.mubr.bf16.mxu0 %v1690_v4  ;;  %v1698_v7 = vld [vmem:[%s1798_s7 + $0x40] sm:$0xff]   ;;  %v1699_v11 = vld [vmem:[%s1798_s7 + $0x48] sm:$0xff]   ;;  %v1700_v13 = vld [vmem:[%s1798_s7 + $0x50] sm:$0xff]  }
  0x11   : > { %1626 = vmatprep.mubr.bf16.mxu1 %v1698_v7  ;;  %v1693_v14 = vld [vmem:[%s1798_s7 + $0x18] sm:$0xff]   ;;  %v1694_v16 = vld [vmem:[%s1798_s7 + $0x20] sm:$0xff]   ;;  %v1695_v18 = vld [vmem:[%s1798_s7 + $0x28] sm:$0xff]  }
  0x12   : > { %1597 = vmatpush3.bf16.msra.mxu0 %v1683_v1  ;;  %1651 = vmatpush3.bf16.msra.mxu1 %v1683_v1  ;;  %v1701_v15 = vld [vmem:[%s1798_s7 + $0x58] sm:$0xff]   ;;  %v1702_v17 = vld [vmem:[%s1798_s7 + $0x60] sm:$0xff]   ;;  %v1703_v19 = vld [vmem:[%s1798_s7 + $0x68] sm:$0xff]  }
  0x13   : > { %1598 = vmatprep.subr.bf16.mxu0 %v1684_v2  ;;  %1644 = vmatprep.subr.bf16.mxu1 %v1684_v2  ;;  %v1696_v20 = vld [vmem:[%s1798_s7 + $0x30] sm:$0xff]   ;;  %v1697_v22 = vld [vmem:[%s1798_s7 + $0x38] sm:$0xff]   ;;  %v1834_v26 = vld [vmem:[%s1994_s2] ss:$0 sm:$0xff] }
  0x14   : > { %v1704_v21 = vld [vmem:[%s1798_s7 + $0x70] sm:$0xff]   ;;  %v1705_v23 = vld [vmem:[%s1798_s7 + $0x78] sm:$0xff]  }
  0x16   : > { %1599 = vmatpush3.bf16.msra.mxu0 %v1684_v2  ;;  %1652 = vmatpush3.bf16.msra.mxu1 %v1684_v2 }
  0x17   : > { %1600 = vmatprep.subr.bf16.mxu0 %v1685_v3  ;;  %1645 = vmatprep.subr.bf16.mxu1 %v1685_v3 }
  0x1a   : > { %1601 = vmatpush3.bf16.msra.mxu0 %v1685_v3  ;;  %1653 = vmatpush3.bf16.msra.mxu1 %v1685_v3 }
  0x1b   : > { %1602 = vmatprep.subr.bf16.mxu0 %v1686_v5  ;;  %1646 = vmatprep.subr.bf16.mxu1 %v1686_v5 }
  0x1e   : > { %1603 = vmatpush3.bf16.msra.mxu0 %v1686_v5  ;;  %1654 = vmatpush3.bf16.msra.mxu1 %v1686_v5 }
  0x1f   : > { %1604 = vmatprep.subr.bf16.mxu0 %v1687_v6  ;;  %1647 = vmatprep.subr.bf16.mxu1 %v1687_v6 }
  0x22   : > { %1605 = vmatpush3.bf16.msra.mxu0 %v1687_v6  ;;  %1655 = vmatpush3.bf16.msra.mxu1 %v1687_v6 }
  0x23   : > { %1606 = vmatprep.subr.bf16.mxu0 %v1688_v8  ;;  %1648 = vmatprep.subr.bf16.mxu1 %v1688_v8 }
  0x26   : > { %1607 = vmatpush3.bf16.msra.mxu0 %v1688_v8  ;;  %1656 = vmatpush3.bf16.msra.mxu1 %v1688_v8 }
  0x27   : > { %1608 = vmatprep.subr.bf16.mxu0 %v1689_v9  ;;  %1649 = vmatprep.subr.bf16.mxu1 %v1689_v9 }
  0x2a   : > { %1609 = vmatpush3.bf16.msra.mxu0 %v1689_v9  ;;  %1657 = vmatpush3.bf16.msra.mxu1 %v1689_v9 }
  0x2d   : > { %1611 = vmatmul.mubr.bf16.vlgmr.msra.gmra.mxu0 %v1691_v10  ;;  %1627 = vmatmul.mubr.bf16.vlgmr.msra.gmra.mxu1 %v1699_v11 }
  0x2e   : > { %1614 = vmatprep.mubr.bf16.mxu0 %v1692_v12  ;;  %1630 = vmatprep.mubr.bf16.mxu1 %v1700_v13 }
  0x35   : > { %1615 = vmatmul.mubr.bf16.gmra.mxu0 %v1693_v14  ;;  %1631 = vmatmul.mubr.bf16.gmra.mxu1 %v1701_v15 }
  0x36   : > { %1618 = vmatprep.mubr.bf16.mxu0 %v1694_v16  ;;  %1634 = vmatprep.mubr.bf16.mxu1 %v1702_v17 }
  0x3d   : > { %1619 = vmatmul.mubr.bf16.gmra.mxu0 %v1695_v18  ;;  %1635 = vmatmul.mubr.bf16.gmra.mxu1 %v1703_v19 }
  0x3e   : > { %1622 = vmatprep.mubr.bf16.mxu0 %v1696_v20  ;;  %1638 = vmatprep.mubr.bf16.mxu1 %v1704_v21 }
  0x45   : > { %1623 = vmatmul.mubr.bf16.gmra.mxu0 %v1697_v22  ;;  %1639 = vmatmul.mubr.bf16.gmra.mxu1 %v1705_v23 }
  0xed   : > { %v1612_v24 = vpop.f32.mrf.mxu0  ;;  %v1628_v25 = vpop.f32.mrf.mxu1 }
  0xee   : > { %v1837_v30 = vadd.f32 %v1628_v25, %v1834_v26  ;;  %v880_v32 = vadd.f32 %v1612_v24, %v1834_v26 }
  0xef   : > { %v645_v27 = vpop.f32.mrf.mxu0  ;;  %v709_v28 = vpop.f32.mrf.mxu1 }
  0xf0   : > { %v878_v33 = vadd.f32 %v1834_v26, %v645_v27  ;;  %v1853_v37 = vadd.f32 %v1834_v26, %v709_v28  ;;  %v949_v52 = vmul.f32 %v880_v32, %v880_v32 }
  0xf1   : > { %v1613_v29 = vpop.f32.mrf.mxu0  ;;  %v1629_v31 = vpop.f32.mrf.mxu1 }
  0xf2   : > { %v881_v34 = vadd.f32 %v1613_v29, %v1834_v26  ;;  %v1843_v35 = vadd.f32 %v1629_v31, %v1834_v26  ;;  %v947_v45 = vmul.f32 %v878_v33, %v878_v33 }
  0xf3   : > { %v648_v36 = vpop.f32.mrf.mxu0  ;;  %v712_v38 = vpop.f32.mrf.mxu1 }
  0xf4   : > { %v1483_v39 = vpack.c.bf16 %v881_v34, %v880_v32  ;;  %v879_v40 = vadd.f32 %v1834_v26, %v648_v36  ;;  %v1523_v42 = vpack.c.bf16 %v1843_v35, %v1837_v30  ;;  %v1859_v43 = vadd.f32 %v1834_v26, %v712_v38 }
  0xf5   : > { %v1616_v41 = vpop.f32.mrf.mxu0  ;;  %v1632_v44 = vpop.f32.mrf.mxu1  ;;  %v950_v56 = vmul.f32 %v881_v34, %v881_v34 }
  0xf6   : > { %1555 = vst [vmem:[%s1850_s27 + $0x8] sm:$0xff] %v1483_v39   ;;  %v910_v46 = vadd.f32 %v879_v40, %v878_v33  ;;  %v948_v47 = vmul.f32 %v879_v40, %v879_v40  ;;  %v1478_v48 = vpack.c.bf16 %v879_v40, %v878_v33  ;;  %1563 = vst [vmem:[%s1850_s27 + $0x48] sm:$0xff] %v1523_v42  }
  0xf7   : > { %v661_v49 = vpop.f32.mrf.mxu0  ;;  %v1518_v50 = vpack.c.bf16 %v1859_v43, %v1853_v37  ;;  %v725_v51 = vpop.f32.mrf.mxu1  ;;  %v1869_v58 = vadd.f32 %v1632_v44, %v1834_v26  ;;  %v884_v61 = vadd.f32 %v1616_v41, %v1834_v26 }
  0xf8   : > { %v911_v53 = vadd.f32 %v910_v46, %v880_v32  ;;  %v979_v54 = vadd.f32 %v948_v47, %v947_v45  ;;  %1479 = vst [vmem:[%s1850_s27] sm:$0xff] %v1478_v48   ;;  %v882_v55 = vadd.f32 %v1834_v26, %v661_v49  ;;  %v1874_v1 = vadd.f32 %v1834_v26, %v725_v51 }
  0xf9   : > { %v1617_v57 = vpop.f32.mrf.mxu0  ;;  %1562 = vst [vmem:[%s1850_s27 + $0x40] sm:$0xff] %v1518_v50   ;;  %v1633_v59 = vpop.f32.mrf.mxu1  ;;  %v953_v21 = vmul.f32 %v884_v61, %v884_v61 }
  0xfa   : > { %v980_v60 = vadd.f32 %v979_v54, %v949_v52  ;;  %v912_v62 = vadd.f32 %v911_v53, %v881_v34  ;;  %v885_v63 = vadd.f32 %v1617_v57, %v1834_v26  ;;  %v1877_v2 = vadd.f32 %v1633_v59, %v1834_v26 }
  0xfb   : > { %v664_v0 = vpop.f32.mrf.mxu0  ;;  %v728_v3 = vpop.f32.mrf.mxu1  ;;  %v951_v5 = vmul.f32 %v882_v55, %v882_v55 }
  0xfc   : > { %v913_v4 = vadd.f32 %v912_v62, %v882_v55  ;;  %v981_v6 = vadd.f32 %v980_v60, %v950_v56  ;;  %v1493_v7 = vpack.c.bf16 %v885_v63, %v884_v61  ;;  %v883_v8 = vadd.f32 %v1834_v26, %v664_v0 }
  0xfd   : > { %v1620_v9 = vpop.f32.mrf.mxu0  ;;  %v1533_v10 = vpack.c.bf16 %v1877_v2, %v1869_v58  ;;  %v1883_v11 = vadd.f32 %v1834_v26, %v728_v3  ;;  %v1636_v12 = vpop.f32.mrf.mxu1  ;;  %v954_v32 = vmul.f32 %v885_v63, %v885_v63 }
  0xfe   : > { %v982_v13 = vadd.f32 %v981_v6, %v951_v5  ;;  %1557 = vst [vmem:[%s1850_s27 + $0x18] sm:$0xff] %v1493_v7   ;;  %v914_v14 = vadd.f32 %v913_v4, %v883_v8  ;;  %v952_v15 = vmul.f32 %v883_v8, %v883_v8  ;;  %v1488_v16 = vpack.c.bf16 %v883_v8, %v882_v55 }
  0xff   : > { %v677_v17 = vpop.f32.mrf.mxu0  ;;  %1565 = vst [vmem:[%s1850_s27 + $0x58] sm:$0xff] %v1533_v10   ;;  %v741_v18 = vpop.f32.mrf.mxu1  ;;  %v1528_v20 = vpack.c.bf16 %v1883_v11, %v1874_v1  ;;  %v1892_v25 = vadd.f32 %v1636_v12, %v1834_v26  ;;  %v888_v28 = vadd.f32 %v1620_v9, %v1834_v26 }
 0x100   : > { %v886_v19 = vadd.f32 %v1834_v26, %v677_v17  ;;  %v915_v22 = vadd.f32 %v914_v14, %v884_v61  ;;  %v983_v23 = vadd.f32 %v982_v13, %v952_v15  ;;  %1556 = vst [vmem:[%s1850_s27 + $0x10] sm:$0xff] %v1488_v16   ;;  %v1901_v38 = vadd.f32 %v1834_v26, %v741_v18 }
 0x101   : > { %v1621_v24 = vpop.f32.mrf.mxu0  ;;  %v1637_v27 = vpop.f32.mrf.mxu1  ;;  %1564 = vst [vmem:[%s1850_s27 + $0x50] sm:$0xff] %v1528_v20   ;;  %v957_v59 = vmul.f32 %v888_v28, %v888_v28 }
 0x102   : > { %v889_v29 = vadd.f32 %v1621_v24, %v1834_v26  ;;  %v1898_v31 = vadd.f32 %v1637_v27, %v1834_v26  ;;  %v984_v33 = vadd.f32 %v983_v23, %v953_v21  ;;  %v916_v34 = vadd.f32 %v915_v22, %v885_v63 }
 0x103   : > { %v680_v36 = vpop.f32.mrf.mxu0  ;;  %v744_v39 = vpop.f32.mrf.mxu1  ;;  %v955_v40 = vmul.f32 %v886_v19, %v886_v19 }
 0x104   : > { %v1503_v41 = vpack.c.bf16 %v889_v29, %v888_v28  ;;  %v887_v42 = vadd.f32 %v1834_v26, %v680_v36  ;;  %v917_v44 = vadd.f32 %v916_v34, %v886_v19  ;;  %v985_v45 = vadd.f32 %v984_v33, %v954_v32 }
 0x105   : > { %v1624_v46 = vpop.f32.mrf.mxu0  ;;  %v1543_v47 = vpack.c.bf16 %v1898_v31, %v1892_v25  ;;  %v1907_v48 = vadd.f32 %v1834_v26, %v744_v39  ;;  %v1640_v49 = vpop.f32.mrf.mxu1  ;;  %v958_v6 = vmul.f32 %v889_v29, %v889_v29  ;;  %v963_v36 = vmul.f32 %v1853_v37, %v1853_v37 }
 0x106   : > { %1559 = vst [vmem:[%s1850_s27 + $0x28] sm:$0xff] %v1503_v41   ;;  %v956_v50 = vmul.f32 %v887_v42, %v887_v42  ;;  %v1498_v51 = vpack.c.bf16 %v887_v42, %v886_v19  ;;  %v986_v52 = vadd.f32 %v985_v45, %v955_v40  ;;  %v918_v53 = vadd.f32 %v917_v44, %v887_v42 }
 0x107   : > { %v693_v54 = vpop.f32.mrf.mxu0  ;;  %1567 = vst [vmem:[%s1850_s27 + $0x68] sm:$0xff] %v1543_v47   ;;  %v1538_v55 = vpack.c.bf16 %v1907_v48, %v1901_v38  ;;  %v757_v56 = vpop.f32.mrf.mxu1  ;;  %v1917_v63 = vadd.f32 %v1640_v49, %v1834_v26  ;;  %v892_v3 = vadd.f32 %v1624_v46, %v1834_v26  ;;  %v964_v41 = vmul.f32 %v1859_v43, %v1859_v43 }
 0x108   : > { %1558 = vst [vmem:[%s1850_s27 + $0x20] sm:$0xff] %v1498_v51   ;;  %v890_v57 = vadd.f32 %v1834_v26, %v693_v54  ;;  %v919_v60 = vadd.f32 %v918_v53, %v888_v28  ;;  %v987_v61 = vadd.f32 %v986_v52, %v956_v50  ;;  %v906_v10 = vadd.f32 %v1834_v26, %v757_v56 }
 0x109   : > { %v1625_v62 = vpop.f32.mrf.mxu0  ;;  %1566 = vst [vmem:[%s1850_s27 + $0x60] sm:$0xff] %v1538_v55   ;;  %v1641_v0 = vpop.f32.mrf.mxu1  ;;  %v961_v27 = vmul.f32 %v892_v3, %v892_v3  ;;  %v965_v44 = vmul.f32 %v1837_v30, %v1837_v30  ;;  %v966_v47 = vmul.f32 %v1843_v35, %v1843_v35  ;;  %v967_v51 = vmul.f32 %v1874_v1, %v1874_v1 }
 0x10a   : > { %v893_v4 = vadd.f32 %v1625_v62, %v1834_v26  ;;  %v1922_v5 = vadd.f32 %v1641_v0, %v1834_v26  ;;  %v988_v7 = vadd.f32 %v987_v61, %v957_v59  ;;  %v920_v8 = vadd.f32 %v919_v60, %v889_v29 }
 0x10b   : > { %v696_v9 = vpop.f32.mrf.mxu0  ;;  %v760_v12 = vpop.f32.mrf.mxu1  ;;  %v959_v13 = vmul.f32 %v890_v57, %v890_v57  ;;  %v968_v54 = vmul.f32 %v1883_v11, %v1883_v11  ;;  %v971_v60 = vmul.f32 %v1901_v38, %v1901_v38  ;;  %v972_v0 = vmul.f32 %v1907_v48, %v1907_v48 }
 0x10c   : > { %v1513_v14 = vpack.c.bf16 %v893_v4, %v892_v3  ;;  %v891_v15 = vadd.f32 %v1834_v26, %v696_v9  ;;  %v921_v16 = vadd.f32 %v920_v8, %v890_v57  ;;  %v989_v17 = vadd.f32 %v988_v7, %v958_v6 }
 0x10d   : > { %v1553_v18 = vpack.c.bf16 %v1922_v5, %v1917_v63  ;;  %v907_v19 = vadd.f32 %v1834_v26, %v760_v12  ;;  %v962_v32 = vmul.f32 %v893_v4, %v893_v4  ;;  %v975_v8 = vmul.f32 %v906_v10, %v906_v10 }
 0x10e   : > { %1561 = vst [vmem:[%s1850_s27 + $0x38] sm:$0xff] %v1513_v14   ;;  %v960_v20 = vmul.f32 %v891_v15, %v891_v15  ;;  %v1508_v21 = vpack.c.bf16 %v891_v15, %v890_v57  ;;  %v990_v22 = vadd.f32 %v989_v17, %v959_v13  ;;  %v922_v23 = vadd.f32 %v921_v16, %v891_v15 }
 0x10f   : > { %1569 = vst [vmem:[%s1850_s27 + $0x78] sm:$0xff] %v1553_v18   ;;  %v1548_v24 = vpack.c.bf16 %v907_v19, %v906_v10  ;;  %v977_v14 = vmul.f32 %v1917_v63, %v1917_v63  ;;  %v978_v16 = vmul.f32 %v1922_v5, %v1922_v5 }
 0x110   : > { %1560 = vst [vmem:[%s1850_s27 + $0x30] sm:$0xff] %v1508_v21   ;;  %v923_v28 = vadd.f32 %v922_v23, %v892_v3  ;;  %v991_v29 = vadd.f32 %v990_v22, %v960_v20 }
 0x111   : > { %1568 = vst [vmem:[%s1850_s27 + $0x70] sm:$0xff] %v1548_v24  }
 0x112   : > { %v992_v33 = vadd.f32 %v991_v29, %v961_v27  ;;  %v924_v34 = vadd.f32 %v923_v28, %v893_v4 }
 0x114   : > { %v925_v26 = vadd.f32 %v924_v34, %v1853_v37  ;;  %v993_v39 = vadd.f32 %v992_v33, %v962_v32 }
 0x116   : > { %v926_v40 = vadd.f32 %v925_v26, %v1859_v43  ;;  %v994_v42 = vadd.f32 %v993_v39, %v963_v36 }
 0x118   : > { %v927_v45 = vadd.f32 %v926_v40, %v1837_v30  ;;  %v995_v46 = vadd.f32 %v994_v42, %v964_v41  ;;  %v969_v30 = vmul.f32 %v1869_v58, %v1869_v58 }
 0x11a   : > { %v996_v49 = vadd.f32 %v995_v46, %v965_v44  ;;  %v928_v50 = vadd.f32 %v927_v45, %v1843_v35  ;;  %v970_v35 = vmul.f32 %v1877_v2, %v1877_v2 }
 0x11c   : > { %v929_v37 = vadd.f32 %v928_v50, %v1874_v1  ;;  %v997_v52 = vadd.f32 %v996_v49, %v966_v47 }
 0x11e   : > { %v998_v43 = vadd.f32 %v997_v52, %v967_v51  ;;  %v930_v53 = vadd.f32 %v929_v37, %v1883_v11 }
 0x120   : > { %v931_v55 = vadd.f32 %v930_v53, %v1869_v58  ;;  %v999_v56 = vadd.f32 %v998_v43, %v968_v54  ;;  %v973_v58 = vmul.f32 %v1892_v25, %v1892_v25 }
 0x122   : > { %v1000_v57 = vadd.f32 %v999_v56, %v969_v30  ;;  %v932_v59 = vadd.f32 %v931_v55, %v1877_v2  ;;  %v974_v2 = vmul.f32 %v1898_v31, %v1898_v31 }
 0x124   : > { %v933_v1 = vadd.f32 %v932_v59, %v1901_v38  ;;  %v1001_v61 = vadd.f32 %v1000_v57, %v970_v35 }
 0x126   : > { %v1002_v62 = vadd.f32 %v1001_v61, %v971_v60  ;;  %v934_v11 = vadd.f32 %v933_v1, %v1907_v48  ;;  %v976_v48 = vmul.f32 %v907_v19, %v907_v19 }
 0x128   : > { %v935_v3 = vadd.f32 %v934_v11, %v1892_v25  ;;  %v1003_v4 = vadd.f32 %v1002_v62, %v972_v0 }
 0x12a   : > { %v1004_v6 = vadd.f32 %v1003_v4, %v973_v58  ;;  %v936_v38 = vadd.f32 %v935_v3, %v1898_v31 }
 0x12c   : > { %v937_v7 = vadd.f32 %v936_v38, %v906_v10  ;;  %v1005_v9 = vadd.f32 %v1004_v6, %v974_v2 }
 0x12e   : > { %v1006_v12 = vadd.f32 %v1005_v9, %v975_v8  ;;  %v938_v13 = vadd.f32 %v937_v7, %v907_v19 }
 0x130   : > { %v939_v15 = vadd.f32 %v938_v13, %v1917_v63  ;;  %v1007_v25 = vadd.f32 %v1006_v12, %v976_v48 }
 0x132   : > { %v940_v17 = vadd.f32 %v939_v15, %v1922_v5  ;;  %v1008_v31 = vadd.f32 %v1007_v25, %v977_v14 }
 0x134   : > { %v941_v18 = vrot.slane %v940_v17, 4  ;;  %v1009_v20 = vadd.f32 %v1008_v31, %v978_v16 }
 0x136   : > { %v942_v10 = vadd.f32 %v941_v18, %v940_v17  ;;  %v1010_v21 = vrot.slane %v1009_v20, 4 }
 0x138   : > { %v943_v22 = vrot.slane %v942_v10, 2  ;;  %v1011_v19 = vadd.f32 %v1010_v21, %v1009_v20 }
 0x13a   : > { %v944_v23 = vadd.f32 %v943_v22, %v942_v10  ;;  %v1012_v24 = vrot.slane %v1011_v19, 2 }
 0x13c   : > { %v945_v27 = vrot.slane %v944_v23, 1  ;;  %v1013_v63 = vadd.f32 %v1012_v24, %v1011_v19 }
 0x13e   : > { %v946_v28 = vadd.f32 %v945_v27, %v944_v23  ;;  %v1014_v29 = vrot.slane %v1013_v63, 1 }
 0x140   : > { %v1015_v5 = vadd.f32 %v1014_v29, %v1013_v63  ;;  %1016 = vst [vmem:[%s342_s30] sm:$0xff] %v946_v28 }
 0x142   : > { %1017 = vst [vmem:[%s349_s8] sm:$0xff] %v1015_v5 }
 0x143 PF: > { %s16_s20 = sadd.s32 1, %s1728_s20   ;;  %s1998_s18 = smov %s1724_s19 }
 0x144   : > { %p13_p6 = scmp.ge.s32.totalorder %s16_s20, 4   ;;  %s1999_s19 = smov %s2001_s21 }
 0x146   :  { %15 = sbr.rel (!%p13_p6) target bundleno = 2 (0x2), region = 100 }

// kernel: tile.63
= control target key start
LH: loop header
LB: loop body
LE: loop exit
PB: predicated region body
PF: predicated region fallthrough
CT: control target
= control target key end

     0   :  { %s36_s0 = inlined_call_operand.vmem [shape: bf16[16], index: 0, kind: input, shape index: {}]   ;;  %s37_s1 = inlined_call_operand.vmem [shape: bf16[9,16], index: 1, kind: output, shape index: {}]  }
   0x1   :  { %v4_v0 = vld [vmem:[%s36_s0] ss:$0 sm:$0xff] }
   0x2   :  { %v5_v1 = vunpack.i.l.bf16 %v4_v0 }
   0x4   :  { %v18_v2 = vpack.c.bf16 %v5_v1, %v5_v1 }
   0x6   :  { %19 = vst [vmem:[%s37_s1] sm:$0xff] %v18_v2  }

// kernel: tile.64
= control target key start
LH: loop header
LB: loop body
LE: loop exit
PB: predicated region body
PF: predicated region fallthrough
CT: control target
= control target key end

     0   :  { %vm36_vm0 = vcmask 130048   ;;  %s103_s8 = smov 112   ;;  %s104_s9 = smov 80   ;;  %vm42_vm1 = vcmask 1048448   ;;  %vm48_vm2 = vcmask 917248   ;;  %vm54_vm3 = vcmask 786048   ;;  %s127_s0 = inlined_call_operand.vmem [shape: bf16[9,16], index: 0, kind: input, shape index: {}]   ;;  %s128_s1 = inlined_call_operand.vmem [shape: bf16[144], index: 1, kind: output, shape index: {}]  }
   0x1   :  { %v92_v0 = vld [vmem:[%s127_s0] sm:$0xff]   ;;  %s34_s0 = smov 3  ;;  %s105_s10 = smov 96   ;;  %vm60_vm4 = vcmask 654848   ;;  %vm66_vm5 = vcmask 523648   ;;  %vm72_vm6 = vcmask 392448  }
   0x2   :  { %v93_v1 = vunpack.c.l.bf16 %v92_v0  ;;  %v94_v2 = vunpack.c.h.bf16 %v92_v0  ;;  %s106_s11 = smov 64   ;;  %s107_s12 = smov 48   ;;  %vm78_vm7 = vcmask 261248   ;;  %v110_v19 = vmov 0.0  }
   0x3   :  { %s108_s13 = smov 32   ;;  %s109_s14 = smov 16  }
   0x4   :  { %20 = vst [vmem:[#allocation1 + $0x8] sm:$0xff] %v94_v2  ;;  %33 = vst [vmem:[#allocation1] sm:$0xff] %v93_v1 }
   0xb   :  { %v39_v3 = vld [vmem:[#allocation1 + $0x7] sm:$0x1]   ;;  %v51_v4 = vld [vmem:[#allocation1 + $0x5] sm:$0x1]   ;;  %v45_v5 = vld [vmem:[#allocation1 + $0x6] sm:$0x1]  }
   0xc   :  { %40 = vrot.lane.b32.xlu0 %v39_v3, %s103_s8  ;;  %52 = vrot.lane.b32.xlu1 %v51_v4, %s104_s9  ;;  %v57_v6 = vld [vmem:[#allocation1 + $0x4] sm:$0x1]   ;;  %v35_v7 = vld [vmem:[#allocation1] ss:$8 sm:%s34_s0]   ;;  %v63_v8 = vld [vmem:[#allocation1 + $0x3] sm:$0x1]  }
   0xd   :  { %37 = vst.msk [vmem:[#allocation0] sm:$0x3] %vm36_vm0, %v35_v7   ;;  %v69_v9 = vld [vmem:[#allocation1 + $0x2] sm:$0x1]   ;;  %v75_v10 = vld [vmem:[#allocation1 + $0x1] sm:$0x1]  }
  0x10   :  { %46 = vrot.lane.b32.xlu0 %v45_v5, %s105_s10  ;;  %58 = vrot.lane.b32.xlu1 %v57_v6, %s106_s11 }
  0x14   :  { %64 = vrot.lane.b32.xlu0 %v63_v8, %s107_s12  ;;  %70 = vrot.lane.b32.xlu1 %v69_v9, %s108_s13 }
  0x18   :  { %76 = vrot.lane.b32.xlu0 %v75_v10, %s109_s14 }
  0x7e   :  { %v41_v11 = vpop.permute.xlu0 %40   ;;  %v53_v12 = vpop.permute.xlu1 %52  }
  0x7f   :  { %43 = vst.msk [vmem:[#allocation0] sm:$0x1] %vm42_vm1, %v41_v11  }
  0x82   :  { %v47_v13 = vpop.permute.xlu0 %46   ;;  %v59_v14 = vpop.permute.xlu1 %58  }
  0x83   :  { %49 = vst.msk [vmem:[#allocation0] sm:$0x1] %vm48_vm2, %v47_v13  }
  0x84   :  { %55 = vst.msk [vmem:[#allocation0] sm:$0x1] %vm54_vm3, %v53_v12  }
  0x85   :  { %61 = vst.msk [vmem:[#allocation0] sm:$0x1] %vm60_vm4, %v59_v14  }
  0x86   :  { %v65_v15 = vpop.permute.xlu0 %64   ;;  %v71_v16 = vpop.permute.xlu1 %70  }
  0x87   :  { %67 = vst.msk [vmem:[#allocation0] sm:$0x1] %vm66_vm5, %v65_v15  }
  0x88   :  { %73 = vst.msk [vmem:[#allocation0] sm:$0x1] %vm72_vm6, %v71_v16  }
  0x8a   :  { %v77_v17 = vpop.permute.xlu0 %76  }
  0x8b   :  { %79 = vst.msk [vmem:[#allocation0] sm:$0x1] %vm78_vm7, %v77_v17  }
  0x92   :  { %v85_v18 = vld [vmem:[#allocation0] sm:$0x3] }
  0x93   :  { %v86_v20 = vpack.c.bf16 %v110_v19, %v85_v18 }
  0x95   :  { %89 = vst [vmem:[%s128_s1] sm:$0x1] %v86_v20 }

// kernel: _lambda_.12
= control target key start
LH: loop header
LB: loop body
LE: loop exit
PB: predicated region body
PF: predicated region fallthrough
CT: control target
= control target key end

     0   :  { %s1467_s12 = smov 0   ;;  %s1469_s13 = smov 0   ;;  %s1604_s0 = inlined_call_operand.vmem [shape: bf16[512,128], index: 0, kind: input, shape index: {}]   ;;  %s1605_s1 = inlined_call_operand.vmem [shape: bf16[128,128], index: 1, kind: input, shape index: {}]   ;;  %s1606_s2 = inlined_call_operand.vmem [shape: f32[1,128], index: 2, kind: input, shape index: {}]   ;;  %s1607_s3 = inlined_call_operand.vmem [shape: bf16[512,128], index: 3, kind: output, shape index: {}]  }
   0x1   :  { %s1471_s14 = smov 0  }
   0x2 LB: > { %s32_s15 = sadd.s32 1, %s1441_s13  ;;  %p1096_p0 = scmp.ge.s32.totalorder %s1445_s14, 1  ;;  %s1445_s14 = sphi %s1471_s14, %s13_s14   ;;  %s1441_s13 = sphi %s1469_s13, %s1609_s13   ;;  %s1437_s12 = sphi %s1467_s12, %s1608_s12  }
   0x3   : > { %p34_p1 = scmp.ge.s32.totalorder %s32_s15, 2  ;;  %p188_p2 = scmp.lt.s32.totalorder %s1445_s14, 3 }
   0x5   : > { %s1611_s15 = smov (%p34_p1, %s32_s15), 0  ;;  %p189_p3 = pnand %p1096_p0, %p188_p2 }
   0x6   : > { %s1097_s18 = sshll.u32 (!%p189_p3), %s1437_s12, 5 }
   0x7   : > { %192 = sbr.rel (%p189_p3) target bundleno = 273 (0x111), region = 32  ;;  %p230_p4 = scmp.lt.s32.totalorder (!%p189_p3), %s1097_s18, 63 }
   0xc   : > { %v1399_v0 = vld [vmem:[%s1605_s1 + $0x38] sm:$0xff]   ;;  %v1400_v1 = vld [vmem:[%s1605_s1 + $0x30] sm:$0xff]   ;;  %s1613_s18 = smov (!%p230_p4, %s1097_s18), 63  ;;  %v1401_v2 = vld [vmem:[%s1605_s1 + $0x28] sm:$0xff]  }
   0xd   : > { %1311 = vmatprep.subr.bf16.mxu0 %v1399_v0  ;;  %1359 = vmatprep.subr.bf16.mxu1 %v1399_v0  ;;  %s1098_s23 = sshll.u32 %s1613_s18, 2  ;;  %v1402_v3 = vld [vmem:[%s1605_s1 + $0x20] sm:$0xff]   ;;  %v1403_v6 = vld [vmem:[%s1605_s1 + $0x18] sm:$0xff]   ;;  %v1404_v7 = vld [vmem:[%s1605_s1 + $0x10] sm:$0xff]  }
   0xe   : > { %1312 = vmatpush3.bf16.msra.mxu0 %v1399_v0  ;;  %1367 = vmatpush3.bf16.msra.mxu1 %v1399_v0  ;;  %s1502_s26 = scalar_lea.vmem %s1604_s0, %s1098_s23  ;;  %v1405_v8 = vld [vmem:[%s1605_s1 + $0x8] sm:$0xff]   ;;  %v1406_v9 = vld [vmem:[%s1605_s1] sm:$0xff]   ;;  %s1551_s17 = scalar_lea.vmem %s1607_s3, %s1098_s23 }
   0xf   : > { %1313 = vmatprep.subr.bf16.mxu0 %v1400_v1  ;;  %1360 = vmatprep.subr.bf16.mxu1 %v1400_v1  ;;  %v1407_v4 = vld [vmem:[%s1502_s26] sm:$0xff]   ;;  %v1409_v10 = vld [vmem:[%s1502_s26 + $0x8] sm:$0xff]   ;;  %v1411_v12 = vld [vmem:[%s1502_s26 + $0x10] sm:$0xff]  }
  0x10   : > { %v1408_v5 = vld [vmem:[%s1502_s26 + $0x40] sm:$0xff]   ;;  %1327 = vmatprep.mubr.bf16.mxu0 %v1407_v4  ;;  %v1410_v11 = vld [vmem:[%s1502_s26 + $0x48] sm:$0xff]   ;;  %v1412_v13 = vld [vmem:[%s1502_s26 + $0x50] sm:$0xff]  }
  0x11   : > { %1343 = vmatprep.mubr.bf16.mxu1 %v1408_v5  ;;  %v1413_v14 = vld [vmem:[%s1502_s26 + $0x18] sm:$0xff]   ;;  %v1415_v16 = vld [vmem:[%s1502_s26 + $0x20] sm:$0xff]   ;;  %v1417_v18 = vld [vmem:[%s1502_s26 + $0x28] sm:$0xff]  }
  0x12   : > { %1314 = vmatpush3.bf16.msra.mxu0 %v1400_v1  ;;  %1368 = vmatpush3.bf16.msra.mxu1 %v1400_v1  ;;  %v1414_v15 = vld [vmem:[%s1502_s26 + $0x58] sm:$0xff]   ;;  %v1416_v17 = vld [vmem:[%s1502_s26 + $0x60] sm:$0xff]   ;;  %v1418_v19 = vld [vmem:[%s1502_s26 + $0x68] sm:$0xff]  }
  0x13   : > { %1315 = vmatprep.subr.bf16.mxu0 %v1401_v2  ;;  %1361 = vmatprep.subr.bf16.mxu1 %v1401_v2  ;;  %v1419_v20 = vld [vmem:[%s1502_s26 + $0x30] sm:$0xff]   ;;  %v1421_v22 = vld [vmem:[%s1502_s26 + $0x38] sm:$0xff]   ;;  %v1538_v26 = vld [vmem:[%s1606_s2] ss:$0 sm:$0xff] }
  0x14   : > { %v1420_v21 = vld [vmem:[%s1502_s26 + $0x70] sm:$0xff]   ;;  %v1422_v23 = vld [vmem:[%s1502_s26 + $0x78] sm:$0xff]  }
  0x16   : > { %1316 = vmatpush3.bf16.msra.mxu0 %v1401_v2  ;;  %1369 = vmatpush3.bf16.msra.mxu1 %v1401_v2 }
  0x17   : > { %1317 = vmatprep.subr.bf16.mxu0 %v1402_v3  ;;  %1362 = vmatprep.subr.bf16.mxu1 %v1402_v3 }
  0x1a   : > { %1318 = vmatpush3.bf16.msra.mxu0 %v1402_v3  ;;  %1370 = vmatpush3.bf16.msra.mxu1 %v1402_v3 }
  0x1b   : > { %1319 = vmatprep.subr.bf16.mxu0 %v1403_v6  ;;  %1363 = vmatprep.subr.bf16.mxu1 %v1403_v6 }
  0x1e   : > { %1320 = vmatpush3.bf16.msra.mxu0 %v1403_v6  ;;  %1371 = vmatpush3.bf16.msra.mxu1 %v1403_v6 }
  0x1f   : > { %1321 = vmatprep.subr.bf16.mxu0 %v1404_v7  ;;  %1364 = vmatprep.subr.bf16.mxu1 %v1404_v7 }
  0x22   : > { %1322 = vmatpush3.bf16.msra.mxu0 %v1404_v7  ;;  %1372 = vmatpush3.bf16.msra.mxu1 %v1404_v7 }
  0x23   : > { %1323 = vmatprep.subr.bf16.mxu0 %v1405_v8  ;;  %1365 = vmatprep.subr.bf16.mxu1 %v1405_v8 }
  0x26   : > { %1324 = vmatpush3.bf16.msra.mxu0 %v1405_v8  ;;  %1373 = vmatpush3.bf16.msra.mxu1 %v1405_v8 }
  0x27   : > { %1325 = vmatprep.subr.bf16.mxu0 %v1406_v9  ;;  %1366 = vmatprep.subr.bf16.mxu1 %v1406_v9 }
  0x2a   : > { %1326 = vmatpush3.bf16.msra.mxu0 %v1406_v9  ;;  %1374 = vmatpush3.bf16.msra.mxu1 %v1406_v9 }
  0x2d   : > { %1328 = vmatmul.mubr.bf16.vlgmr.msra.gmra.mxu0 %v1409_v10  ;;  %1344 = vmatmul.mubr.bf16.vlgmr.msra.gmra.mxu1 %v1410_v11 }
  0x2e   : > { %1331 = vmatprep.mubr.bf16.mxu0 %v1411_v12  ;;  %1347 = vmatprep.mubr.bf16.mxu1 %v1412_v13 }
  0x35   : > { %1332 = vmatmul.mubr.bf16.gmra.mxu0 %v1413_v14  ;;  %1348 = vmatmul.mubr.bf16.gmra.mxu1 %v1414_v15 }
  0x36   : > { %1335 = vmatprep.mubr.bf16.mxu0 %v1415_v16  ;;  %1351 = vmatprep.mubr.bf16.mxu1 %v1416_v17 }
  0x3d   : > { %1336 = vmatmul.mubr.bf16.gmra.mxu0 %v1417_v18  ;;  %1352 = vmatmul.mubr.bf16.gmra.mxu1 %v1418_v19 }
  0x3e   : > { %1339 = vmatprep.mubr.bf16.mxu0 %v1419_v20  ;;  %1355 = vmatprep.mubr.bf16.mxu1 %v1420_v21 }
  0x45   : > { %1340 = vmatmul.mubr.bf16.gmra.mxu0 %v1421_v22  ;;  %1356 = vmatmul.mubr.bf16.gmra.mxu1 %v1422_v23 }
  0xed   : > { %v1329_v24 = vpop.f32.mrf.mxu0  ;;  %v1345_v25 = vpop.f32.mrf.mxu1 }
  0xee   : > { %v789_v31 = vadd.f32 %v1329_v24, %v1538_v26  ;;  %v805_v32 = vadd.f32 %v1345_v25, %v1538_v26 }
  0xef   : > { %v554_v27 = vpop.f32.mrf.mxu0  ;;  %v618_v28 = vpop.f32.mrf.mxu1 }
  0xf0   : > { %v787_v35 = vadd.f32 %v1538_v26, %v554_v27  ;;  %v803_v36 = vadd.f32 %v1538_v26, %v618_v28 }
  0xf1   : > { %v1330_v29 = vpop.f32.mrf.mxu0  ;;  %v1346_v30 = vpop.f32.mrf.mxu1 }
  0xf2   : > { %v790_v33 = vadd.f32 %v1330_v29, %v1538_v26  ;;  %v806_v34 = vadd.f32 %v1346_v30, %v1538_v26 }
  0xf3   : > { %v557_v37 = vpop.f32.mrf.mxu0  ;;  %v621_v38 = vpop.f32.mrf.mxu1 }
  0xf4   : > { %v1200_v39 = vpack.c.bf16 %v790_v33, %v789_v31  ;;  %v1240_v40 = vpack.c.bf16 %v806_v34, %v805_v32  ;;  %v788_v41 = vadd.f32 %v1538_v26, %v557_v37  ;;  %v804_v42 = vadd.f32 %v1538_v26, %v621_v38 }
  0xf5   : > { %v1333_v43 = vpop.f32.mrf.mxu0  ;;  %v1349_v44 = vpop.f32.mrf.mxu1 }
  0xf6   : > { %1272 = vst [vmem:[%s1551_s17 + $0x8] sm:$0xff] %v1200_v39   ;;  %1280 = vst [vmem:[%s1551_s17 + $0x48] sm:$0xff] %v1240_v40   ;;  %v1195_v45 = vpack.c.bf16 %v788_v41, %v787_v35  ;;  %v1235_v46 = vpack.c.bf16 %v804_v42, %v803_v36  ;;  %v793_v51 = vadd.f32 %v1333_v43, %v1538_v26 }
  0xf7   : > { %v570_v47 = vpop.f32.mrf.mxu0  ;;  %v634_v48 = vpop.f32.mrf.mxu1  ;;  %v809_v52 = vadd.f32 %v1349_v44, %v1538_v26 }
  0xf8   : > { %1196 = vst [vmem:[%s1551_s17] sm:$0xff] %v1195_v45   ;;  %1279 = vst [vmem:[%s1551_s17 + $0x40] sm:$0xff] %v1235_v46   ;;  %v791_v55 = vadd.f32 %v1538_v26, %v570_v47  ;;  %v807_v56 = vadd.f32 %v1538_v26, %v634_v48 }
  0xf9   : > { %v1334_v49 = vpop.f32.mrf.mxu0  ;;  %v1350_v50 = vpop.f32.mrf.mxu1 }
  0xfa   : > { %v794_v53 = vadd.f32 %v1334_v49, %v1538_v26  ;;  %v810_v54 = vadd.f32 %v1350_v50, %v1538_v26 }
  0xfb   : > { %v573_v57 = vpop.f32.mrf.mxu0  ;;  %v637_v58 = vpop.f32.mrf.mxu1 }
  0xfc   : > { %v1210_v59 = vpack.c.bf16 %v794_v53, %v793_v51  ;;  %v1250_v60 = vpack.c.bf16 %v810_v54, %v809_v52  ;;  %v792_v61 = vadd.f32 %v1538_v26, %v573_v57  ;;  %v808_v62 = vadd.f32 %v1538_v26, %v637_v58 }
  0xfd   : > { %v1337_v63 = vpop.f32.mrf.mxu0  ;;  %v1353_v0 = vpop.f32.mrf.mxu1 }
  0xfe   : > { %1274 = vst [vmem:[%s1551_s17 + $0x18] sm:$0xff] %v1210_v59   ;;  %1282 = vst [vmem:[%s1551_s17 + $0x58] sm:$0xff] %v1250_v60   ;;  %v1205_v1 = vpack.c.bf16 %v792_v61, %v791_v55  ;;  %v1245_v2 = vpack.c.bf16 %v808_v62, %v807_v56  ;;  %v797_v7 = vadd.f32 %v1337_v63, %v1538_v26 }
  0xff   : > { %v586_v3 = vpop.f32.mrf.mxu0  ;;  %v650_v4 = vpop.f32.mrf.mxu1  ;;  %v813_v8 = vadd.f32 %v1353_v0, %v1538_v26 }
 0x100   : > { %1273 = vst [vmem:[%s1551_s17 + $0x10] sm:$0xff] %v1205_v1   ;;  %1281 = vst [vmem:[%s1551_s17 + $0x50] sm:$0xff] %v1245_v2   ;;  %v795_v11 = vadd.f32 %v1538_v26, %v586_v3  ;;  %v811_v12 = vadd.f32 %v1538_v26, %v650_v4 }
 0x101   : > { %v1338_v5 = vpop.f32.mrf.mxu0  ;;  %v1354_v6 = vpop.f32.mrf.mxu1 }
 0x102   : > { %v798_v9 = vadd.f32 %v1338_v5, %v1538_v26  ;;  %v814_v10 = vadd.f32 %v1354_v6, %v1538_v26 }
 0x103   : > { %v589_v13 = vpop.f32.mrf.mxu0  ;;  %v653_v14 = vpop.f32.mrf.mxu1 }
 0x104   : > { %v1220_v15 = vpack.c.bf16 %v798_v9, %v797_v7  ;;  %v1260_v16 = vpack.c.bf16 %v814_v10, %v813_v8  ;;  %v796_v17 = vadd.f32 %v1538_v26, %v589_v13  ;;  %v812_v18 = vadd.f32 %v1538_v26, %v653_v14 }
 0x105   : > { %v1341_v19 = vpop.f32.mrf.mxu0  ;;  %v1357_v20 = vpop.f32.mrf.mxu1 }
 0x106   : > { %1276 = vst [vmem:[%s1551_s17 + $0x28] sm:$0xff] %v1220_v15   ;;  %1284 = vst [vmem:[%s1551_s17 + $0x68] sm:$0xff] %v1260_v16   ;;  %v1215_v21 = vpack.c.bf16 %v796_v17, %v795_v11  ;;  %v1255_v22 = vpack.c.bf16 %v812_v18, %v811_v12  ;;  %v801_v28 = vadd.f32 %v1341_v19, %v1538_v26 }
 0x107   : > { %v602_v23 = vpop.f32.mrf.mxu0  ;;  %v666_v24 = vpop.f32.mrf.mxu1  ;;  %v817_v29 = vadd.f32 %v1357_v20, %v1538_v26 }
 0x108   : > { %1275 = vst [vmem:[%s1551_s17 + $0x20] sm:$0xff] %v1215_v21   ;;  %1283 = vst [vmem:[%s1551_s17 + $0x60] sm:$0xff] %v1255_v22   ;;  %v799_v32 = vadd.f32 %v1538_v26, %v602_v23  ;;  %v815_v33 = vadd.f32 %v1538_v26, %v666_v24 }
 0x109   : > { %v1342_v25 = vpop.f32.mrf.mxu0  ;;  %v1358_v27 = vpop.f32.mrf.mxu1 }
 0x10a   : > { %v802_v30 = vadd.f32 %v1342_v25, %v1538_v26  ;;  %v818_v31 = vadd.f32 %v1358_v27, %v1538_v26 }
 0x10b   : > { %v605_v34 = vpop.f32.mrf.mxu0  ;;  %v669_v35 = vpop.f32.mrf.mxu1 }
 0x10c   : > { %v1230_v36 = vpack.c.bf16 %v802_v30, %v801_v28  ;;  %v1270_v37 = vpack.c.bf16 %v818_v31, %v817_v29  ;;  %v800_v38 = vadd.f32 %v1538_v26, %v605_v34  ;;  %v816_v39 = vadd.f32 %v1538_v26, %v669_v35 }
 0x10e   : > { %1278 = vst [vmem:[%s1551_s17 + $0x38] sm:$0xff] %v1230_v36   ;;  %1286 = vst [vmem:[%s1551_s17 + $0x78] sm:$0xff] %v1270_v37   ;;  %v1225_v40 = vpack.c.bf16 %v800_v38, %v799_v32  ;;  %v1265_v41 = vpack.c.bf16 %v816_v39, %v815_v33 }
 0x110   : > { %1277 = vst [vmem:[%s1551_s17 + $0x30] sm:$0xff] %v1225_v40   ;;  %1285 = vst [vmem:[%s1551_s17 + $0x70] sm:$0xff] %v1265_v41  }
 0x111 PF: > { %s13_s14 = sadd.s32 1, %s1445_s14   ;;  %s1608_s12 = smov %s1441_s13 }
 0x112   : > { %p10_p5 = scmp.ge.s32.totalorder %s13_s14, 4   ;;  %s1609_s13 = smov %s1611_s15 }
 0x114   :  { %12 = sbr.rel (!%p10_p5) target bundleno = 2 (0x2), region = 76 }

// kernel: _lambda_.11
= control target key start
LH: loop header
LB: loop body
LE: loop exit
PB: predicated region body
PF: predicated region fallthrough
CT: control target
= control target key end

     0   :  { %s2277_s24 = smov 0   ;;  %s2279_s25 = smov 0   ;;  %s2676_s0 = inlined_call_operand.vmem [shape: bf16[512,256], index: 0, kind: input, shape index: {}]   ;;  %s2677_s1 = inlined_call_operand.vmem [shape: bf16[256,128], index: 1, kind: input, shape index: {}]   ;;  %s2678_s2 = inlined_call_operand.vmem [shape: bf16[1,256], index: 2, kind: input, shape index: {}]   ;;  %s2679_s3 = inlined_call_operand.vmem [shape: bf16[1,256], index: 3, kind: input, shape index: {}]   ;;  %s2680_s4 = inlined_call_operand.vmem [shape: f32[1,128], index: 4, kind: input, shape index: {}]   ;;  %s2681_s5 = inlined_call_operand.vmem [shape: bf16[512,128], index: 5, kind: output, shape index: {0}]   ;;  %s2682_s6 = inlined_call_operand.vmem [shape: f32[16,128], index: 6, kind: output, shape index: {1}]   ;;  %s2683_s7 = inlined_call_operand.vmem [shape: f32[16,128], index: 7, kind: output, shape index: {2}]  }
   0x1   :  { %s2281_s26 = smov 0  }
   0x2 LB: > { %s37_s27 = sadd.s32 1, %s2229_s25  ;;  %p1818_p0 = scmp.ge.s32.totalorder %s2233_s26, 1  ;;  %s2233_s26 = sphi %s2281_s26, %s18_s26   ;;  %s2229_s25 = sphi %s2279_s25, %s2685_s25   ;;  %s2225_s24 = sphi %s2277_s24, %s2684_s24  }
   0x3   : > { %p39_p1 = scmp.ge.s32.totalorder %s37_s27, 2  ;;  %p320_p2 = scmp.lt.s32.totalorder %s2233_s26, 3 }
   0x5   : > { %s2687_s27 = smov (%p39_p1, %s37_s27), 0  ;;  %p321_p3 = pnand %p1818_p0, %p320_p2 }
   0x6   : > { %s1819_s21 = sshll.u32 (!%p321_p3), %s2225_s24, 5  ;;  %p436_p5 = scmp.lt.s32.totalorder (!%p321_p3), %s2225_s24, 1 }
   0x7   : > { %324 = sbr.rel (%p321_p3) target bundleno = 353 (0x161), region = 40  ;;  %p395_p4 = scmp.lt.s32.totalorder (!%p321_p3), %s1819_s21, 63 }
   0xc   : > { %v2195_v0 = vld [vmem:[%s2677_s1 + $0x78] sm:$0xff]   ;;  %v2197_v2 = vld [vmem:[%s2677_s1 + $0x70] sm:$0xff]   ;;  %v2199_v4 = vld [vmem:[%s2677_s1 + $0x68] sm:$0xff]   ;;  %v532_v9 = vlaneseq  ;;  %s2689_s21 = smov (!%p395_p4, %s1819_s21), 63  ;;  %v2235_v14 = vmov 1966171168  }
   0xd   : > { %v2196_v1 = vld [vmem:[%s2677_s1 + $0x38] sm:$0xff]   ;;  %2041 = vmatprep.subr.bf16.mxu0 %v2195_v0  ;;  %2153 = vmatprep.subr.bf16.mxu1 %v2195_v0  ;;  %v2198_v3 = vld [vmem:[%s2677_s1 + $0x30] sm:$0xff]   ;;  %v2200_v5 = vld [vmem:[%s2677_s1 + $0x28] sm:$0xff]   ;;  %v530_v15 = vunpack.c.l.s4 %v2235_v14  ;;  %s1913_s17 = sshll.u32 %s2689_s21, 3  ;;  %v2236_v57 = vmov 0   ;;  %s1823_s11 = sshll.u32 %s2689_s21, 2 }
   0xe   : > { %2042 = vmatpush3.bf16.msra.mxu0 %v2196_v1  ;;  %2161 = vmatpush3.bf16.msra.mxu1 %v2196_v1  ;;  %v2201_v6 = vld [vmem:[%s2677_s1 + $0x60] sm:$0xff]   ;;  %v2203_v8 = vld [vmem:[%s2677_s1 + $0x58] sm:$0xff]   ;;  %v2205_v11 = vld [vmem:[%s2677_s1 + $0x50] sm:$0xff]   ;;  %v533_v16 = vshrl.u32 %v532_v9, 7  ;;  %s2355_s29 = scalar_lea.vmem %s2676_s0, %s1913_s17  ;;  %s2507_s14 = scalar_lea.vmem %s2681_s5, %s1823_s11 }
   0xf   : > { %2043 = vmatprep.subr.bf16.mxu0 %v2197_v2  ;;  %2154 = vmatprep.subr.bf16.mxu1 %v2197_v2  ;;  %v2202_v7 = vld [vmem:[%s2677_s1 + $0x20] sm:$0xff]   ;;  %v2204_v10 = vld [vmem:[%s2677_s1 + $0x18] sm:$0xff]   ;;  %v2206_v17 = vld [vmem:[%s2677_s1 + $0x10] sm:$0xff]   ;;  %v531_v20 = vunpack.c.0.s8 %v530_v15  ;;  %s2691_s24 = smov (!%p436_p5, %s2225_s24), 1 }
  0x10   : > { %v1826_v12 = vld.sshfl [vmem:[%s2678_s2] sm:$0x11 pattern:$0x75316420]  ;;  %v2207_v18 = vld [vmem:[%s2677_s1 + $0x48] sm:$0xff]   ;;  %v548_v24 = vsub.s32 0, %v533_v16 }
  0x11   : > { %v1828_v13 = vld.sshfl [vmem:[%s2679_s3] sm:$0x11 pattern:$0x75316420]  ;;  %v528_v19 = vcombine.high %v1826_v12, %v1826_v12  ;;  %v534_v22 = vsub.s32 %v531_v20, %v533_v16  ;;  %v2208_v23 = vld [vmem:[%s2677_s1 + $0x8] sm:$0xff]   ;;  %v489_v41 = vld [vmem:[%s2355_s29 + $0x10] sm:$0xff] }
  0x12   : > { %2044 = vmatpush3.bf16.msra.mxu0 %v2198_v3  ;;  %2162 = vmatpush3.bf16.msra.mxu1 %v2198_v3  ;;  %v604_v21 = vcombine.high %v1828_v13, %v1828_v13  ;;  %v2209_v25 = vld [vmem:[%s2677_s1 + $0x40] sm:$0xff]   ;;  %v488_v40 = vld [vmem:[%s2355_s29 + $0x8] sm:$0xff]  ;;  %v490_v42 = vld [vmem:[%s2355_s29 + $0x18] sm:$0xff]  ;;  %s1824_s21 = sshll.u32 %s2691_s24, 3 }
  0x13   : > { %2045 = vmatprep.subr.bf16.mxu0 %v2199_v4  ;;  %2155 = vmatprep.subr.bf16.mxu1 %v2199_v4  ;;  %v535_v26 = vrot.slane %v1826_v12, %v534_v22  ;;  %v542_v27 = vrot.slane %v528_v19, %v534_v22  ;;  %v611_v28 = vrot.slane %v1828_v13, %v534_v22  ;;  %v2210_v34 = vld [vmem:[%s2677_s1] sm:$0xff]   ;;  %v492_v46 = vld [vmem:[%s2355_s29 + $0x28] sm:$0xff]  ;;  %v493_v62 = vld [vmem:[%s2355_s29 + $0x30] sm:$0xff]  ;;  %s442_s17 = scalar_lea.vmem %s2682_s6, %s1824_s21  ;;  %s449_s20 = scalar_lea.vmem %s2683_s7, %s1824_s21 }
  0x14   : > { %v618_v29 = vrot.slane %v604_v21, %v534_v22  ;;  %v487_v35 = vld [vmem:[%s2355_s29] sm:$0xff]  ;;  %v494_v0 = vld [vmem:[%s2355_s29 + $0x38] sm:$0xff]  ;;  %v504_v2 = vld [vmem:[%s2355_s29 + $0x88] sm:$0xff] }
  0x15   : > { %v544_v30 = vpack.i.b16 %v535_v26, %v535_v26  ;;  %v551_v31 = vpack.i.b16 %v542_v27, %v542_v27  ;;  %v620_v32 = vpack.i.b16 %v611_v28, %v611_v28  ;;  %v491_v45 = vld [vmem:[%s2355_s29 + $0x20] sm:$0xff] }
  0x16   : > { %2046 = vmatpush3.bf16.msra.mxu0 %v2200_v5  ;;  %2163 = vmatpush3.bf16.msra.mxu1 %v2200_v5  ;;  %v627_v33 = vpack.i.b16 %v618_v29, %v618_v29  ;;  %v503_v1 = vld [vmem:[%s2355_s29 + $0x80] sm:$0xff]  ;;  %v508_v29 = vld [vmem:[%s2355_s29 + $0xa8] sm:$0xff] }
  0x17   : > { %2047 = vmatprep.subr.bf16.mxu0 %v2201_v6  ;;  %2156 = vmatprep.subr.bf16.mxu1 %v2201_v6  ;;  %v549_v36 = vrot.slane %v544_v30, %v548_v24  ;;  %v556_v37 = vrot.slane %v551_v31, %v548_v24  ;;  %v625_v38 = vrot.slane %v620_v32, %v548_v24  ;;  %v507_v28 = vld [vmem:[%s2355_s29 + $0xa0] sm:$0xff] }
  0x18   : > { %v632_v39 = vrot.slane %v627_v33, %v548_v24  ;;  %v495_v33 = vld [vmem:[%s2355_s29 + $0x40] sm:$0xff] }
  0x19   : > { %v2364_v43 = vcombine.low %v549_v36, %v556_v37  ;;  %v510_v37 = vld [vmem:[%s2355_s29 + $0xb8] sm:$0xff] }
  0x1a   : > { %2048 = vmatpush3.bf16.msra.mxu0 %v2202_v7  ;;  %2164 = vmatpush3.bf16.msra.mxu1 %v2202_v7  ;;  %v2366_v44 = vcombine.low %v625_v38, %v632_v39  ;;  %v505_v7 = vld [vmem:[%s2355_s29 + $0x90] sm:$0xff] }
  0x1b   : > { %2049 = vmatprep.subr.bf16.mxu0 %v2203_v8  ;;  %2157 = vmatprep.subr.bf16.mxu1 %v2203_v8  ;;  %v563_v47 = vmul.bf16 %v2364_v43, %v487_v35  ;;  %v564_v48 = vmul.bf16 %v2364_v43, %v488_v40  ;;  %v565_v49 = vmul.bf16 %v2364_v43, %v489_v41  ;;  %v506_v8 = vld [vmem:[%s2355_s29 + $0x98] sm:$0xff]  ;;  %v509_v35 = vld [vmem:[%s2355_s29 + $0xb0] sm:$0xff] }
  0x1c   : > { %v566_v50 = vmul.bf16 %v2364_v43, %v490_v42  ;;  %v567_v51 = vmul.bf16 %v2364_v43, %v491_v45  ;;  %v568_v52 = vmul.bf16 %v2364_v43, %v492_v46  ;;  %v569_v9 = vmul.bf16 %v2364_v43, %v493_v62 }
  0x1d   : > { %v639_v53 = vadd.bf16 %v2366_v44, %v563_v47  ;;  %v640_v54 = vadd.bf16 %v2366_v44, %v564_v48  ;;  %v641_v55 = vadd.bf16 %v2366_v44, %v565_v49  ;;  %v580_v12 = vmul.bf16 %v2364_v43, %v504_v2 }
  0x1e   : > { %2050 = vmatpush3.bf16.msra.mxu0 %v2204_v10  ;;  %2165 = vmatpush3.bf16.msra.mxu1 %v2204_v10  ;;  %v642_v56 = vadd.bf16 %v2366_v44, %v566_v50  ;;  %v643_v63 = vadd.bf16 %v2366_v44, %v567_v51  ;;  %v644_v6 = vadd.bf16 %v2366_v44, %v568_v52 }
  0x1f   : > { %2051 = vmatprep.subr.bf16.mxu0 %v2205_v11  ;;  %2158 = vmatprep.subr.bf16.mxu1 %v2205_v11  ;;  %v671_v58 = vmax.bf16 %v2236_v57, %v639_v53  ;;  %v672_v59 = vmax.bf16 %v2236_v57, %v640_v54  ;;  %v673_v60 = vmax.bf16 %v2236_v57, %v641_v55 }
  0x20   : > { %v674_v61 = vmax.bf16 %v2236_v57, %v642_v56  ;;  %v570_v10 = vmul.bf16 %v2364_v43, %v494_v0  ;;  %v579_v11 = vmul.bf16 %v2364_v43, %v503_v1  ;;  %v581_v13 = vmul.bf16 %v2364_v43, %v505_v7  ;;  %v497_v56 = vld [vmem:[%s2355_s29 + $0x50] sm:$0xff]  ;;  %v512_v0 = vld [vmem:[%s2355_s29 + $0xc8] sm:$0xff] }
  0x21   : > { %v1831_v3 = vcombine.high %v671_v58, %v672_v59  ;;  %v1830_v4 = vcombine.low %v671_v58, %v672_v59  ;;  %v582_v14 = vmul.bf16 %v2364_v43, %v506_v8  ;;  %v675_v15 = vmax.bf16 %v2236_v57, %v643_v63  ;;  %v498_v58 = vld [vmem:[%s2355_s29 + $0x58] sm:$0xff]  ;;  %v511_v63 = vld [vmem:[%s2355_s29 + $0xc0] sm:$0xff] }
  0x22   : > { %2052 = vmatpush3.bf16.msra.mxu0 %v2206_v17  ;;  %2166 = vmatpush3.bf16.msra.mxu1 %v2206_v17  ;;  %v1833_v5 = vcombine.high %v673_v60, %v674_v61  ;;  %v676_v16 = vmax.bf16 %v2236_v57, %v644_v6  ;;  %v655_v17 = vadd.bf16 %v2366_v44, %v579_v11 }
  0x23   : > { %2053 = vmatprep.subr.bf16.mxu0 %v2207_v18  ;;  %2159 = vmatprep.subr.bf16.mxu1 %v2207_v18  ;;  %v656_v18 = vadd.bf16 %v2366_v44, %v580_v12  ;;  %v657_v19 = vadd.bf16 %v2366_v44, %v581_v13  ;;  %v658_v20 = vadd.bf16 %v2366_v44, %v582_v14  ;;  %v499_v14 = vld [vmem:[%s2355_s29 + $0x60] sm:$0xff] }
  0x24   : > { %1055 = vmatprep.mubr.bf16.mxu0 %v1831_v3  ;;  %v645_v21 = vadd.bf16 %v2366_v44, %v569_v9  ;;  %v646_v22 = vadd.bf16 %v2366_v44, %v570_v10  ;;  %v1835_v30 = vcombine.high %v675_v15, %v676_v16  ;;  %v583_v40 = vmul.bf16 %v2364_v43, %v507_v28 }
  0x25   : > { %v688_v24 = vmax.bf16 %v2236_v57, %v656_v18  ;;  %v689_v26 = vmax.bf16 %v2236_v57, %v657_v19  ;;  %v690_v27 = vmax.bf16 %v2236_v57, %v658_v20  ;;  %v584_v41 = vmul.bf16 %v2364_v43, %v508_v29  ;;  %v513_v19 = vld [vmem:[%s2355_s29 + $0xd0] sm:$0xff]  ;;  %v514_v20 = vld [vmem:[%s2355_s29 + $0xd8] sm:$0xff] }
  0x26   : > { %2054 = vmatpush3.bf16.msra.mxu0 %v2208_v23  ;;  %2167 = vmatpush3.bf16.msra.mxu1 %v2208_v23  ;;  %v687_v23 = vmax.bf16 %v2236_v57, %v655_v17  ;;  %v677_v38 = vmax.bf16 %v2236_v57, %v645_v21  ;;  %v678_v39 = vmax.bf16 %v2236_v57, %v646_v22 }
  0x27   : > { %2055 = vmatprep.subr.bf16.mxu0 %v2209_v25  ;;  %2160 = vmatprep.subr.bf16.mxu1 %v2209_v25  ;;  %v1832_v25 = vcombine.low %v673_v60, %v674_v61  ;;  %v1849_v36 = vcombine.high %v689_v26, %v690_v27  ;;  %v571_v42 = vmul.bf16 %v2364_v43, %v495_v33  ;;  %v501_v33 = vld [vmem:[%s2355_s29 + $0x70] sm:$0xff] }
  0x28   : > { %v1847_v31 = vcombine.high %v687_v23, %v688_v24  ;;  %v1846_v32 = vcombine.low %v687_v23, %v688_v24  ;;  %v585_v46 = vmul.bf16 %v2364_v43, %v509_v35  ;;  %v659_v47 = vadd.bf16 %v2366_v44, %v583_v40  ;;  %v516_v40 = vld [vmem:[%s2355_s29 + $0xe8] sm:$0xff] }
  0x29   : > { %v660_v48 = vadd.bf16 %v2366_v44, %v584_v41  ;;  %v586_v49 = vmul.bf16 %v2364_v43, %v510_v37  ;;  %v1834_v50 = vcombine.low %v675_v15, %v676_v16  ;;  %v647_v53 = vadd.bf16 %v2366_v44, %v571_v42  ;;  %v500_v15 = vld [vmem:[%s2355_s29 + $0x68] sm:$0xff] }
  0x2a   : > { %2056 = vmatpush3.bf16.msra.mxu0 %v2210_v34  ;;  %2168 = vmatpush3.bf16.msra.mxu1 %v2210_v34  ;;  %v496_v34 = vld [vmem:[%s2355_s29 + $0x48] sm:$0xff]  ;;  %v691_v51 = vmax.bf16 %v2236_v57, %v659_v47  ;;  %v1848_v55 = vcombine.low %v689_v26, %v690_v27  ;;  %v661_v59 = vadd.bf16 %v2366_v44, %v585_v46 }
  0x2b   : > { %1119 = vmatprep.mubr.bf16.mxu1 %v1847_v31  ;;  %v572_v45 = vmul.bf16 %v2364_v43, %v496_v34  ;;  %v692_v52 = vmax.bf16 %v2236_v57, %v660_v48  ;;  %v1837_v60 = vcombine.high %v677_v38, %v678_v39  ;;  %v662_v62 = vadd.bf16 %v2366_v44, %v586_v49  ;;  %v502_v34 = vld [vmem:[%s2355_s29 + $0x78] sm:$0xff] }
  0x2c   : > { %v573_v1 = vmul.bf16 %v2364_v43, %v497_v56  ;;  %v574_v2 = vmul.bf16 %v2364_v43, %v498_v58  ;;  %v679_v3 = vmax.bf16 %v2236_v57, %v647_v53  ;;  %v587_v7 = vmul.bf16 %v2364_v43, %v511_v63 }
  0x2d   : > { %1056 = vmatmul.mubr.bf16.vlgmr.msra.gmra.mxu0 %v1830_v4  ;;  %1120 = vmatmul.mubr.bf16.vlgmr.msra.gmra.mxu1 %v1846_v32  ;;  %v648_v54 = vadd.bf16 %v2366_v44, %v572_v45  ;;  %v1851_v61 = vcombine.high %v691_v51, %v692_v52  ;;  %v694_v6 = vmax.bf16 %v2236_v57, %v662_v62 }
  0x2e   : > { %1063 = vmatprep.mubr.bf16.mxu0 %v1833_v5  ;;  %1127 = vmatprep.mubr.bf16.mxu1 %v1849_v36  ;;  %v693_v5 = vmax.bf16 %v2236_v57, %v661_v59  ;;  %v588_v8 = vmul.bf16 %v2364_v43, %v512_v0  ;;  %v649_v9 = vadd.bf16 %v2366_v44, %v573_v1 }
  0x2f   : > { %v680_v4 = vmax.bf16 %v2236_v57, %v648_v54  ;;  %v650_v10 = vadd.bf16 %v2366_v44, %v574_v2  ;;  %v1836_v11 = vcombine.low %v677_v38, %v678_v39  ;;  %v1850_v12 = vcombine.low %v691_v51, %v692_v52  ;;  %v515_v39 = vld [vmem:[%s2355_s29 + $0xe0] sm:$0xff] }
  0x30   : > { %v1853_v16 = vcombine.high %v693_v5, %v694_v6  ;;  %v663_v17 = vadd.bf16 %v2366_v44, %v587_v7  ;;  %v664_v18 = vadd.bf16 %v2366_v44, %v588_v8  ;;  %v681_v21 = vmax.bf16 %v2236_v57, %v649_v9 }
  0x31   : > { %v1839_v13 = vcombine.high %v679_v3, %v680_v4  ;;  %v682_v22 = vmax.bf16 %v2236_v57, %v650_v10  ;;  %v575_v23 = vmul.bf16 %v2364_v43, %v499_v14  ;;  %v576_v24 = vmul.bf16 %v2364_v43, %v500_v15 }
  0x32   : > { %v695_v26 = vmax.bf16 %v2236_v57, %v663_v17  ;;  %v696_v27 = vmax.bf16 %v2236_v57, %v664_v18  ;;  %v590_v28 = vmul.bf16 %v2364_v43, %v514_v20  ;;  %v1838_v29 = vcombine.low %v679_v3, %v680_v4  ;;  %v2495_v18 = vld [vmem:[%s2680_s4] ss:$0 sm:$0xff] }
  0x33   : > { %v652_v31 = vadd.bf16 %v2366_v44, %v576_v24  ;;  %v1852_v32 = vcombine.low %v693_v5, %v694_v6  ;;  %v1841_v35 = vcombine.high %v681_v21, %v682_v22  ;;  %v577_v41 = vmul.bf16 %v2364_v43, %v501_v33 }
  0x34   : > { %v1855_v36 = vcombine.high %v695_v26, %v696_v27  ;;  %v666_v38 = vadd.bf16 %v2366_v44, %v590_v28  ;;  %v578_v42 = vmul.bf16 %v2364_v43, %v502_v34  ;;  %v591_v47 = vmul.bf16 %v2364_v43, %v515_v39 }
  0x35   : > { %1064 = vmatmul.mubr.bf16.gmra.mxu0 %v1832_v25  ;;  %1128 = vmatmul.mubr.bf16.gmra.mxu1 %v1848_v55  ;;  %v589_v25 = vmul.bf16 %v2364_v43, %v513_v19  ;;  %v684_v46 = vmax.bf16 %v2236_v57, %v652_v31  ;;  %v1840_v51 = vcombine.low %v681_v21, %v682_v22 }
  0x36   : > { %1071 = vmatprep.mubr.bf16.mxu0 %v1835_v30  ;;  %1135 = vmatprep.mubr.bf16.mxu1 %v1851_v61  ;;  %v651_v30 = vadd.bf16 %v2366_v44, %v575_v23  ;;  %v698_v49 = vmax.bf16 %v2236_v57, %v666_v38  ;;  %v653_v52 = vadd.bf16 %v2366_v44, %v577_v41  ;;  %v518_v61 = vld [vmem:[%s2355_s29 + $0xf8] sm:$0xff] }
  0x37   : > { %v665_v37 = vadd.bf16 %v2366_v44, %v589_v25  ;;  %v654_v53 = vadd.bf16 %v2366_v44, %v578_v42  ;;  %v1854_v54 = vcombine.low %v695_v26, %v696_v27  ;;  %v667_v58 = vadd.bf16 %v2366_v44, %v591_v47 }
  0x38   : > { %v683_v45 = vmax.bf16 %v2236_v57, %v651_v30  ;;  %v685_v62 = vmax.bf16 %v2236_v57, %v653_v52  ;;  %v594_v3 = vmul.bf16 %v2364_v43, %v518_v61 }
  0x39   : > { %v697_v48 = vmax.bf16 %v2236_v57, %v665_v37  ;;  %v686_v63 = vmax.bf16 %v2236_v57, %v654_v53  ;;  %v699_v1 = vmax.bf16 %v2236_v57, %v667_v58 }
  0x3a   : > { %v1843_v55 = vcombine.high %v683_v45, %v684_v46  ;;  %v1842_v4 = vcombine.low %v683_v45, %v684_v46  ;;  %v670_v9 = vadd.bf16 %v2366_v44, %v594_v3 }
  0x3b   : > { %v1857_v56 = vcombine.high %v697_v48, %v698_v49  ;;  %v1856_v5 = vcombine.low %v697_v48, %v698_v49  ;;  %v1845_v6 = vcombine.high %v685_v62, %v686_v63 }
  0x3d   : > { %1072 = vmatmul.mubr.bf16.gmra.mxu0 %v1834_v50  ;;  %1136 = vmatmul.mubr.bf16.gmra.mxu1 %v1850_v12  ;;  %v592_v50 = vmul.bf16 %v2364_v43, %v516_v40  ;;  %v1844_v12 = vcombine.low %v685_v62, %v686_v63 }
  0x3e   : > { %1079 = vmatprep.mubr.bf16.mxu0 %v1837_v60  ;;  %1143 = vmatprep.mubr.bf16.mxu1 %v1853_v16  ;;  %v517_v60 = vld [vmem:[%s2355_s29 + $0xf0] sm:$0xff] }
  0x3f   : > { %v668_v59 = vadd.bf16 %v2366_v44, %v592_v50  ;;  %v593_v0 = vmul.bf16 %v2364_v43, %v517_v60 }
  0x41   : > { %v700_v2 = vmax.bf16 %v2236_v57, %v668_v59  ;;  %v669_v8 = vadd.bf16 %v2366_v44, %v593_v0 }
  0x43   : > { %v1859_v7 = vcombine.high %v699_v1, %v700_v2  ;;  %v701_v10 = vmax.bf16 %v2236_v57, %v669_v8 }
  0x45   : > { %1080 = vmatmul.mubr.bf16.gmra.mxu0 %v1836_v11  ;;  %1144 = vmatmul.mubr.bf16.gmra.mxu1 %v1852_v32  ;;  %v702_v11 = vmax.bf16 %v2236_v57, %v670_v9 }
  0x46   : > { %1087 = vmatprep.mubr.bf16.mxu0 %v1839_v13  ;;  %1151 = vmatprep.mubr.bf16.mxu1 %v1855_v36  ;;  %v1858_v13 = vcombine.low %v699_v1, %v700_v2 }
  0x47   : > { %v1861_v43 = vcombine.high %v701_v10, %v702_v11  ;;  %v1860_v14 = vcombine.low %v701_v10, %v702_v11 }
  0x4d   : > { %1088 = vmatmul.mubr.bf16.gmra.mxu0 %v1838_v29  ;;  %1152 = vmatmul.mubr.bf16.gmra.mxu1 %v1854_v54 }
  0x4e   : > { %1095 = vmatprep.mubr.bf16.mxu0 %v1841_v35  ;;  %1159 = vmatprep.mubr.bf16.mxu1 %v1857_v56 }
  0x55   : > { %1096 = vmatmul.mubr.bf16.gmra.mxu0 %v1840_v51  ;;  %1160 = vmatmul.mubr.bf16.gmra.mxu1 %v1856_v5 }
  0x56   : > { %1103 = vmatprep.mubr.bf16.mxu0 %v1843_v55  ;;  %1167 = vmatprep.mubr.bf16.mxu1 %v1859_v7 }
  0x5d   : > { %1104 = vmatmul.mubr.bf16.gmra.mxu0 %v1842_v4  ;;  %1168 = vmatmul.mubr.bf16.gmra.mxu1 %v1858_v13 }
  0x5e   : > { %1111 = vmatprep.mubr.bf16.mxu0 %v1845_v6  ;;  %1175 = vmatprep.mubr.bf16.mxu1 %v1861_v43 }
  0x65   : > { %1112 = vmatmul.mubr.bf16.gmra.mxu0 %v1844_v12  ;;  %1176 = vmatmul.mubr.bf16.gmra.mxu1 %v1860_v14 }
  0xed   : > { %v2057_v15 = vpop.f32.mrf.mxu0  ;;  %v2105_v21 = vpop.f32.mrf.mxu1 }
  0xef   : > { %v2058_v16 = vpop.f32.mrf.mxu0  ;;  %v2106_v25 = vpop.f32.mrf.mxu1 }
  0xf0   : > { %v2059_v17 = vadd.f32 %v2058_v16, %v2057_v15  ;;  %v2107_v28 = vadd.f32 %v2106_v25, %v2105_v21 }
  0xf1   : > { %v2060_v44 = vpop.f32.mrf.mxu0  ;;  %v2108_v29 = vpop.f32.mrf.mxu1 }
  0xf2   : > { %v2499_v22 = vadd.f32 %v2059_v17, %v2495_v18  ;;  %v2513_v36 = vadd.f32 %v2107_v28, %v2495_v18 }
  0xf3   : > { %v2061_v19 = vpop.f32.mrf.mxu0  ;;  %v2109_v32 = vpop.f32.mrf.mxu1 }
  0xf4   : > { %v2062_v57 = vadd.f32 %v2061_v19, %v2060_v44  ;;  %v2110_v34 = vadd.f32 %v2109_v32, %v2108_v29  ;;  %v1359_v25 = vmul.f32 %v2499_v22, %v2499_v22 }
  0xf5   : > { %v2063_v20 = vpop.f32.mrf.mxu0  ;;  %v2111_v37 = vpop.f32.mrf.mxu1 }
  0xf6   : > { %v2502_v23 = vadd.f32 %v2062_v57, %v2495_v18  ;;  %v2522_v40 = vadd.f32 %v2110_v34, %v2495_v18 }
  0xf7   : > { %v2064_v24 = vpop.f32.mrf.mxu0  ;;  %v2112_v42 = vpop.f32.mrf.mxu1 }
  0xf8   : > { %v1949_v26 = vpack.c.bf16 %v2502_v23, %v2499_v22  ;;  %v2065_v30 = vadd.f32 %v2064_v24, %v2063_v20  ;;  %v1989_v47 = vpack.c.bf16 %v2522_v40, %v2513_v36  ;;  %v2113_v48 = vadd.f32 %v2112_v42, %v2111_v37 }
  0xf9   : > { %v2066_v27 = vpop.f32.mrf.mxu0  ;;  %v2114_v49 = vpop.f32.mrf.mxu1  ;;  %v1360_v17 = vmul.f32 %v2502_v23, %v2502_v23  ;;  %v1322_v29 = vadd.f32 %v2502_v23, %v2499_v22 }
  0xfa   : > { %1950 = vst [vmem:[%s2507_s14] sm:$0xff] %v1949_v26   ;;  %v2516_v38 = vadd.f32 %v2065_v30, %v2495_v18  ;;  %2033 = vst [vmem:[%s2507_s14 + $0x40] sm:$0xff] %v1989_v47   ;;  %v2531_v56 = vadd.f32 %v2113_v48, %v2495_v18 }
  0xfb   : > { %v2067_v31 = vpop.f32.mrf.mxu0  ;;  %v2115_v52 = vpop.f32.mrf.mxu1  ;;  %v1391_v32 = vadd.f32 %v1360_v17, %v1359_v25 }
  0xfc   : > { %v2068_v33 = vadd.f32 %v2067_v31, %v2066_v27  ;;  %v2116_v54 = vadd.f32 %v2115_v52, %v2114_v49  ;;  %v1361_v26 = vmul.f32 %v2516_v38, %v2516_v38 }
  0xfd   : > { %v2069_v35 = vpop.f32.mrf.mxu0  ;;  %v2117_v58 = vpop.f32.mrf.mxu1 }
  0xfe   : > { %v2519_v39 = vadd.f32 %v2068_v33, %v2495_v18  ;;  %v2538_v61 = vadd.f32 %v2116_v54, %v2495_v18  ;;  %v1392_v23 = vadd.f32 %v1391_v32, %v1361_v26 }
  0xff   : > { %v2070_v41 = vpop.f32.mrf.mxu0  ;;  %v2118_v63 = vpop.f32.mrf.mxu1 }
 0x100   : > { %v1954_v45 = vpack.c.bf16 %v2519_v39, %v2516_v38  ;;  %v2071_v50 = vadd.f32 %v2070_v41, %v2069_v35  ;;  %v1994_v2 = vpack.c.bf16 %v2538_v61, %v2531_v56  ;;  %v2119_v3 = vadd.f32 %v2118_v63, %v2117_v58 }
 0x101   : > { %v2072_v46 = vpop.f32.mrf.mxu0  ;;  %v2120_v4 = vpop.f32.mrf.mxu1  ;;  %v1362_v33 = vmul.f32 %v2519_v39, %v2519_v39  ;;  %v1323_v41 = vadd.f32 %v1322_v29, %v2516_v38 }
 0x102   : > { %2026 = vst [vmem:[%s2507_s14 + $0x8] sm:$0xff] %v1954_v45   ;;  %v1294_v59 = vadd.f32 %v2071_v50, %v2495_v18  ;;  %2034 = vst [vmem:[%s2507_s14 + $0x48] sm:$0xff] %v1994_v2   ;;  %v2546_v11 = vadd.f32 %v2119_v3, %v2495_v18 }
 0x103   : > { %v2073_v51 = vpop.f32.mrf.mxu0  ;;  %v2121_v7 = vpop.f32.mrf.mxu1  ;;  %v1324_v49 = vadd.f32 %v1323_v41, %v2519_v39 }
 0x104   : > { %v2074_v53 = vadd.f32 %v2073_v51, %v2072_v46  ;;  %v2122_v9 = vadd.f32 %v2121_v7, %v2120_v4  ;;  %v1363_v46 = vmul.f32 %v1294_v59, %v1294_v59  ;;  %v1393_v51 = vadd.f32 %v1392_v23, %v1362_v33 }
 0x105   : > { %v2075_v55 = vpop.f32.mrf.mxu0  ;;  %v2123_v12 = vpop.f32.mrf.mxu1  ;;  %v1325_v58 = vadd.f32 %v1324_v49, %v1294_v59 }
 0x106   : > { %v2535_v60 = vadd.f32 %v2074_v53, %v2495_v18  ;;  %v2553_v14 = vadd.f32 %v2122_v9, %v2495_v18  ;;  %v1394_v63 = vadd.f32 %v1393_v51, %v1363_v46 }
 0x107   : > { %v2076_v62 = vpop.f32.mrf.mxu0  ;;  %v2124_v16 = vpop.f32.mrf.mxu1 }
 0x108   : > { %v1959_v0 = vpack.c.bf16 %v2535_v60, %v1294_v59  ;;  %v2077_v5 = vadd.f32 %v2076_v62, %v2075_v55  ;;  %v1999_v57 = vpack.c.bf16 %v2553_v14, %v2546_v11  ;;  %v2125_v20 = vadd.f32 %v2124_v16, %v2123_v12 }
 0x109   : > { %v2078_v1 = vpop.f32.mrf.mxu0  ;;  %v2126_v21 = vpop.f32.mrf.mxu1  ;;  %v1364_v38 = vmul.f32 %v2535_v60, %v2535_v60  ;;  %v1326_v39 = vadd.f32 %v1325_v58, %v2535_v60 }
 0x10a   : > { %2027 = vst [vmem:[%s2507_s14 + $0x10] sm:$0xff] %v1959_v0   ;;  %v1296_v13 = vadd.f32 %v2077_v5, %v2495_v18  ;;  %2035 = vst [vmem:[%s2507_s14 + $0x50] sm:$0xff] %v1999_v57   ;;  %v2571_v35 = vadd.f32 %v2125_v20, %v2495_v18 }
 0x10b   : > { %v2079_v6 = vpop.f32.mrf.mxu0  ;;  %v2127_v28 = vpop.f32.mrf.mxu1  ;;  %v1395_v5 = vadd.f32 %v1394_v63, %v1364_v38 }
 0x10c   : > { %v2080_v8 = vadd.f32 %v2079_v6, %v2078_v1  ;;  %v2128_v31 = vadd.f32 %v2127_v28, %v2126_v21  ;;  %v1365_v0 = vmul.f32 %v1296_v13, %v1296_v13  ;;  %v1327_v9 = vadd.f32 %v1326_v39, %v1296_v13 }
 0x10d   : > { %v2081_v10 = vpop.f32.mrf.mxu0  ;;  %v2129_v37 = vpop.f32.mrf.mxu1 }
 0x10e   : > { %v2550_v43 = vadd.f32 %v2080_v8, %v2495_v18  ;;  %v2577_v22 = vadd.f32 %v2128_v31, %v2495_v18  ;;  %v1396_v60 = vadd.f32 %v1395_v5, %v1365_v0 }
 0x10f   : > { %v2082_v15 = vpop.f32.mrf.mxu0  ;;  %v2130_v48 = vpop.f32.mrf.mxu1 }
 0x110   : > { %v1964_v44 = vpack.c.bf16 %v2550_v43, %v1296_v13  ;;  %v2083_v24 = vadd.f32 %v2082_v15, %v2081_v10  ;;  %v2004_v53 = vpack.c.bf16 %v2577_v22, %v2571_v35  ;;  %v2131_v54 = vadd.f32 %v2130_v48, %v2129_v37 }
 0x111   : > { %v2084_v19 = vpop.f32.mrf.mxu0  ;;  %v2132_v55 = vpop.f32.mrf.mxu1  ;;  %v1366_v6 = vmul.f32 %v2550_v43, %v2550_v43 }
 0x112   : > { %2028 = vst [vmem:[%s2507_s14 + $0x18] sm:$0xff] %v1964_v44   ;;  %v1298_v42 = vadd.f32 %v2083_v24, %v2495_v18  ;;  %2036 = vst [vmem:[%s2507_s14 + $0x58] sm:$0xff] %v2004_v53   ;;  %v2590_v8 = vadd.f32 %v2131_v54, %v2495_v18 }
 0x113   : > { %v2085_v27 = vpop.f32.mrf.mxu0  ;;  %v2133_v2 = vpop.f32.mrf.mxu1  ;;  %v1397_v21 = vadd.f32 %v1396_v60, %v1366_v6 }
 0x114   : > { %v2086_v30 = vadd.f32 %v2085_v27, %v2084_v19  ;;  %v2134_v4 = vadd.f32 %v2133_v2, %v2132_v55  ;;  %v1367_v16 = vmul.f32 %v1298_v42, %v1298_v42  ;;  %v1328_v19 = vadd.f32 %v1327_v9, %v2550_v43 }
 0x115   : > { %v2087_v34 = vpop.f32.mrf.mxu0  ;;  %v2135_v59 = vpop.f32.mrf.mxu1 }
 0x116   : > { %v1299_v45 = vadd.f32 %v2086_v30, %v2495_v18  ;;  %v2595_v15 = vadd.f32 %v2134_v4, %v2495_v18  ;;  %v1329_v28 = vadd.f32 %v1328_v19, %v1298_v42  ;;  %v1398_v29 = vadd.f32 %v1397_v21, %v1367_v16 }
 0x117   : > { %v2088_v47 = vpop.f32.mrf.mxu0  ;;  %v2136_v17 = vpop.f32.mrf.mxu1 }
 0x118   : > { %v1969_v50 = vpack.c.bf16 %v1299_v45, %v1298_v42  ;;  %v2089_v62 = vadd.f32 %v2088_v47, %v2087_v34  ;;  %v1368_v24 = vmul.f32 %v1299_v45, %v1299_v45  ;;  %v2009_v25 = vpack.c.bf16 %v2595_v15, %v2590_v8 }
 0x119   : > { %v2090_v52 = vpop.f32.mrf.mxu0  ;;  %v2137_v26 = vadd.f32 %v2136_v17, %v2135_v59  ;;  %v2138_v27 = vpop.f32.mrf.mxu1  ;;  %v1330_v43 = vadd.f32 %v1329_v28, %v1299_v45  ;;  %v1375_v28 = vmul.f32 %v2513_v36, %v2513_v36 }
 0x11a   : > { %2029 = vst [vmem:[%s2507_s14 + $0x20] sm:$0xff] %v1969_v50   ;;  %v1300_v10 = vadd.f32 %v2089_v62, %v2495_v18  ;;  %2037 = vst [vmem:[%s2507_s14 + $0x60] sm:$0xff] %v2009_v25   ;;  %v1399_v41 = vadd.f32 %v1398_v29, %v1368_v24 }
 0x11b   : > { %v2091_v1 = vpop.f32.mrf.mxu0  ;;  %v2139_v33 = vpop.f32.mrf.mxu1  ;;  %v2604_v47 = vadd.f32 %v2137_v26, %v2495_v18 }
 0x11c   : > { %v2092_v3 = vadd.f32 %v2091_v1, %v2090_v52  ;;  %v1369_v30 = vmul.f32 %v1300_v10, %v1300_v10  ;;  %v2140_v37 = vadd.f32 %v2139_v33, %v2138_v27  ;;  %v1331_v49 = vadd.f32 %v1330_v43, %v1300_v10 }
 0x11d   : > { %v2093_v7 = vpop.f32.mrf.mxu0  ;;  %v2141_v48 = vpop.f32.mrf.mxu1 }
 0x11e   : > { %v1301_v12 = vadd.f32 %v2092_v3, %v2495_v18  ;;  %v2608_v50 = vadd.f32 %v2140_v37, %v2495_v18  ;;  %v1400_v51 = vadd.f32 %v1399_v41, %v1369_v30  ;;  %v1377_v41 = vmul.f32 %v2531_v56, %v2531_v56 }
 0x11f   : > { %v2094_v44 = vpop.f32.mrf.mxu0  ;;  %v2142_v45 = vpop.f32.mrf.mxu1 }
 0x120   : > { %v1974_v57 = vpack.c.bf16 %v1301_v12, %v1300_v10  ;;  %v2095_v20 = vadd.f32 %v2094_v44, %v2093_v7  ;;  %v1370_v23 = vmul.f32 %v1301_v12, %v1301_v12  ;;  %v1332_v53 = vadd.f32 %v1331_v49, %v1301_v12 }
 0x121   : > { %v2096_v13 = vpop.f32.mrf.mxu0  ;;  %v2014_v63 = vpack.c.bf16 %v2608_v50, %v2604_v47  ;;  %v2143_v0 = vadd.f32 %v2142_v45, %v2141_v48  ;;  %v2144_v1 = vpop.f32.mrf.mxu1  ;;  %v1378_v48 = vmul.f32 %v2538_v61, %v2538_v61 }
 0x122   : > { %2030 = vst [vmem:[%s2507_s14 + $0x28] sm:$0xff] %v1974_v57   ;;  %v1302_v31 = vadd.f32 %v2095_v20, %v2495_v18  ;;  %v1401_v58 = vadd.f32 %v1400_v51, %v1370_v23 }
 0x123   : > { %v2097_v32 = vpop.f32.mrf.mxu0  ;;  %2038 = vst [vmem:[%s2507_s14 + $0x68] sm:$0xff] %v2014_v63   ;;  %v2145_v6 = vpop.f32.mrf.mxu1  ;;  %v1318_v12 = vadd.f32 %v2143_v0, %v2495_v18 }
 0x124   : > { %v2098_v34 = vadd.f32 %v2097_v32, %v2096_v13  ;;  %v1371_v38 = vmul.f32 %v1302_v31, %v1302_v31  ;;  %v1333_v2 = vadd.f32 %v1332_v53, %v1302_v31  ;;  %v2146_v10 = vadd.f32 %v2145_v6, %v2144_v1 }
 0x125   : > { %v2099_v46 = vpop.f32.mrf.mxu0  ;;  %v2147_v60 = vpop.f32.mrf.mxu1  ;;  %v1381_v53 = vmul.f32 %v2571_v35, %v2571_v35  ;;  %v1384_v1 = vmul.f32 %v2595_v15, %v2595_v15 }
 0x126   : > { %v1303_v42 = vadd.f32 %v2098_v34, %v2495_v18  ;;  %v1402_v4 = vadd.f32 %v1401_v58, %v1371_v38  ;;  %v1319_v19 = vadd.f32 %v2146_v10, %v2495_v18 }
 0x127   : > { %v2100_v52 = vpop.f32.mrf.mxu0  ;;  %v2148_v57 = vpop.f32.mrf.mxu1 }
 0x128   : > { %v1979_v54 = vpack.c.bf16 %v1303_v42, %v1302_v31  ;;  %v2101_v55 = vadd.f32 %v2100_v52, %v2099_v46  ;;  %v1372_v39 = vmul.f32 %v1303_v42, %v1303_v42  ;;  %v1334_v7 = vadd.f32 %v1333_v2, %v1303_v42 }
 0x129   : > { %v2102_v62 = vpop.f32.mrf.mxu0  ;;  %v2019_v25 = vpack.c.bf16 %v1319_v19, %v1318_v12  ;;  %v2149_v26 = vadd.f32 %v2148_v57, %v2147_v60  ;;  %v2150_v27 = vpop.f32.mrf.mxu1  ;;  %v1376_v31 = vmul.f32 %v2522_v40, %v2522_v40 }
 0x12a   : > { %2031 = vst [vmem:[%s2507_s14 + $0x30] sm:$0xff] %v1979_v54   ;;  %v1304_v3 = vadd.f32 %v2101_v55, %v2495_v18  ;;  %v1403_v16 = vadd.f32 %v1402_v4, %v1372_v39  ;;  %v1382_v55 = vmul.f32 %v2577_v22, %v2577_v22 }
 0x12b   : > { %v2103_v5 = vpop.f32.mrf.mxu0  ;;  %2039 = vst [vmem:[%s2507_s14 + $0x70] sm:$0xff] %v2019_v25   ;;  %v2151_v32 = vpop.f32.mrf.mxu1  ;;  %v1320_v34 = vadd.f32 %v2149_v26, %v2495_v18 }
 0x12c   : > { %v1373_v59 = vmul.f32 %v1304_v3, %v1304_v3  ;;  %v2104_v9 = vadd.f32 %v2103_v5, %v2102_v62  ;;  %v1335_v44 = vadd.f32 %v1334_v7, %v1304_v3  ;;  %v2152_v37 = vadd.f32 %v2151_v32, %v2150_v27 }
 0x12d   : > { %v1387_v7 = vmul.f32 %v1318_v12, %v1318_v12 }
 0x12e   : > { %v1305_v17 = vadd.f32 %v2104_v9, %v2495_v18  ;;  %v1404_v20 = vadd.f32 %v1403_v16, %v1373_v59  ;;  %v1321_v46 = vadd.f32 %v2152_v37, %v2495_v18  ;;  %v1388_v9 = vmul.f32 %v1319_v19, %v1319_v19 }
 0x12f   : > { %v1389_v16 = vmul.f32 %v1320_v34, %v1320_v34 }
 0x130   : > { %v1336_v21 = vadd.f32 %v1335_v44, %v1305_v17  ;;  %v1374_v24 = vmul.f32 %v1305_v17, %v1305_v17  ;;  %v1984_v13 = vpack.c.bf16 %v1305_v17, %v1304_v3  ;;  %v2024_v51 = vpack.c.bf16 %v1321_v46, %v1320_v34 }
 0x132   : > { %v1337_v29 = vadd.f32 %v1336_v21, %v2513_v36  ;;  %v1405_v30 = vadd.f32 %v1404_v20, %v1374_v24  ;;  %2032 = vst [vmem:[%s2507_s14 + $0x38] sm:$0xff] %v1984_v13   ;;  %2040 = vst [vmem:[%s2507_s14 + $0x78] sm:$0xff] %v2024_v51  }
 0x134   : > { %v1338_v33 = vadd.f32 %v1337_v29, %v2522_v40  ;;  %v1406_v43 = vadd.f32 %v1405_v30, %v1375_v28  ;;  %v1379_v40 = vmul.f32 %v2546_v11, %v2546_v11 }
 0x136   : > { %v1339_v23 = vadd.f32 %v1338_v33, %v2531_v56  ;;  %v1407_v36 = vadd.f32 %v1406_v43, %v1376_v31  ;;  %v1380_v56 = vmul.f32 %v2553_v14, %v2553_v14 }
 0x138   : > { %v1340_v49 = vadd.f32 %v1339_v23, %v2538_v61  ;;  %v1408_v42 = vadd.f32 %v1407_v36, %v1377_v41 }
 0x13a   : > { %v1409_v38 = vadd.f32 %v1408_v42, %v1378_v48  ;;  %v1341_v52 = vadd.f32 %v1340_v49, %v2546_v11  ;;  %v1383_v11 = vmul.f32 %v2590_v8, %v2590_v8 }
 0x13c   : > { %v1342_v45 = vadd.f32 %v1341_v52, %v2553_v14  ;;  %v1410_v18 = vadd.f32 %v1409_v38, %v1379_v40 }
 0x13e   : > { %v1343_v61 = vadd.f32 %v1342_v45, %v2571_v35  ;;  %v1411_v54 = vadd.f32 %v1410_v18, %v1380_v56 }
 0x140   : > { %v1344_v58 = vadd.f32 %v1343_v61, %v2577_v22  ;;  %v1412_v62 = vadd.f32 %v1411_v54, %v1381_v53  ;;  %v1385_v22 = vmul.f32 %v2604_v47, %v2604_v47 }
 0x142   : > { %v1345_v63 = vadd.f32 %v1344_v58, %v2590_v8  ;;  %v1413_v0 = vadd.f32 %v1412_v62, %v1382_v55  ;;  %v1386_v8 = vmul.f32 %v2608_v50, %v2608_v50 }
 0x144   : > { %v1346_v14 = vadd.f32 %v1345_v63, %v2595_v15  ;;  %v1414_v2 = vadd.f32 %v1413_v0, %v1383_v11 }
 0x146   : > { %v1415_v35 = vadd.f32 %v1414_v2, %v1384_v1  ;;  %v1347_v39 = vadd.f32 %v1346_v14, %v2604_v47  ;;  %v1390_v47 = vmul.f32 %v1321_v46, %v1321_v46 }
 0x148   : > { %v1416_v3 = vadd.f32 %v1415_v35, %v1385_v22  ;;  %v1348_v4 = vadd.f32 %v1347_v39, %v2608_v50 }
 0x14a   : > { %v1417_v5 = vadd.f32 %v1416_v3, %v1386_v8  ;;  %v1349_v6 = vadd.f32 %v1348_v4, %v1318_v12 }
 0x14c   : > { %v1418_v59 = vadd.f32 %v1417_v5, %v1387_v7  ;;  %v1350_v15 = vadd.f32 %v1349_v6, %v1319_v19 }
 0x14e   : > { %v1419_v10 = vadd.f32 %v1418_v59, %v1388_v9  ;;  %v1351_v60 = vadd.f32 %v1350_v15, %v1320_v34 }
 0x150   : > { %v1420_v44 = vadd.f32 %v1419_v10, %v1389_v16  ;;  %v1352_v17 = vadd.f32 %v1351_v60, %v1321_v46 }
 0x152   : > { %v1353_v57 = vrot.slane %v1352_v17, 4  ;;  %v1421_v20 = vadd.f32 %v1420_v44, %v1390_v47 }
 0x154   : > { %v1354_v21 = vadd.f32 %v1353_v57, %v1352_v17  ;;  %v1422_v24 = vrot.slane %v1421_v20, 4 }
 0x156   : > { %v1355_v50 = vrot.slane %v1354_v21, 2  ;;  %v1423_v13 = vadd.f32 %v1422_v24, %v1421_v20 }
 0x158   : > { %v1356_v25 = vadd.f32 %v1355_v50, %v1354_v21  ;;  %v1424_v12 = vrot.slane %v1423_v13, 2 }
 0x15a   : > { %v1357_v26 = vrot.slane %v1356_v25, 1  ;;  %v1425_v27 = vadd.f32 %v1424_v12, %v1423_v13 }
 0x15c   : > { %v1358_v19 = vadd.f32 %v1357_v26, %v1356_v25  ;;  %v1426_v28 = vrot.slane %v1425_v27, 1 }
 0x15e   : > { %v1427_v29 = vadd.f32 %v1426_v28, %v1425_v27  ;;  %1428 = vst [vmem:[%s442_s17] sm:$0xff] %v1358_v19 }
 0x160   : > { %1429 = vst [vmem:[%s449_s20] sm:$0xff] %v1427_v29 }
 0x161 PF: > { %s18_s26 = sadd.s32 1, %s2233_s26   ;;  %s2684_s24 = smov %s2229_s25 }
 0x162   : > { %p15_p6 = scmp.ge.s32.totalorder %s18_s26, 4   ;;  %s2685_s25 = smov %s2687_s27 }
 0x164   :  { %17 = sbr.rel (!%p15_p6) target bundleno = 2 (0x2), region = 114 }

// kernel: _lambda_.13
= control target key start
LH: loop header
LB: loop body
LE: loop exit
PB: predicated region body
PF: predicated region fallthrough
CT: control target
= control target key end

     0   :  { %s2534_s27 = smov 0   ;;  %s2536_s28 = smov 0   ;;  %s2986_s0 = inlined_call_operand.vmem [shape: bf16[512,256], index: 0, kind: input, shape index: {}]   ;;  %s2987_s1 = inlined_call_operand.vmem [shape: bf16[256,128], index: 1, kind: input, shape index: {}]   ;;  %s2988_s2 = inlined_call_operand.vmem [shape: bf16[1,256], index: 2, kind: input, shape index: {}]   ;;  %s2989_s3 = inlined_call_operand.vmem [shape: bf16[1,256], index: 3, kind: input, shape index: {}]   ;;  %s2990_s4 = inlined_call_operand.vmem [shape: f32[1,128], index: 4, kind: input, shape index: {}]   ;;  %s2991_s5 = inlined_call_operand.vmem [shape: bf16[512,128], index: 5, kind: input, shape index: {}]   ;;  %s2992_s6 = inlined_call_operand.vmem [shape: bf16[512,128], index: 6, kind: output, shape index: {0}]   ;;  %s2993_s7 = inlined_call_operand.vmem [shape: f32[16,128], index: 7, kind: output, shape index: {1}]   ;;  %s2994_s8 = inlined_call_operand.vmem [shape: f32[16,128], index: 8, kind: output, shape index: {2}]  }
   0x1   :  { %s2538_s29 = smov 0  }
   0x2 LB: > { %s38_s30 = sadd.s32 1, %s2481_s28  ;;  %p1989_p0 = scmp.ge.s32.totalorder %s2485_s29, 1  ;;  %s2485_s29 = sphi %s2538_s29, %s19_s29   ;;  %s2481_s28 = sphi %s2536_s28, %s2996_s28   ;;  %s2477_s27 = sphi %s2534_s27, %s2995_s27  }
   0x3   : > { %p40_p1 = scmp.ge.s32.totalorder %s38_s30, 2  ;;  %p361_p2 = scmp.lt.s32.totalorder %s2485_s29, 3 }
   0x5   : > { %s2998_s30 = smov (%p40_p1, %s38_s30), 0  ;;  %p362_p3 = pnand %p1989_p0, %p361_p2 }
   0x6   : > { %s1990_s25 = sshll.u32 (!%p362_p3), %s2477_s27, 5  ;;  %p496_p5 = scmp.lt.s32.totalorder (!%p362_p3), %s2477_s27, 1 }
   0x7   : > { %365 = sbr.rel (%p362_p3) target bundleno = 355 (0x163), region = 44  ;;  %p446_p4 = scmp.lt.s32.totalorder (!%p362_p3), %s1990_s25, 63 }
   0xc   : > { %v2447_v0 = vld [vmem:[%s2987_s1 + $0x78] sm:$0xff]   ;;  %v2449_v2 = vld [vmem:[%s2987_s1 + $0x70] sm:$0xff]   ;;  %v2451_v4 = vld [vmem:[%s2987_s1 + $0x68] sm:$0xff]   ;;  %v592_v9 = vlaneseq  ;;  %s3000_s25 = smov (!%p446_p4, %s1990_s25), 63  ;;  %v2487_v14 = vmov 1966171168  }
   0xd   : > { %v2448_v1 = vld [vmem:[%s2987_s1 + $0x38] sm:$0xff]   ;;  %2293 = vmatprep.subr.bf16.mxu0 %v2447_v0  ;;  %2405 = vmatprep.subr.bf16.mxu1 %v2447_v0  ;;  %v2450_v3 = vld [vmem:[%s2987_s1 + $0x30] sm:$0xff]   ;;  %v2452_v5 = vld [vmem:[%s2987_s1 + $0x28] sm:$0xff]   ;;  %v590_v15 = vunpack.c.l.s4 %v2487_v14  ;;  %s2086_s22 = sshll.u32 %s3000_s25, 3  ;;  %v2488_v57 = vmov 0   ;;  %s1994_s15 = sshll.u32 %s3000_s25, 2 }
   0xe   : > { %2294 = vmatpush3.bf16.msra.mxu0 %v2448_v1  ;;  %2413 = vmatpush3.bf16.msra.mxu1 %v2448_v1  ;;  %v2453_v6 = vld [vmem:[%s2987_s1 + $0x60] sm:$0xff]   ;;  %v2455_v8 = vld [vmem:[%s2987_s1 + $0x58] sm:$0xff]   ;;  %v2457_v11 = vld [vmem:[%s2987_s1 + $0x50] sm:$0xff]   ;;  %v593_v16 = vshrl.u32 %v592_v9, 7  ;;  %s2612_s12 = scalar_lea.vmem %s2986_s0, %s2086_s22  ;;  %s2753_s18 = scalar_lea.vmem %s2991_s5, %s1994_s15 }
   0xf   : > { %2295 = vmatprep.subr.bf16.mxu0 %v2449_v2  ;;  %2406 = vmatprep.subr.bf16.mxu1 %v2449_v2  ;;  %v2454_v7 = vld [vmem:[%s2987_s1 + $0x20] sm:$0xff]   ;;  %v2456_v10 = vld [vmem:[%s2987_s1 + $0x18] sm:$0xff]   ;;  %v2458_v17 = vld [vmem:[%s2987_s1 + $0x10] sm:$0xff]   ;;  %v591_v20 = vunpack.c.0.s8 %v590_v15  ;;  %s2772_s22 = scalar_lea.vmem %s2992_s6, %s1994_s15  ;;  %s3002_s27 = smov (!%p496_p5, %s2477_s27), 1 }
  0x10   : > { %v1999_v12 = vld.sshfl [vmem:[%s2988_s2] sm:$0x11 pattern:$0x75316420]  ;;  %v2459_v18 = vld [vmem:[%s2987_s1 + $0x48] sm:$0xff]   ;;  %v608_v24 = vsub.s32 0, %v593_v16 }
  0x11   : > { %v2001_v13 = vld.sshfl [vmem:[%s2989_s3] sm:$0x11 pattern:$0x75316420]  ;;  %v588_v19 = vcombine.high %v1999_v12, %v1999_v12  ;;  %v594_v22 = vsub.s32 %v591_v20, %v593_v16  ;;  %v2460_v23 = vld [vmem:[%s2987_s1 + $0x8] sm:$0xff]   ;;  %v549_v41 = vld [vmem:[%s2612_s12 + $0x10] sm:$0xff] }
  0x12   : > { %2296 = vmatpush3.bf16.msra.mxu0 %v2450_v3  ;;  %2414 = vmatpush3.bf16.msra.mxu1 %v2450_v3  ;;  %v664_v21 = vcombine.high %v2001_v13, %v2001_v13  ;;  %v2461_v25 = vld [vmem:[%s2987_s1 + $0x40] sm:$0xff]   ;;  %v548_v40 = vld [vmem:[%s2612_s12 + $0x8] sm:$0xff]  ;;  %v550_v42 = vld [vmem:[%s2612_s12 + $0x18] sm:$0xff]  ;;  %s1997_s23 = sshll.u32 %s3002_s27, 3 }
  0x13   : > { %2297 = vmatprep.subr.bf16.mxu0 %v2451_v4  ;;  %2407 = vmatprep.subr.bf16.mxu1 %v2451_v4  ;;  %v595_v26 = vrot.slane %v1999_v12, %v594_v22  ;;  %v602_v27 = vrot.slane %v588_v19, %v594_v22  ;;  %v671_v28 = vrot.slane %v2001_v13, %v594_v22  ;;  %v2462_v34 = vld [vmem:[%s2987_s1] sm:$0xff]   ;;  %v552_v46 = vld [vmem:[%s2612_s12 + $0x28] sm:$0xff]  ;;  %v553_v62 = vld [vmem:[%s2612_s12 + $0x30] sm:$0xff]  ;;  %s502_s9 = scalar_lea.vmem %s2993_s7, %s1997_s23 }
  0x14   : > { %v678_v29 = vrot.slane %v664_v21, %v594_v22  ;;  %v547_v35 = vld [vmem:[%s2612_s12] sm:$0xff]  ;;  %v554_v0 = vld [vmem:[%s2612_s12 + $0x38] sm:$0xff]  ;;  %v564_v2 = vld [vmem:[%s2612_s12 + $0x88] sm:$0xff] }
  0x15   : > { %v604_v30 = vpack.i.b16 %v595_v26, %v595_v26  ;;  %v611_v31 = vpack.i.b16 %v602_v27, %v602_v27  ;;  %v680_v32 = vpack.i.b16 %v671_v28, %v671_v28  ;;  %v551_v45 = vld [vmem:[%s2612_s12 + $0x20] sm:$0xff] }
  0x16   : > { %2298 = vmatpush3.bf16.msra.mxu0 %v2452_v5  ;;  %2415 = vmatpush3.bf16.msra.mxu1 %v2452_v5  ;;  %v687_v33 = vpack.i.b16 %v678_v29, %v678_v29  ;;  %v563_v1 = vld [vmem:[%s2612_s12 + $0x80] sm:$0xff]  ;;  %v568_v29 = vld [vmem:[%s2612_s12 + $0xa8] sm:$0xff] }
  0x17   : > { %2299 = vmatprep.subr.bf16.mxu0 %v2453_v6  ;;  %2408 = vmatprep.subr.bf16.mxu1 %v2453_v6  ;;  %v609_v36 = vrot.slane %v604_v30, %v608_v24  ;;  %v616_v37 = vrot.slane %v611_v31, %v608_v24  ;;  %v685_v38 = vrot.slane %v680_v32, %v608_v24  ;;  %v567_v28 = vld [vmem:[%s2612_s12 + $0xa0] sm:$0xff] }
  0x18   : > { %v692_v39 = vrot.slane %v687_v33, %v608_v24  ;;  %v555_v33 = vld [vmem:[%s2612_s12 + $0x40] sm:$0xff] }
  0x19   : > { %v2621_v43 = vcombine.low %v609_v36, %v616_v37  ;;  %v570_v37 = vld [vmem:[%s2612_s12 + $0xb8] sm:$0xff] }
  0x1a   : > { %2300 = vmatpush3.bf16.msra.mxu0 %v2454_v7  ;;  %2416 = vmatpush3.bf16.msra.mxu1 %v2454_v7  ;;  %v2623_v44 = vcombine.low %v685_v38, %v692_v39  ;;  %v565_v7 = vld [vmem:[%s2612_s12 + $0x90] sm:$0xff] }
  0x1b   : > { %2301 = vmatprep.subr.bf16.mxu0 %v2455_v8  ;;  %2409 = vmatprep.subr.bf16.mxu1 %v2455_v8  ;;  %v623_v47 = vmul.bf16 %v2621_v43, %v547_v35  ;;  %v624_v48 = vmul.bf16 %v2621_v43, %v548_v40  ;;  %v625_v49 = vmul.bf16 %v2621_v43, %v549_v41  ;;  %v566_v8 = vld [vmem:[%s2612_s12 + $0x98] sm:$0xff]  ;;  %v569_v35 = vld [vmem:[%s2612_s12 + $0xb0] sm:$0xff] }
  0x1c   : > { %v626_v50 = vmul.bf16 %v2621_v43, %v550_v42  ;;  %v627_v51 = vmul.bf16 %v2621_v43, %v551_v45  ;;  %v628_v52 = vmul.bf16 %v2621_v43, %v552_v46  ;;  %v629_v9 = vmul.bf16 %v2621_v43, %v553_v62 }
  0x1d   : > { %v699_v53 = vadd.bf16 %v2623_v44, %v623_v47  ;;  %v700_v54 = vadd.bf16 %v2623_v44, %v624_v48  ;;  %v701_v55 = vadd.bf16 %v2623_v44, %v625_v49  ;;  %v640_v12 = vmul.bf16 %v2621_v43, %v564_v2 }
  0x1e   : > { %2302 = vmatpush3.bf16.msra.mxu0 %v2456_v10  ;;  %2417 = vmatpush3.bf16.msra.mxu1 %v2456_v10  ;;  %v702_v56 = vadd.bf16 %v2623_v44, %v626_v50  ;;  %v703_v63 = vadd.bf16 %v2623_v44, %v627_v51  ;;  %v704_v6 = vadd.bf16 %v2623_v44, %v628_v52 }
  0x1f   : > { %2303 = vmatprep.subr.bf16.mxu0 %v2457_v11  ;;  %2410 = vmatprep.subr.bf16.mxu1 %v2457_v11  ;;  %v731_v58 = vmax.bf16 %v2488_v57, %v699_v53  ;;  %v732_v59 = vmax.bf16 %v2488_v57, %v700_v54  ;;  %v733_v60 = vmax.bf16 %v2488_v57, %v701_v55 }
  0x20   : > { %v734_v61 = vmax.bf16 %v2488_v57, %v702_v56  ;;  %v630_v10 = vmul.bf16 %v2621_v43, %v554_v0  ;;  %v639_v11 = vmul.bf16 %v2621_v43, %v563_v1  ;;  %v641_v13 = vmul.bf16 %v2621_v43, %v565_v7  ;;  %v557_v56 = vld [vmem:[%s2612_s12 + $0x50] sm:$0xff]  ;;  %v572_v0 = vld [vmem:[%s2612_s12 + $0xc8] sm:$0xff] }
  0x21   : > { %v2004_v3 = vcombine.high %v731_v58, %v732_v59  ;;  %v2003_v4 = vcombine.low %v731_v58, %v732_v59  ;;  %v642_v14 = vmul.bf16 %v2621_v43, %v566_v8  ;;  %v735_v15 = vmax.bf16 %v2488_v57, %v703_v63  ;;  %v558_v58 = vld [vmem:[%s2612_s12 + $0x58] sm:$0xff]  ;;  %v571_v63 = vld [vmem:[%s2612_s12 + $0xc0] sm:$0xff] }
  0x22   : > { %2304 = vmatpush3.bf16.msra.mxu0 %v2458_v17  ;;  %2418 = vmatpush3.bf16.msra.mxu1 %v2458_v17  ;;  %v2006_v5 = vcombine.high %v733_v60, %v734_v61  ;;  %v736_v16 = vmax.bf16 %v2488_v57, %v704_v6  ;;  %v715_v17 = vadd.bf16 %v2623_v44, %v639_v11 }
  0x23   : > { %2305 = vmatprep.subr.bf16.mxu0 %v2459_v18  ;;  %2411 = vmatprep.subr.bf16.mxu1 %v2459_v18  ;;  %v716_v18 = vadd.bf16 %v2623_v44, %v640_v12  ;;  %v717_v19 = vadd.bf16 %v2623_v44, %v641_v13  ;;  %v718_v20 = vadd.bf16 %v2623_v44, %v642_v14  ;;  %v559_v14 = vld [vmem:[%s2612_s12 + $0x60] sm:$0xff] }
  0x24   : > { %1115 = vmatprep.mubr.bf16.mxu0 %v2004_v3  ;;  %v705_v21 = vadd.bf16 %v2623_v44, %v629_v9  ;;  %v706_v22 = vadd.bf16 %v2623_v44, %v630_v10  ;;  %v2008_v30 = vcombine.high %v735_v15, %v736_v16  ;;  %v643_v40 = vmul.bf16 %v2621_v43, %v567_v28 }
  0x25   : > { %v748_v24 = vmax.bf16 %v2488_v57, %v716_v18  ;;  %v749_v26 = vmax.bf16 %v2488_v57, %v717_v19  ;;  %v750_v27 = vmax.bf16 %v2488_v57, %v718_v20  ;;  %v644_v41 = vmul.bf16 %v2621_v43, %v568_v29  ;;  %v573_v19 = vld [vmem:[%s2612_s12 + $0xd0] sm:$0xff]  ;;  %v574_v20 = vld [vmem:[%s2612_s12 + $0xd8] sm:$0xff] }
  0x26   : > { %2306 = vmatpush3.bf16.msra.mxu0 %v2460_v23  ;;  %2419 = vmatpush3.bf16.msra.mxu1 %v2460_v23  ;;  %v747_v23 = vmax.bf16 %v2488_v57, %v715_v17  ;;  %v737_v38 = vmax.bf16 %v2488_v57, %v705_v21  ;;  %v738_v39 = vmax.bf16 %v2488_v57, %v706_v22 }
  0x27   : > { %2307 = vmatprep.subr.bf16.mxu0 %v2461_v25  ;;  %2412 = vmatprep.subr.bf16.mxu1 %v2461_v25  ;;  %v2005_v25 = vcombine.low %v733_v60, %v734_v61  ;;  %v2022_v36 = vcombine.high %v749_v26, %v750_v27  ;;  %v631_v42 = vmul.bf16 %v2621_v43, %v555_v33  ;;  %v561_v33 = vld [vmem:[%s2612_s12 + $0x70] sm:$0xff] }
  0x28   : > { %v2020_v31 = vcombine.high %v747_v23, %v748_v24  ;;  %v2019_v32 = vcombine.low %v747_v23, %v748_v24  ;;  %v645_v46 = vmul.bf16 %v2621_v43, %v569_v35  ;;  %v719_v47 = vadd.bf16 %v2623_v44, %v643_v40  ;;  %v576_v40 = vld [vmem:[%s2612_s12 + $0xe8] sm:$0xff] }
  0x29   : > { %v720_v48 = vadd.bf16 %v2623_v44, %v644_v41  ;;  %v646_v49 = vmul.bf16 %v2621_v43, %v570_v37  ;;  %v2007_v50 = vcombine.low %v735_v15, %v736_v16  ;;  %v707_v53 = vadd.bf16 %v2623_v44, %v631_v42  ;;  %v560_v15 = vld [vmem:[%s2612_s12 + $0x68] sm:$0xff] }
  0x2a   : > { %2308 = vmatpush3.bf16.msra.mxu0 %v2462_v34  ;;  %2420 = vmatpush3.bf16.msra.mxu1 %v2462_v34  ;;  %v556_v34 = vld [vmem:[%s2612_s12 + $0x48] sm:$0xff]  ;;  %v751_v51 = vmax.bf16 %v2488_v57, %v719_v47  ;;  %v2021_v55 = vcombine.low %v749_v26, %v750_v27  ;;  %v721_v59 = vadd.bf16 %v2623_v44, %v645_v46 }
  0x2b   : > { %1179 = vmatprep.mubr.bf16.mxu1 %v2020_v31  ;;  %v632_v45 = vmul.bf16 %v2621_v43, %v556_v34  ;;  %v752_v52 = vmax.bf16 %v2488_v57, %v720_v48  ;;  %v2010_v60 = vcombine.high %v737_v38, %v738_v39  ;;  %v722_v62 = vadd.bf16 %v2623_v44, %v646_v49  ;;  %v562_v34 = vld [vmem:[%s2612_s12 + $0x78] sm:$0xff] }
  0x2c   : > { %v633_v1 = vmul.bf16 %v2621_v43, %v557_v56  ;;  %v634_v2 = vmul.bf16 %v2621_v43, %v558_v58  ;;  %v739_v3 = vmax.bf16 %v2488_v57, %v707_v53  ;;  %v647_v7 = vmul.bf16 %v2621_v43, %v571_v63 }
  0x2d   : > { %1116 = vmatmul.mubr.bf16.vlgmr.msra.gmra.mxu0 %v2003_v4  ;;  %1180 = vmatmul.mubr.bf16.vlgmr.msra.gmra.mxu1 %v2019_v32  ;;  %v708_v54 = vadd.bf16 %v2623_v44, %v632_v45  ;;  %v2024_v61 = vcombine.high %v751_v51, %v752_v52  ;;  %v754_v6 = vmax.bf16 %v2488_v57, %v722_v62 }
  0x2e   : > { %1123 = vmatprep.mubr.bf16.mxu0 %v2006_v5  ;;  %1187 = vmatprep.mubr.bf16.mxu1 %v2022_v36  ;;  %v753_v5 = vmax.bf16 %v2488_v57, %v721_v59  ;;  %v648_v8 = vmul.bf16 %v2621_v43, %v572_v0  ;;  %v709_v9 = vadd.bf16 %v2623_v44, %v633_v1 }
  0x2f   : > { %v740_v4 = vmax.bf16 %v2488_v57, %v708_v54  ;;  %v710_v10 = vadd.bf16 %v2623_v44, %v634_v2  ;;  %v2009_v11 = vcombine.low %v737_v38, %v738_v39  ;;  %v2023_v12 = vcombine.low %v751_v51, %v752_v52  ;;  %v575_v39 = vld [vmem:[%s2612_s12 + $0xe0] sm:$0xff] }
  0x30   : > { %v2026_v16 = vcombine.high %v753_v5, %v754_v6  ;;  %v723_v17 = vadd.bf16 %v2623_v44, %v647_v7  ;;  %v724_v18 = vadd.bf16 %v2623_v44, %v648_v8  ;;  %v741_v21 = vmax.bf16 %v2488_v57, %v709_v9 }
  0x31   : > { %v2012_v13 = vcombine.high %v739_v3, %v740_v4  ;;  %v742_v22 = vmax.bf16 %v2488_v57, %v710_v10  ;;  %v635_v23 = vmul.bf16 %v2621_v43, %v559_v14  ;;  %v636_v24 = vmul.bf16 %v2621_v43, %v560_v15 }
  0x32   : > { %v755_v26 = vmax.bf16 %v2488_v57, %v723_v17  ;;  %v756_v27 = vmax.bf16 %v2488_v57, %v724_v18  ;;  %v650_v28 = vmul.bf16 %v2621_v43, %v574_v20  ;;  %v2011_v29 = vcombine.low %v739_v3, %v740_v4  ;;  %v2120_v17 = vld [vmem:[%s2753_s18] sm:$0xff]  }
  0x33   : > { %v712_v31 = vadd.bf16 %v2623_v44, %v636_v24  ;;  %v2025_v32 = vcombine.low %v753_v5, %v754_v6  ;;  %v2014_v35 = vcombine.high %v741_v21, %v742_v22  ;;  %v637_v41 = vmul.bf16 %v2621_v43, %v561_v33 }
  0x34   : > { %v2028_v36 = vcombine.high %v755_v26, %v756_v27  ;;  %v726_v38 = vadd.bf16 %v2623_v44, %v650_v28  ;;  %v638_v42 = vmul.bf16 %v2621_v43, %v562_v34  ;;  %v651_v47 = vmul.bf16 %v2621_v43, %v575_v39  ;;  %v2270_v34 = vld [vmem:[%s2753_s18 + $0x40] sm:$0xff]  }
  0x35   : > { %1124 = vmatmul.mubr.bf16.gmra.mxu0 %v2005_v25  ;;  %1188 = vmatmul.mubr.bf16.gmra.mxu1 %v2021_v55  ;;  %v649_v25 = vmul.bf16 %v2621_v43, %v573_v19  ;;  %v744_v46 = vmax.bf16 %v2488_v57, %v712_v31  ;;  %v2013_v51 = vcombine.low %v741_v21, %v742_v22  ;;  %v2121_v21 = vunpack.c.l.bf16 %v2120_v17 }
  0x36   : > { %1131 = vmatprep.mubr.bf16.mxu0 %v2008_v30  ;;  %1195 = vmatprep.mubr.bf16.mxu1 %v2024_v61  ;;  %v711_v30 = vadd.bf16 %v2623_v44, %v635_v23  ;;  %v758_v49 = vmax.bf16 %v2488_v57, %v726_v38  ;;  %v713_v52 = vadd.bf16 %v2623_v44, %v637_v41  ;;  %v578_v61 = vld [vmem:[%s2612_s12 + $0xf8] sm:$0xff]  ;;  %v2122_v23 = vunpack.c.h.bf16 %v2120_v17 }
  0x37   : > { %v725_v37 = vadd.bf16 %v2623_v44, %v649_v25  ;;  %v714_v53 = vadd.bf16 %v2623_v44, %v638_v42  ;;  %v2027_v54 = vcombine.low %v755_v26, %v756_v27  ;;  %v727_v58 = vadd.bf16 %v2623_v44, %v651_v47 }
  0x38   : > { %v743_v45 = vmax.bf16 %v2488_v57, %v711_v30  ;;  %v745_v62 = vmax.bf16 %v2488_v57, %v713_v52  ;;  %v654_v3 = vmul.bf16 %v2621_v43, %v578_v61  ;;  %v2153_v42 = vunpack.c.l.bf16 %v2270_v34 }
  0x39   : > { %v757_v48 = vmax.bf16 %v2488_v57, %v725_v37  ;;  %v746_v63 = vmax.bf16 %v2488_v57, %v714_v53  ;;  %v759_v1 = vmax.bf16 %v2488_v57, %v727_v58 }
  0x3a   : > { %v2016_v55 = vcombine.high %v743_v45, %v744_v46  ;;  %v2015_v4 = vcombine.low %v743_v45, %v744_v46  ;;  %v730_v9 = vadd.bf16 %v2623_v44, %v654_v3 }
  0x3b   : > { %v2030_v56 = vcombine.high %v757_v48, %v758_v49  ;;  %v2029_v5 = vcombine.low %v757_v48, %v758_v49  ;;  %v2018_v6 = vcombine.high %v745_v62, %v746_v63  ;;  %v2154_v49 = vunpack.c.h.bf16 %v2270_v34 }
  0x3d   : > { %1132 = vmatmul.mubr.bf16.gmra.mxu0 %v2007_v50  ;;  %1196 = vmatmul.mubr.bf16.gmra.mxu1 %v2023_v12  ;;  %v652_v50 = vmul.bf16 %v2621_v43, %v576_v40  ;;  %v2017_v12 = vcombine.low %v745_v62, %v746_v63  ;;  %v2271_v63 = vld [vmem:[%s2753_s18 + $0x48] sm:$0xff]  }
  0x3e   : > { %1139 = vmatprep.mubr.bf16.mxu0 %v2010_v60  ;;  %1203 = vmatprep.mubr.bf16.mxu1 %v2026_v16  ;;  %v577_v60 = vld [vmem:[%s2612_s12 + $0xf0] sm:$0xff]  ;;  %s509_s12 = scalar_lea.vmem %s2994_s8, %s1997_s23 }
  0x3f   : > { %v728_v59 = vadd.bf16 %v2623_v44, %v652_v50  ;;  %v653_v0 = vmul.bf16 %v2621_v43, %v577_v60 }
  0x41   : > { %v760_v2 = vmax.bf16 %v2488_v57, %v728_v59  ;;  %v729_v8 = vadd.bf16 %v2623_v44, %v653_v0 }
  0x43   : > { %v2032_v7 = vcombine.high %v759_v1, %v760_v2  ;;  %v761_v10 = vmax.bf16 %v2488_v57, %v729_v8 }
  0x45   : > { %1140 = vmatmul.mubr.bf16.gmra.mxu0 %v2009_v11  ;;  %1204 = vmatmul.mubr.bf16.gmra.mxu1 %v2025_v32  ;;  %v762_v11 = vmax.bf16 %v2488_v57, %v730_v9  ;;  %v2758_v57 = vld [vmem:[%s2990_s4] ss:$0 sm:$0xff]  ;;  %v2263_v32 = vld [vmem:[%s2753_s18 + $0x8] sm:$0xff]   ;;  %v2157_v9 = vunpack.c.l.bf16 %v2271_v63 }
  0x46   : > { %1147 = vmatprep.mubr.bf16.mxu0 %v2012_v13  ;;  %1211 = vmatprep.mubr.bf16.mxu1 %v2028_v36  ;;  %v2031_v13 = vcombine.low %v759_v1, %v760_v2  ;;  %v2125_v38 = vunpack.c.l.bf16 %v2263_v32  ;;  %v2126_v40 = vunpack.c.h.bf16 %v2263_v32 }
  0x47   : > { %v2034_v43 = vcombine.high %v761_v10, %v762_v11  ;;  %v2033_v14 = vcombine.low %v761_v10, %v762_v11 }
  0x4d   : > { %1148 = vmatmul.mubr.bf16.gmra.mxu0 %v2011_v29  ;;  %1212 = vmatmul.mubr.bf16.gmra.mxu1 %v2027_v54 }
  0x4e   : > { %1155 = vmatprep.mubr.bf16.mxu0 %v2014_v35  ;;  %1219 = vmatprep.mubr.bf16.mxu1 %v2030_v56 }
  0x55   : > { %1156 = vmatmul.mubr.bf16.gmra.mxu0 %v2013_v51  ;;  %1220 = vmatmul.mubr.bf16.gmra.mxu1 %v2029_v5 }
  0x56   : > { %1163 = vmatprep.mubr.bf16.mxu0 %v2016_v55  ;;  %1227 = vmatprep.mubr.bf16.mxu1 %v2032_v7  ;;  %v2264_v55 = vld [vmem:[%s2753_s18 + $0x10] sm:$0xff]  }
  0x5d   : > { %1164 = vmatmul.mubr.bf16.gmra.mxu0 %v2015_v4  ;;  %1228 = vmatmul.mubr.bf16.gmra.mxu1 %v2031_v13  ;;  %v2129_v4 = vunpack.c.l.bf16 %v2264_v55 }
  0x5e   : > { %1171 = vmatprep.mubr.bf16.mxu0 %v2018_v6  ;;  %1235 = vmatprep.mubr.bf16.mxu1 %v2034_v43  ;;  %v2130_v6 = vunpack.c.h.bf16 %v2264_v55  ;;  %v2158_v43 = vunpack.c.h.bf16 %v2271_v63 }
  0x65   : > { %1172 = vmatmul.mubr.bf16.gmra.mxu0 %v2017_v12  ;;  %1236 = vmatmul.mubr.bf16.gmra.mxu1 %v2033_v14 }
  0xed   : > { %v2309_v15 = vpop.f32.mrf.mxu0  ;;  %v2357_v25 = vpop.f32.mrf.mxu1 }
  0xef   : > { %v2310_v44 = vpop.f32.mrf.mxu0  ;;  %v2358_v28 = vpop.f32.mrf.mxu1 }
  0xf0   : > { %v2311_v16 = vadd.f32 %v2310_v44, %v2309_v15  ;;  %v2359_v33 = vadd.f32 %v2358_v28, %v2357_v25  ;;  %v2272_v25 = vld [vmem:[%s2753_s18 + $0x50] sm:$0xff]  }
  0xf1   : > { %v2312_v18 = vpop.f32.mrf.mxu0  ;;  %v2360_v36 = vpop.f32.mrf.mxu1 }
  0xf2   : > { %v1350_v20 = vadd.f32 %v2311_v16, %v2758_v57  ;;  %v1366_v41 = vadd.f32 %v2359_v33, %v2758_v57 }
  0xf3   : > { %v2313_v19 = vpop.f32.mrf.mxu0  ;;  %v2361_v45 = vpop.f32.mrf.mxu1 }
  0xf4   : > { %v2314_v22 = vadd.f32 %v2313_v19, %v2312_v18  ;;  %v2763_v29 = vadd.f32 %v2121_v21, %v1350_v20  ;;  %v2362_v48 = vadd.f32 %v2361_v45, %v2360_v36  ;;  %v2782_v56 = vadd.f32 %v2153_v42, %v1366_v41  ;;  %v2265_v18 = vld [vmem:[%s2753_s18 + $0x18] sm:$0xff]  }
  0xf5   : > { %v2315_v24 = vpop.f32.mrf.mxu0  ;;  %v2363_v51 = vpop.f32.mrf.mxu1  ;;  %v2133_v32 = vunpack.c.l.bf16 %v2265_v18  ;;  %v2134_v34 = vunpack.c.h.bf16 %v2265_v18  ;;  %v2162_v42 = vunpack.c.h.bf16 %v2272_v25 }
  0xf6   : > { %v1351_v26 = vadd.f32 %v2314_v22, %v2758_v57  ;;  %v1367_v53 = vadd.f32 %v2362_v48, %v2758_v57 }
  0xf7   : > { %v2316_v27 = vpop.f32.mrf.mxu0  ;;  %v2364_v58 = vpop.f32.mrf.mxu1 }
  0xf8   : > { %v2765_v30 = vadd.f32 %v2122_v23, %v1351_v26  ;;  %v2317_v31 = vadd.f32 %v2316_v27, %v2315_v24  ;;  %v2788_v62 = vadd.f32 %v2154_v49, %v1367_v53  ;;  %v2365_v1 = vadd.f32 %v2364_v58, %v2363_v51  ;;  %v2273_v53 = vld [vmem:[%s2753_s18 + $0x58] sm:$0xff]  }
  0xf9   : > { %v2318_v35 = vpop.f32.mrf.mxu0  ;;  %v2366_v2 = vpop.f32.mrf.mxu1 }
  0xfa   : > { %v2186_v37 = vpack.c.bf16 %v2765_v30, %v2763_v29  ;;  %v1352_v46 = vadd.f32 %v2317_v31, %v2758_v57  ;;  %v2226_v7 = vpack.c.bf16 %v2788_v62, %v2782_v56  ;;  %v1368_v8 = vadd.f32 %v2365_v1, %v2758_v57 }
  0xfb   : > { %v2319_v39 = vpop.f32.mrf.mxu0  ;;  %v2367_v10 = vpop.f32.mrf.mxu1  ;;  %v1516_v63 = vmul.f32 %v2765_v30, %v2765_v30 }
  0xfc   : > { %2187 = vst [vmem:[%s2772_s22] sm:$0xff] %v2186_v37   ;;  %v2320_v47 = vadd.f32 %v2319_v39, %v2318_v35  ;;  %v2784_v59 = vadd.f32 %v2125_v38, %v1352_v46  ;;  %v2368_v13 = vadd.f32 %v2367_v10, %v2366_v2  ;;  %2285 = vst [vmem:[%s2772_s22 + $0x40] sm:$0xff] %v2226_v7   ;;  %v2161_v37 = vunpack.c.l.bf16 %v2272_v25  ;;  %v2267_v25 = vld [vmem:[%s2753_s18 + $0x28] sm:$0xff]  }
  0xfd   : > { %v2321_v50 = vpop.f32.mrf.mxu0  ;;  %v2369_v15 = vpop.f32.mrf.mxu1  ;;  %v2802_v19 = vadd.f32 %v2157_v9, %v1368_v8  ;;  %v1515_v7 = vmul.f32 %v2763_v29, %v2763_v29 }
  0xfe   : > { %v1353_v52 = vadd.f32 %v2320_v47, %v2758_v57  ;;  %v1369_v16 = vadd.f32 %v2368_v13, %v2758_v57  ;;  %v1517_v8 = vmul.f32 %v2784_v59, %v2784_v59 }
  0xff   : > { %v2322_v54 = vpop.f32.mrf.mxu0  ;;  %v2370_v20 = vpop.f32.mrf.mxu1 }
 0x100   : > { %v2786_v60 = vadd.f32 %v2126_v40, %v1353_v52  ;;  %v2323_v61 = vadd.f32 %v2322_v54, %v2321_v50  ;;  %v2808_v24 = vadd.f32 %v2158_v43, %v1369_v16  ;;  %v2371_v27 = vadd.f32 %v2370_v20, %v2369_v15  ;;  %v2266_v50 = vld [vmem:[%s2753_s18 + $0x20] sm:$0xff]  }
 0x101   : > { %v2324_v0 = vpop.f32.mrf.mxu0  ;;  %v2372_v28 = vpop.f32.mrf.mxu1  ;;  %v2166_v15 = vunpack.c.h.bf16 %v2273_v53  ;;  %v1547_v16 = vadd.f32 %v1516_v63, %v1515_v7 }
 0x102   : > { %v2191_v3 = vpack.c.bf16 %v2786_v60, %v2784_v59  ;;  %v1354_v11 = vadd.f32 %v2323_v61, %v2758_v57  ;;  %v2231_v35 = vpack.c.bf16 %v2808_v24, %v2802_v19  ;;  %v1370_v36 = vadd.f32 %v2371_v27, %v2758_v57 }
 0x103   : > { %v2325_v5 = vpop.f32.mrf.mxu0  ;;  %v2373_v38 = vpop.f32.mrf.mxu1  ;;  %v1518_v20 = vmul.f32 %v2786_v60, %v2786_v60 }
 0x104   : > { %2278 = vst [vmem:[%s2772_s22 + $0x8] sm:$0xff] %v2191_v3   ;;  %v2326_v12 = vadd.f32 %v2325_v5, %v2324_v0  ;;  %v2804_v21 = vadd.f32 %v2129_v4, %v1354_v11  ;;  %v2374_v41 = vadd.f32 %v2373_v38, %v2372_v28  ;;  %2286 = vst [vmem:[%s2772_s22 + $0x48] sm:$0xff] %v2231_v35   ;;  %v2137_v4 = vunpack.c.l.bf16 %v2266_v50 }
 0x105   : > { %v2327_v14 = vpop.f32.mrf.mxu0  ;;  %v2375_v46 = vpop.f32.mrf.mxu1  ;;  %v2822_v51 = vadd.f32 %v2161_v37, %v1370_v36  ;;  %v2138_v5 = vunpack.c.h.bf16 %v2266_v50  ;;  %v1548_v28 = vadd.f32 %v1547_v16, %v1517_v8  ;;  %v2871_v50 = vld [vmem:[%s2753_s18 + $0x30] sm:$0xff]  }
 0x106   : > { %v1355_v44 = vadd.f32 %v2326_v12, %v2758_v57  ;;  %v1371_v48 = vadd.f32 %v2374_v41, %v2758_v57  ;;  %v1519_v38 = vmul.f32 %v2804_v21, %v2804_v21  ;;  %v2145_v8 = vunpack.c.l.bf16 %v2871_v50 }
 0x107   : > { %v2328_v17 = vpop.f32.mrf.mxu0  ;;  %v2376_v52 = vpop.f32.mrf.mxu1 }
 0x108   : > { %v2806_v22 = vadd.f32 %v2130_v6, %v1355_v44  ;;  %v2329_v23 = vadd.f32 %v2328_v17, %v2327_v14  ;;  %v2829_v61 = vadd.f32 %v2162_v42, %v1371_v48  ;;  %v2377_v1 = vadd.f32 %v2376_v52, %v2375_v46 }
 0x109   : > { %v2330_v26 = vpop.f32.mrf.mxu0  ;;  %v2378_v2 = vpop.f32.mrf.mxu1  ;;  %v2165_v6 = vunpack.c.l.bf16 %v2273_v53  ;;  %v1478_v44 = vadd.f32 %v2765_v30, %v2763_v29  ;;  %v2274_v29 = vld [vmem:[%s2753_s18 + $0x60] sm:$0xff]   ;;  %v1549_v42 = vadd.f32 %v1548_v28, %v1518_v20  ;;  %v2142_v46 = vunpack.c.h.bf16 %v2267_v25 }
 0x10a   : > { %v2196_v31 = vpack.c.bf16 %v2806_v22, %v2804_v21  ;;  %v1356_v39 = vadd.f32 %v2329_v23, %v2758_v57  ;;  %v2236_v10 = vpack.c.bf16 %v2829_v61, %v2822_v51  ;;  %v1372_v11 = vadd.f32 %v2377_v1, %v2758_v57 }
 0x10b   : > { %v2331_v33 = vpop.f32.mrf.mxu0  ;;  %v2379_v12 = vpop.f32.mrf.mxu1  ;;  %v1479_v27 = vadd.f32 %v1478_v44, %v2784_v59  ;;  %v2141_v59 = vunpack.c.l.bf16 %v2267_v25 }
 0x10c   : > { %2279 = vst [vmem:[%s2772_s22 + $0x10] sm:$0xff] %v2196_v31   ;;  %v2332_v40 = vadd.f32 %v2331_v33, %v2330_v26  ;;  %v2825_v54 = vadd.f32 %v2133_v32, %v1356_v39  ;;  %v2380_v14 = vadd.f32 %v2379_v12, %v2378_v2  ;;  %2287 = vst [vmem:[%s2772_s22 + $0x50] sm:$0xff] %v2236_v10   ;;  %v2170_v2 = vunpack.c.h.bf16 %v2274_v29 }
 0x10d   : > { %v2333_v45 = vpop.f32.mrf.mxu0  ;;  %v2381_v18 = vpop.f32.mrf.mxu1  ;;  %v2853_v32 = vadd.f32 %v2165_v6, %v1372_v11  ;;  %v1480_v37 = vadd.f32 %v1479_v27, %v2786_v60  ;;  %v1520_v60 = vmul.f32 %v2806_v22, %v2806_v22 }
 0x10e   : > { %v1357_v47 = vadd.f32 %v2332_v40, %v2758_v57  ;;  %v1373_v26 = vadd.f32 %v2380_v14, %v2758_v57  ;;  %v2275_v14 = vld [vmem:[%s2753_s18 + $0x68] sm:$0xff]  }
 0x10f   : > { %v2334_v49 = vpop.f32.mrf.mxu0  ;;  %v2382_v33 = vpop.f32.mrf.mxu1  ;;  %v1481_v48 = vadd.f32 %v1480_v37, %v2804_v21  ;;  %v1550_v21 = vadd.f32 %v1549_v42, %v1519_v38  ;;  %v2901_v38 = vld [vmem:[%s2753_s18 + $0x38] sm:$0xff]  }
 0x110   : > { %v2827_v55 = vadd.f32 %v2134_v34, %v1357_v47  ;;  %v2335_v58 = vadd.f32 %v2334_v49, %v2333_v45  ;;  %v2860_v36 = vadd.f32 %v2166_v15, %v1373_v26  ;;  %v2383_v40 = vadd.f32 %v2382_v33, %v2381_v18 }
 0x111   : > { %v2336_v0 = vpop.f32.mrf.mxu0  ;;  %v2384_v41 = vpop.f32.mrf.mxu1  ;;  %v2169_v47 = vunpack.c.l.bf16 %v2274_v29  ;;  %v1551_v10 = vadd.f32 %v1550_v21, %v1520_v60  ;;  %v2173_v33 = vunpack.c.l.bf16 %v2275_v14 }
 0x112   : > { %v2201_v3 = vpack.c.bf16 %v2827_v55, %v2825_v54  ;;  %v1358_v13 = vadd.f32 %v2335_v58, %v2758_v57  ;;  %v2241_v52 = vpack.c.bf16 %v2860_v36, %v2853_v32  ;;  %v1374_v53 = vadd.f32 %v2383_v40, %v2758_v57 }
 0x113   : > { %v2337_v9 = vpop.f32.mrf.mxu0  ;;  %v2385_v58 = vpop.f32.mrf.mxu1  ;;  %v1522_v12 = vmul.f32 %v2827_v55, %v2827_v55 }
 0x114   : > { %2280 = vst [vmem:[%s2772_s22 + $0x18] sm:$0xff] %v2201_v3   ;;  %v2338_v43 = vadd.f32 %v2337_v9, %v2336_v0  ;;  %v2856_v30 = vadd.f32 %v2137_v4, %v1358_v13  ;;  %v2386_v1 = vadd.f32 %v2385_v58, %v2384_v41  ;;  %v1482_v3 = vadd.f32 %v1481_v48, %v2806_v22 }
 0x115   : > { %v2339_v17 = vpop.f32.mrf.mxu0  ;;  %v1521_v4 = vmul.f32 %v2825_v54, %v2825_v54  ;;  %2288 = vst [vmem:[%s2772_s22 + $0x58] sm:$0xff] %v2241_v52   ;;  %v2387_v6 = vpop.f32.mrf.mxu1  ;;  %v2888_v22 = vadd.f32 %v2169_v47, %v1374_v53  ;;  %v2149_v53 = vunpack.c.l.bf16 %v2901_v38 }
 0x116   : > { %v1359_v23 = vadd.f32 %v2338_v43, %v2758_v57  ;;  %v1375_v9 = vadd.f32 %v2386_v1, %v2758_v57  ;;  %v1483_v11 = vadd.f32 %v1482_v3, %v2825_v54  ;;  %v1523_v20 = vmul.f32 %v2856_v30, %v2856_v30 }
 0x117   : > { %v2340_v31 = vpop.f32.mrf.mxu0  ;;  %v2388_v43 = vpop.f32.mrf.mxu1  ;;  %v1552_v18 = vadd.f32 %v1551_v10, %v1521_v4  ;;  %v2146_v54 = vunpack.c.h.bf16 %v2871_v50 }
 0x118   : > { %v2858_v34 = vadd.f32 %v2138_v5, %v1359_v23  ;;  %v2341_v35 = vadd.f32 %v2340_v31, %v2339_v17  ;;  %v2891_v17 = vadd.f32 %v2170_v2, %v1375_v9  ;;  %v2389_v25 = vadd.f32 %v2388_v43, %v2387_v6 }
 0x119   : > { %v2342_v39 = vpop.f32.mrf.mxu0  ;;  %v2390_v26 = vpop.f32.mrf.mxu1  ;;  %v1484_v27 = vadd.f32 %v1483_v11, %v2827_v55  ;;  %v1553_v29 = vadd.f32 %v1552_v18, %v1522_v12  ;;  %v2150_v2 = vunpack.c.h.bf16 %v2901_v38 }
 0x11a   : > { %v2206_v45 = vpack.c.bf16 %v2858_v34, %v2856_v30  ;;  %v1360_v63 = vadd.f32 %v2341_v35, %v2758_v57  ;;  %v1524_v35 = vmul.f32 %v2858_v34, %v2858_v34 }
 0x11b   : > { %v2343_v49 = vpop.f32.mrf.mxu0  ;;  %v2391_v40 = vpop.f32.mrf.mxu1  ;;  %v1485_v55 = vadd.f32 %v1484_v27, %v2856_v30 }
 0x11c   : > { %2281 = vst [vmem:[%s2772_s22 + $0x20] sm:$0xff] %v2206_v45   ;;  %v2344_v0 = vadd.f32 %v2343_v49, %v2342_v39  ;;  %v1456_v15 = vadd.f32 %v2141_v59, %v1360_v63  ;;  %v2246_v59 = vpack.c.bf16 %v2891_v17, %v2888_v22  ;;  %v1376_v39 = vadd.f32 %v2389_v25, %v2758_v57  ;;  %v2276_v63 = vld [vmem:[%s2753_s18 + $0x70] sm:$0xff]  }
 0x11d   : > { %v2345_v5 = vpop.f32.mrf.mxu0  ;;  %v2392_v42 = vadd.f32 %v2391_v40, %v2390_v26  ;;  %v2174_v45 = vunpack.c.h.bf16 %v2275_v14  ;;  %v2393_v49 = vpop.f32.mrf.mxu1  ;;  %v1486_v50 = vadd.f32 %v1485_v55, %v2858_v34  ;;  %v2177_v11 = vunpack.c.l.bf16 %v2276_v63 }
 0x11e   : > { %v1361_v7 = vadd.f32 %v2344_v0, %v2758_v57  ;;  %v1525_v47 = vmul.f32 %v1456_v15, %v1456_v15  ;;  %2289 = vst [vmem:[%s2772_s22 + $0x60] sm:$0xff] %v2246_v59   ;;  %v2915_v21 = vadd.f32 %v2173_v33, %v1376_v39  ;;  %v2277_v59 = vld [vmem:[%s2753_s18 + $0x78] sm:$0xff]  }
 0x11f   : > { %v2346_v13 = vpop.f32.mrf.mxu0  ;;  %v1377_v58 = vadd.f32 %v2392_v42, %v2758_v57  ;;  %v2394_v3 = vpop.f32.mrf.mxu1  ;;  %v1487_v4 = vadd.f32 %v1486_v50, %v1456_v15 }
 0x120   : > { %v1457_v44 = vadd.f32 %v2142_v46, %v1361_v7  ;;  %v2347_v16 = vadd.f32 %v2346_v13, %v2345_v5  ;;  %v1554_v46 = vadd.f32 %v1553_v29, %v1523_v20  ;;  %v2395_v10 = vadd.f32 %v2394_v3, %v2393_v49 }
 0x121   : > { %v2348_v23 = vpop.f32.mrf.mxu0  ;;  %v2917_v7 = vadd.f32 %v2174_v45, %v1377_v58  ;;  %v2396_v12 = vpop.f32.mrf.mxu1 }
 0x122   : > { %v2211_v28 = vpack.c.bf16 %v1457_v44, %v1456_v15  ;;  %v1362_v31 = vadd.f32 %v2347_v16, %v2758_v57  ;;  %v1555_v30 = vadd.f32 %v1554_v46, %v1524_v35  ;;  %v1526_v0 = vmul.f32 %v1457_v44, %v1457_v44 }
 0x123   : > { %v2349_v37 = vpop.f32.mrf.mxu0  ;;  %v1488_v13 = vadd.f32 %v1487_v4, %v1457_v44  ;;  %v2178_v16 = vunpack.c.h.bf16 %v2276_v63  ;;  %v2397_v25 = vpop.f32.mrf.mxu1 }
 0x124   : > { %2282 = vst [vmem:[%s2772_s22 + $0x28] sm:$0xff] %v2211_v28   ;;  %v2350_v41 = vadd.f32 %v2349_v37, %v2348_v23  ;;  %v1458_v48 = vadd.f32 %v2145_v8, %v1362_v31  ;;  %v1556_v34 = vadd.f32 %v1555_v30, %v1525_v47  ;;  %v2251_v23 = vpack.c.bf16 %v2917_v7, %v2915_v21 }
 0x125   : > { %v2351_v60 = vpop.f32.mrf.mxu0  ;;  %v2398_v44 = vadd.f32 %v2397_v25, %v2396_v12  ;;  %v2399_v33 = vpop.f32.mrf.mxu1  ;;  %v2181_v47 = vunpack.c.l.bf16 %v2277_v59  ;;  %v2182_v30 = vunpack.c.h.bf16 %v2277_v59  ;;  %v1534_v12 = vmul.f32 %v2808_v24, %v2808_v24 }
 0x126   : > { %v1363_v52 = vadd.f32 %v2350_v41, %v2758_v57  ;;  %v1527_v8 = vmul.f32 %v1458_v48, %v1458_v48  ;;  %v1557_v18 = vadd.f32 %v1556_v34, %v1526_v0  ;;  %v1489_v26 = vadd.f32 %v1488_v13, %v1458_v48  ;;  %2290 = vst [vmem:[%s2772_s22 + $0x68] sm:$0xff] %v2251_v23  }
 0x127   : > { %v2352_v1 = vpop.f32.mrf.mxu0  ;;  %v1379_v38 = vadd.f32 %v2398_v44, %v2758_v57  ;;  %v2400_v55 = vpop.f32.mrf.mxu1  ;;  %v1531_v0 = vmul.f32 %v2782_v56, %v2782_v56  ;;  %v1540_v44 = vmul.f32 %v2891_v17, %v2891_v17 }
 0x128   : > { %v1459_v5 = vadd.f32 %v2146_v54, %v1363_v52  ;;  %v2353_v6 = vadd.f32 %v2352_v1, %v2351_v60  ;;  %v1378_v54 = vadd.f32 %v2395_v10, %v2758_v57  ;;  %v1558_v31 = vadd.f32 %v1557_v18, %v1527_v8 }
 0x129   : > { %v2354_v9 = vpop.f32.mrf.mxu0  ;;  %v1475_v45 = vadd.f32 %v2178_v16, %v1379_v38  ;;  %v2401_v46 = vadd.f32 %v2400_v55, %v2399_v33  ;;  %v1536_v18 = vmul.f32 %v2829_v61, %v2829_v61 }
 0x12a   : > { %v2216_v43 = vpack.c.bf16 %v1459_v5, %v1458_v48  ;;  %v1364_v14 = vadd.f32 %v2353_v6, %v2758_v57  ;;  %v1528_v20 = vmul.f32 %v1459_v5, %v1459_v5  ;;  %v1490_v29 = vadd.f32 %v1489_v26, %v1459_v5  ;;  %v2402_v48 = vpop.f32.mrf.mxu1 }
 0x12b   : > { %v2355_v15 = vpop.f32.mrf.mxu0  ;;  %v1474_v40 = vadd.f32 %v2177_v11, %v1378_v54  ;;  %v1380_v58 = vadd.f32 %v2401_v46, %v2758_v57  ;;  %v1532_v5 = vmul.f32 %v2788_v62, %v2788_v62  ;;  %v1538_v54 = vmul.f32 %v2860_v36, %v2860_v36 }
 0x12c   : > { %2283 = vst [vmem:[%s2772_s22 + $0x30] sm:$0xff] %v2216_v43   ;;  %v1460_v27 = vadd.f32 %v2149_v53, %v1364_v14  ;;  %v2356_v28 = vadd.f32 %v2355_v15, %v2354_v9  ;;  %v1559_v39 = vadd.f32 %v1558_v31, %v1528_v20  ;;  %v2403_v63 = vpop.f32.mrf.mxu1  ;;  %v1533_v9 = vmul.f32 %v2802_v19, %v2802_v19 }
 0x12d   : > { %v2256_v53 = vpack.c.bf16 %v1475_v45, %v1474_v40  ;;  %v2404_v3 = vadd.f32 %v2403_v63, %v2402_v48  ;;  %v1476_v4 = vadd.f32 %v2181_v47, %v1380_v58  ;;  %v1537_v15 = vmul.f32 %v2853_v32, %v2853_v32 }
 0x12e   : > { %v1529_v35 = vmul.f32 %v1460_v27, %v1460_v27  ;;  %v1365_v37 = vadd.f32 %v2356_v28, %v2758_v57  ;;  %v1491_v41 = vadd.f32 %v1490_v29, %v1460_v27  ;;  %v1543_v59 = vmul.f32 %v1474_v40, %v1474_v40 }
 0x12f   : > { %2291 = vst [vmem:[%s2772_s22 + $0x70] sm:$0xff] %v2256_v53   ;;  %v1381_v8 = vadd.f32 %v2404_v3, %v2758_v57  ;;  %v1544_v55 = vmul.f32 %v1475_v45, %v1475_v45  ;;  %v1545_v46 = vmul.f32 %v1476_v4, %v1476_v4 }
 0x130   : > { %v1461_v42 = vadd.f32 %v2150_v2, %v1365_v37  ;;  %v1560_v60 = vadd.f32 %v1559_v39, %v1529_v35 }
 0x131   : > { %v1477_v11 = vadd.f32 %v2182_v30, %v1381_v8 }
 0x132   : > { %v1492_v49 = vadd.f32 %v1491_v41, %v1461_v42  ;;  %v1530_v50 = vmul.f32 %v1461_v42, %v1461_v42  ;;  %v2221_v52 = vpack.c.bf16 %v1461_v42, %v1460_v27 }
 0x133   : > { %v2261_v14 = vpack.c.bf16 %v1477_v11, %v1476_v4 }
 0x134   : > { %v1493_v1 = vadd.f32 %v1492_v49, %v2782_v56  ;;  %v1561_v2 = vadd.f32 %v1560_v60, %v1530_v50  ;;  %2284 = vst [vmem:[%s2772_s22 + $0x38] sm:$0xff] %v2221_v52  }
 0x135   : > { %2292 = vst [vmem:[%s2772_s22 + $0x78] sm:$0xff] %v2261_v14  }
 0x136   : > { %v1494_v6 = vadd.f32 %v1493_v1, %v2788_v62  ;;  %v1562_v34 = vadd.f32 %v1561_v2, %v1531_v0  ;;  %v1535_v62 = vmul.f32 %v2822_v51, %v2822_v51 }
 0x138   : > { %v1495_v10 = vadd.f32 %v1494_v6, %v2802_v19  ;;  %v1563_v56 = vadd.f32 %v1562_v34, %v1532_v5 }
 0x13a   : > { %v1496_v13 = vadd.f32 %v1495_v10, %v2808_v24  ;;  %v1564_v43 = vadd.f32 %v1563_v56, %v1533_v9 }
 0x13c   : > { %v1565_v16 = vadd.f32 %v1564_v43, %v1534_v12  ;;  %v1497_v57 = vadd.f32 %v1496_v13, %v2822_v51  ;;  %v1539_v51 = vmul.f32 %v2888_v22, %v2888_v22 }
 0x13e   : > { %v1498_v19 = vadd.f32 %v1497_v57, %v2829_v61  ;;  %v1566_v20 = vadd.f32 %v1565_v16, %v1535_v62 }
 0x140   : > { %v1499_v24 = vadd.f32 %v1498_v19, %v2853_v32  ;;  %v1567_v23 = vadd.f32 %v1566_v20, %v1536_v18 }
 0x142   : > { %v1500_v25 = vadd.f32 %v1499_v24, %v2860_v36  ;;  %v1568_v26 = vadd.f32 %v1567_v23, %v1537_v15  ;;  %v1541_v36 = vmul.f32 %v2915_v21, %v2915_v21 }
 0x144   : > { %v1501_v27 = vadd.f32 %v1500_v25, %v2888_v22  ;;  %v1569_v28 = vadd.f32 %v1568_v26, %v1538_v54  ;;  %v1542_v22 = vmul.f32 %v2917_v7, %v2917_v7 }
 0x146   : > { %v1502_v61 = vadd.f32 %v1501_v27, %v2891_v17  ;;  %v1570_v31 = vadd.f32 %v1569_v28, %v1539_v51 }
 0x148   : > { %v1571_v32 = vadd.f32 %v1570_v31, %v1540_v44  ;;  %v1503_v33 = vadd.f32 %v1502_v61, %v2915_v21  ;;  %v1546_v21 = vmul.f32 %v1477_v11, %v1477_v11 }
 0x14a   : > { %v1572_v29 = vadd.f32 %v1571_v32, %v1541_v36  ;;  %v1504_v35 = vadd.f32 %v1503_v33, %v2917_v7 }
 0x14c   : > { %v1573_v37 = vadd.f32 %v1572_v29, %v1542_v22  ;;  %v1505_v38 = vadd.f32 %v1504_v35, %v1474_v40 }
 0x14e   : > { %v1574_v39 = vadd.f32 %v1573_v37, %v1543_v59  ;;  %v1506_v17 = vadd.f32 %v1505_v38, %v1475_v45 }
 0x150   : > { %v1575_v41 = vadd.f32 %v1574_v39, %v1544_v55  ;;  %v1507_v42 = vadd.f32 %v1506_v17, %v1476_v4 }
 0x152   : > { %v1576_v47 = vadd.f32 %v1575_v41, %v1545_v46  ;;  %v1508_v48 = vadd.f32 %v1507_v42, %v1477_v11 }
 0x154   : > { %v1509_v60 = vrot.slane %v1508_v48, 4  ;;  %v1577_v49 = vadd.f32 %v1576_v47, %v1546_v21 }
 0x156   : > { %v1510_v50 = vadd.f32 %v1509_v60, %v1508_v48  ;;  %v1578_v52 = vrot.slane %v1577_v49, 4 }
 0x158   : > { %v1511_v7 = vrot.slane %v1510_v50, 2  ;;  %v1579_v53 = vadd.f32 %v1578_v52, %v1577_v49 }
 0x15a   : > { %v1512_v58 = vadd.f32 %v1511_v7, %v1510_v50  ;;  %v1580_v40 = vrot.slane %v1579_v53, 2 }
 0x15c   : > { %v1513_v63 = vrot.slane %v1512_v58, 1  ;;  %v1581_v30 = vadd.f32 %v1580_v40, %v1579_v53 }
 0x15e   : > { %v1514_v45 = vadd.f32 %v1513_v63, %v1512_v58  ;;  %v1582_v0 = vrot.slane %v1581_v30, 1 }
 0x160   : > { %v1583_v1 = vadd.f32 %v1582_v0, %v1581_v30  ;;  %1584 = vst [vmem:[%s502_s9] sm:$0xff] %v1514_v45 }
 0x162   : > { %1585 = vst [vmem:[%s509_s12] sm:$0xff] %v1583_v1 }
 0x163 PF: > { %s19_s29 = sadd.s32 1, %s2485_s29   ;;  %s2995_s27 = smov %s2481_s28 }
 0x164   : > { %p16_p6 = scmp.ge.s32.totalorder %s19_s29, 4   ;;  %s2996_s28 = smov %s2998_s30 }
 0x166   :  { %18 = sbr.rel (!%p16_p6) target bundleno = 2 (0x2), region = 121 }

// kernel: tile.93
= control target key start
LH: loop header
LB: loop body
LE: loop exit
PB: predicated region body
PF: predicated region fallthrough
CT: control target
= control target key end

     0   :  { %s36_s0 = inlined_call_operand.vmem [shape: bf16[32], index: 0, kind: input, shape index: {}]   ;;  %s37_s1 = inlined_call_operand.vmem [shape: bf16[9,32], index: 1, kind: output, shape index: {}]  }
   0x1   :  { %v4_v0 = vld [vmem:[%s36_s0] ss:$0 sm:$0xff] }
   0x2   :  { %v5_v1 = vunpack.i.l.bf16 %v4_v0 }
   0x4   :  { %v18_v2 = vpack.c.bf16 %v5_v1, %v5_v1 }
   0x6   :  { %19 = vst [vmem:[%s37_s1] sm:$0xff] %v18_v2  }

// kernel: tile.94
= control target key start
LH: loop header
LB: loop body
LE: loop exit
PB: predicated region body
PF: predicated region fallthrough
CT: control target
= control target key end

     0   :  { %s52_s8 = smov 3  ;;  %s45_s9 = smov 3  ;;  %vm35_vm0 = vcmask 261120   ;;  %vm42_vm1 = vcmask 1048320   ;;  %vm49_vm2 = vcmask 785920   ;;  %vm56_vm3 = vcmask 523520   ;;  %s97_s0 = inlined_call_operand.vmem [shape: bf16[9,32], index: 0, kind: input, shape index: {}]   ;;  %s98_s1 = inlined_call_operand.vmem [shape: bf16[288], index: 1, kind: output, shape index: {}]  }
   0x1   :  { %v70_v0 = vld [vmem:[%s97_s0] sm:$0xff]   ;;  %s38_s0 = smov 3  ;;  %s77_s10 = smov 96   ;;  %v80_v11 = vmov 0.0  }
   0x2   :  { %v71_v1 = vunpack.c.l.bf16 %v70_v0  ;;  %v72_v2 = vunpack.c.h.bf16 %v70_v0  ;;  %s78_s11 = smov 32   ;;  %s79_s12 = smov 64  }
   0x4   :  { %20 = vst [vmem:[#allocation1 + $0x8] sm:$0xff] %v72_v2  ;;  %33 = vst [vmem:[#allocation1] sm:$0xff] %v71_v1 }
   0xb   :  { %v39_v3 = vld [vmem:[#allocation1 + $0x3] ss:$4 sm:%s38_s0]   ;;  %v53_v4 = vld [vmem:[#allocation1 + $0x1] ss:$4 sm:%s52_s8]   ;;  %v46_v6 = vld [vmem:[#allocation1 + $0x2] ss:$4 sm:%s45_s9]  }
   0xc   :  { %40 = vrot.lane.b32.xlu0 %v39_v3, %s77_s10  ;;  %54 = vrot.lane.b32.xlu1 %v53_v4, %s78_s11  ;;  %v34_v5 = vld [vmem:[#allocation1] ss:$4 sm:$0x7]  }
   0xd   :  { %36 = vst.msk [vmem:[#allocation0] sm:$0x7] %vm35_vm0, %v34_v5  }
  0x10   :  { %47 = vrot.lane.b32.xlu0 %v46_v6, %s79_s12 }
  0x7e   :  { %v41_v7 = vpop.permute.xlu0 %40   ;;  %v55_v8 = vpop.permute.xlu1 %54  }
  0x7f   :  { %43 = vst.msk [vmem:[#allocation0] sm:$0x3] %vm42_vm1, %v41_v7  }
  0x82   :  { %v48_v9 = vpop.permute.xlu0 %47  }
  0x83   :  { %50 = vst.msk [vmem:[#allocation0] sm:$0x3] %vm49_vm2, %v48_v9  }
  0x84   :  { %57 = vst.msk [vmem:[#allocation0] sm:$0x3] %vm56_vm3, %v55_v8  }
  0x8b   :  { %v63_v10 = vld [vmem:[#allocation0] sm:$0xf] }
  0x8c   :  { %v64_v12 = vpack.c.bf16 %v80_v11, %v63_v10 }
  0x8e   :  { %67 = vst [vmem:[%s98_s1] sm:$0x3] %v64_v12 }

// kernel: _lambda_.14
= control target key start
LH: loop header
LB: loop body
LE: loop exit
PB: predicated region body
PF: predicated region fallthrough
CT: control target
= control target key end

     0   :  { %s1413_s24 = smov 0   ;;  %s1415_s25 = smov 0   ;;  %s1524_s0 = inlined_call_operand.vmem [shape: bf16[128,256], index: 0, kind: input, shape index: {}]   ;;  %s1525_s1 = inlined_call_operand.vmem [shape: bf16[256,128], index: 1, kind: input, shape index: {}]   ;;  %s1526_s2 = inlined_call_operand.vmem [shape: bf16[1,256], index: 2, kind: input, shape index: {}]   ;;  %s1527_s3 = inlined_call_operand.vmem [shape: bf16[1,256], index: 3, kind: input, shape index: {}]   ;;  %s1528_s4 = inlined_call_operand.vmem [shape: f32[1,128], index: 4, kind: input, shape index: {}]   ;;  %s1529_s5 = inlined_call_operand.vmem [shape: bf16[128,128], index: 5, kind: output, shape index: {0}]   ;;  %s1530_s6 = inlined_call_operand.vmem [shape: f32[16,128], index: 6, kind: output, shape index: {1}]   ;;  %s1531_s7 = inlined_call_operand.vmem [shape: f32[16,128], index: 7, kind: output, shape index: {2}]  }
   0x1   :  { %s1417_s26 = smov 0  }
   0x2 LB: > { %s37_s27 = sadd.s32 1, %s1365_s25  ;;  %p1170_p0 = scmp.ge.s32.totalorder %s1369_s26, 1  ;;  %s1369_s26 = sphi %s1417_s26, %s18_s26   ;;  %s1365_s25 = sphi %s1415_s25, %s1533_s25   ;;  %s1361_s24 = sphi %s1413_s24, %s1532_s24  }
   0x3   : > { %p39_p1 = scmp.ge.s32.totalorder %s37_s27, 2  ;;  %p320_p2 = scmp.lt.s32.totalorder %s1369_s26, 3 }
   0x5   : > { %s1535_s27 = smov (%p39_p1, %s37_s27), 0  ;;  %p321_p3 = pnand %p1170_p0, %p320_p2 }
   0x6   : > { %s1171_s21 = sshll.u32 (!%p321_p3), %s1361_s24, 3  ;;  %p436_p5 = scmp.lt.s32.totalorder (!%p321_p3), %s1361_s24, 1 }
   0x7   : > { %324 = sbr.rel (%p321_p3) target bundleno = 281 (0x119), region = 40  ;;  %p395_p4 = scmp.lt.s32.totalorder (!%p321_p3), %s1171_s21, 15 }
   0xc   : > { %v1331_v0 = vld [vmem:[%s1525_s1 + $0x78] sm:$0xff]   ;;  %v1333_v2 = vld [vmem:[%s1525_s1 + $0x70] sm:$0xff]   ;;  %v1335_v4 = vld [vmem:[%s1525_s1 + $0x68] sm:$0xff]   ;;  %v484_v9 = vlaneseq  ;;  %s1537_s21 = smov (!%p395_p4, %s1171_s21), 15  ;;  %v1371_v13 = vmov 1966171168  }
   0xd   : > { %v1332_v1 = vld [vmem:[%s1525_s1 + $0x38] sm:$0xff]   ;;  %1249 = vmatprep.subr.bf16.mxu0 %v1331_v0  ;;  %1289 = vmatprep.subr.bf16.mxu1 %v1331_v0  ;;  %v1334_v3 = vld [vmem:[%s1525_s1 + $0x30] sm:$0xff]   ;;  %v1336_v5 = vld [vmem:[%s1525_s1 + $0x28] sm:$0xff]   ;;  %v482_v14 = vunpack.c.l.s4 %v1371_v13  ;;  %s1217_s17 = sshll.u32 %s1537_s21, 3  ;;  %s1175_s11 = sshll.u32 %s1537_s21, 2 }
   0xe   : > { %1250 = vmatpush3.bf16.msra.mxu0 %v1332_v1  ;;  %1297 = vmatpush3.bf16.msra.mxu1 %v1332_v1  ;;  %v1337_v6 = vld [vmem:[%s1525_s1 + $0x60] sm:$0xff]   ;;  %v1339_v8 = vld [vmem:[%s1525_s1 + $0x58] sm:$0xff]   ;;  %v1341_v11 = vld [vmem:[%s1525_s1 + $0x50] sm:$0xff]   ;;  %v485_v15 = vshrl.u32 %v484_v9, 7  ;;  %s402_s29 = scalar_lea.vmem %s1524_s0, %s1217_s17  ;;  %v1372_v1 = vmov 0   ;;  %s1501_s14 = scalar_lea.vmem %s1529_s5, %s1175_s11 }
   0xf   : > { %1251 = vmatprep.subr.bf16.mxu0 %v1333_v2  ;;  %1290 = vmatprep.subr.bf16.mxu1 %v1333_v2  ;;  %v1338_v7 = vld [vmem:[%s1525_s1 + $0x20] sm:$0xff]   ;;  %v1340_v10 = vld [vmem:[%s1525_s1 + $0x18] sm:$0xff]   ;;  %v1342_v17 = vld [vmem:[%s1525_s1 + $0x10] sm:$0xff]   ;;  %v483_v20 = vunpack.c.0.s8 %v482_v14  ;;  %s1539_s24 = smov (!%p436_p5, %s1361_s24), 1 }
  0x10   : > { %v1178_v12 = vld.sshfl [vmem:[%s1526_s2] sm:$0x11 pattern:$0x75316420]  ;;  %v1343_v18 = vld [vmem:[%s1525_s1 + $0x48] sm:$0xff]   ;;  %v500_v27 = vsub.s32 0, %v485_v15 }
  0x11   : > { %v1180_v16 = vld.sshfl [vmem:[%s1527_s3] sm:$0x11 pattern:$0x75316420]  ;;  %v480_v19 = vcombine.high %v1178_v12, %v1178_v12  ;;  %v486_v22 = vsub.s32 %v483_v20, %v485_v15  ;;  %v1344_v23 = vld [vmem:[%s1525_s1 + $0x8] sm:$0xff]   ;;  %v465_v43 = vld [vmem:[%s402_s29 + $0x10] sm:$0xff] }
  0x12   : > { %1252 = vmatpush3.bf16.msra.mxu0 %v1334_v3  ;;  %1298 = vmatpush3.bf16.msra.mxu1 %v1334_v3  ;;  %v532_v21 = vcombine.high %v1180_v16, %v1180_v16  ;;  %v1345_v24 = vld [vmem:[%s1525_s1 + $0x40] sm:$0xff]   ;;  %v464_v36 = vld [vmem:[%s402_s29 + $0x8] sm:$0xff]  ;;  %v466_v45 = vld [vmem:[%s402_s29 + $0x18] sm:$0xff]  ;;  %s1176_s21 = sshll.u32 %s1539_s24, 3 }
  0x13   : > { %1253 = vmatprep.subr.bf16.mxu0 %v1335_v4  ;;  %1291 = vmatprep.subr.bf16.mxu1 %v1335_v4  ;;  %v487_v25 = vrot.slane %v1178_v12, %v486_v22  ;;  %v494_v26 = vrot.slane %v480_v19, %v486_v22  ;;  %v539_v28 = vrot.slane %v1180_v16, %v486_v22  ;;  %v1346_v33 = vld [vmem:[%s1525_s1] sm:$0xff]   ;;  %v468_v42 = vld [vmem:[%s402_s29 + $0x28] sm:$0xff]  ;;  %v469_v46 = vld [vmem:[%s402_s29 + $0x30] sm:$0xff]  ;;  %s442_s17 = scalar_lea.vmem %s1530_s6, %s1176_s21  ;;  %s449_s20 = scalar_lea.vmem %s1531_s7, %s1176_s21 }
  0x14   : > { %v546_v29 = vrot.slane %v532_v21, %v486_v22  ;;  %v463_v35 = vld [vmem:[%s402_s29] sm:$0xff]  ;;  %v470_v47 = vld [vmem:[%s402_s29 + $0x38] sm:$0xff] }
  0x15   : > { %v496_v30 = vpack.i.b16 %v487_v25, %v487_v25  ;;  %v503_v31 = vpack.i.b16 %v494_v26, %v494_v26  ;;  %v548_v32 = vpack.i.b16 %v539_v28, %v539_v28  ;;  %v467_v41 = vld [vmem:[%s402_s29 + $0x20] sm:$0xff] }
  0x16   : > { %1254 = vmatpush3.bf16.msra.mxu0 %v1336_v5  ;;  %1299 = vmatpush3.bf16.msra.mxu1 %v1336_v5  ;;  %v555_v34 = vpack.i.b16 %v546_v29, %v546_v29  ;;  %v1206_v26 = vld [vmem:[%s1528_s4] ss:$0 sm:$0xff] }
  0x17   : > { %1255 = vmatprep.subr.bf16.mxu0 %v1337_v6  ;;  %1292 = vmatprep.subr.bf16.mxu1 %v1337_v6  ;;  %v501_v37 = vrot.slane %v496_v30, %v500_v27  ;;  %v508_v38 = vrot.slane %v503_v31, %v500_v27  ;;  %v553_v39 = vrot.slane %v548_v32, %v500_v27 }
  0x18   : > { %v560_v40 = vrot.slane %v555_v34, %v500_v27 }
  0x19   : > { %v1179_v44 = vcombine.low %v501_v37, %v508_v38 }
  0x1a   : > { %1256 = vmatpush3.bf16.msra.mxu0 %v1338_v7  ;;  %1300 = vmatpush3.bf16.msra.mxu1 %v1338_v7  ;;  %v1181_v48 = vcombine.low %v553_v39, %v560_v40 }
  0x1b   : > { %1257 = vmatprep.subr.bf16.mxu0 %v1339_v8  ;;  %1293 = vmatprep.subr.bf16.mxu1 %v1339_v8  ;;  %v515_v49 = vmul.bf16 %v1179_v44, %v463_v35  ;;  %v516_v50 = vmul.bf16 %v1179_v44, %v464_v36  ;;  %v519_v51 = vmul.bf16 %v1179_v44, %v467_v41 }
  0x1c   : > { %v520_v52 = vmul.bf16 %v1179_v44, %v468_v42  ;;  %v517_v53 = vmul.bf16 %v1179_v44, %v465_v43  ;;  %v518_v54 = vmul.bf16 %v1179_v44, %v466_v45  ;;  %v521_v55 = vmul.bf16 %v1179_v44, %v469_v46 }
  0x1d   : > { %v522_v56 = vmul.bf16 %v1179_v44, %v470_v47  ;;  %v567_v57 = vadd.bf16 %v1181_v48, %v515_v49  ;;  %v568_v58 = vadd.bf16 %v1181_v48, %v516_v50  ;;  %v571_v59 = vadd.bf16 %v1181_v48, %v519_v51 }
  0x1e   : > { %1258 = vmatpush3.bf16.msra.mxu0 %v1340_v10  ;;  %1301 = vmatpush3.bf16.msra.mxu1 %v1340_v10  ;;  %v572_v60 = vadd.bf16 %v1181_v48, %v520_v52  ;;  %v569_v61 = vadd.bf16 %v1181_v48, %v517_v53  ;;  %v570_v62 = vadd.bf16 %v1181_v48, %v518_v54 }
  0x1f   : > { %1259 = vmatprep.subr.bf16.mxu0 %v1341_v11  ;;  %1294 = vmatprep.subr.bf16.mxu1 %v1341_v11  ;;  %v573_v63 = vadd.bf16 %v1181_v48, %v521_v55  ;;  %v574_v0 = vadd.bf16 %v1181_v48, %v522_v56  ;;  %v575_v2 = vmax.bf16 %v1372_v1, %v567_v57 }
  0x20   : > { %v576_v3 = vmax.bf16 %v1372_v1, %v568_v58  ;;  %v579_v4 = vmax.bf16 %v1372_v1, %v571_v59  ;;  %v580_v5 = vmax.bf16 %v1372_v1, %v572_v60  ;;  %v577_v6 = vmax.bf16 %v1372_v1, %v569_v61 }
  0x21   : > { %v578_v7 = vmax.bf16 %v1372_v1, %v570_v62  ;;  %v581_v8 = vmax.bf16 %v1372_v1, %v573_v63  ;;  %v582_v9 = vmax.bf16 %v1372_v1, %v574_v0 }
  0x22   : > { %1260 = vmatpush3.bf16.msra.mxu0 %v1342_v17  ;;  %1302 = vmatpush3.bf16.msra.mxu1 %v1342_v17  ;;  %v1183_v10 = vcombine.high %v575_v2, %v576_v3  ;;  %v1182_v11 = vcombine.low %v575_v2, %v576_v3  ;;  %v1187_v12 = vcombine.high %v579_v4, %v580_v5 }
  0x23   : > { %1261 = vmatprep.subr.bf16.mxu0 %v1343_v18  ;;  %1295 = vmatprep.subr.bf16.mxu1 %v1343_v18  ;;  %v1186_v13 = vcombine.low %v579_v4, %v580_v5  ;;  %v1185_v14 = vcombine.high %v577_v6, %v578_v7  ;;  %v1189_v15 = vcombine.high %v581_v8, %v582_v9 }
  0x24   : > { %791 = vmatprep.mubr.bf16.mxu0 %v1183_v10  ;;  %807 = vmatprep.mubr.bf16.mxu1 %v1187_v12  ;;  %v1184_v16 = vcombine.low %v577_v6, %v578_v7  ;;  %v1188_v17 = vcombine.low %v581_v8, %v582_v9 }
  0x26   : > { %1262 = vmatpush3.bf16.msra.mxu0 %v1344_v23  ;;  %1303 = vmatpush3.bf16.msra.mxu1 %v1344_v23 }
  0x27   : > { %1263 = vmatprep.subr.bf16.mxu0 %v1345_v24  ;;  %1296 = vmatprep.subr.bf16.mxu1 %v1345_v24 }
  0x2a   : > { %1264 = vmatpush3.bf16.msra.mxu0 %v1346_v33  ;;  %1304 = vmatpush3.bf16.msra.mxu1 %v1346_v33 }
  0x2d   : > { %792 = vmatmul.mubr.bf16.vlgmr.msra.gmra.mxu0 %v1182_v11  ;;  %808 = vmatmul.mubr.bf16.vlgmr.msra.gmra.mxu1 %v1186_v13 }
  0x2e   : > { %799 = vmatprep.mubr.bf16.mxu0 %v1185_v14  ;;  %815 = vmatprep.mubr.bf16.mxu1 %v1189_v15 }
  0x35   : > { %800 = vmatmul.mubr.bf16.gmra.mxu0 %v1184_v16  ;;  %816 = vmatmul.mubr.bf16.gmra.mxu1 %v1188_v17 }
  0xed   : > { %v1265_v18 = vpop.f32.mrf.mxu0  ;;  %v1277_v19 = vpop.f32.mrf.mxu1 }
  0xef   : > { %v1266_v20 = vpop.f32.mrf.mxu0  ;;  %v1278_v21 = vpop.f32.mrf.mxu1 }
  0xf0   : > { %v1279_v23 = vadd.f32 %v1278_v21, %v1277_v19  ;;  %v1267_v25 = vadd.f32 %v1266_v20, %v1265_v18 }
  0xf1   : > { %v1268_v22 = vpop.f32.mrf.mxu0  ;;  %v1280_v24 = vpop.f32.mrf.mxu1 }
  0xf2   : > { %v862_v31 = vadd.f32 %v1279_v23, %v1206_v26  ;;  %v858_v34 = vadd.f32 %v1267_v25, %v1206_v26 }
  0xf3   : > { %v1269_v27 = vpop.f32.mrf.mxu0  ;;  %v1281_v28 = vpop.f32.mrf.mxu1 }
  0xf4   : > { %v1270_v29 = vadd.f32 %v1269_v27, %v1268_v22  ;;  %v1282_v30 = vadd.f32 %v1281_v28, %v1280_v24  ;;  %v879_v49 = vmul.f32 %v858_v34, %v858_v34  ;;  %v883_v0 = vmul.f32 %v862_v31, %v862_v31 }
  0xf5   : > { %v1271_v32 = vpop.f32.mrf.mxu0  ;;  %v1283_v33 = vpop.f32.mrf.mxu1 }
  0xf6   : > { %v859_v35 = vadd.f32 %v1270_v29, %v1206_v26  ;;  %v863_v36 = vadd.f32 %v1282_v30, %v1206_v26 }
  0xf7   : > { %v1272_v37 = vpop.f32.mrf.mxu0  ;;  %v1284_v38 = vpop.f32.mrf.mxu1 }
  0xf8   : > { %v1229_v39 = vpack.c.bf16 %v859_v35, %v858_v34  ;;  %v1239_v40 = vpack.c.bf16 %v863_v36, %v862_v31  ;;  %v1273_v41 = vadd.f32 %v1272_v37, %v1271_v32  ;;  %v1285_v43 = vadd.f32 %v1284_v38, %v1283_v33 }
  0xf9   : > { %v1274_v42 = vpop.f32.mrf.mxu0  ;;  %v1286_v44 = vpop.f32.mrf.mxu1  ;;  %v880_v45 = vmul.f32 %v859_v35, %v859_v35  ;;  %v866_v50 = vadd.f32 %v859_v35, %v858_v34  ;;  %v884_v3 = vmul.f32 %v863_v36, %v863_v36 }
  0xfa   : > { %1230 = vst [vmem:[%s1501_s14] sm:$0xff] %v1229_v39   ;;  %1247 = vst [vmem:[%s1501_s14 + $0x10] sm:$0xff] %v1239_v40   ;;  %v860_v46 = vadd.f32 %v1273_v41, %v1206_v26  ;;  %v864_v54 = vadd.f32 %v1285_v43, %v1206_v26 }
  0xfb   : > { %v1275_v47 = vpop.f32.mrf.mxu0  ;;  %v1287_v48 = vpop.f32.mrf.mxu1  ;;  %v887_v55 = vadd.f32 %v880_v45, %v879_v49 }
  0xfc   : > { %v1276_v51 = vadd.f32 %v1275_v47, %v1274_v42  ;;  %v1288_v52 = vadd.f32 %v1287_v48, %v1286_v44  ;;  %v881_v53 = vmul.f32 %v860_v46, %v860_v46  ;;  %v867_v56 = vadd.f32 %v866_v50, %v860_v46 }
  0xfd   : > { %v885_v6 = vmul.f32 %v864_v54, %v864_v54 }
  0xfe   : > { %v861_v57 = vadd.f32 %v1276_v51, %v1206_v26  ;;  %v865_v58 = vadd.f32 %v1288_v52, %v1206_v26  ;;  %v888_v59 = vadd.f32 %v887_v55, %v881_v53 }
 0x100   : > { %v868_v60 = vadd.f32 %v867_v56, %v861_v57  ;;  %v882_v61 = vmul.f32 %v861_v57, %v861_v57  ;;  %v1234_v62 = vpack.c.bf16 %v861_v57, %v860_v46  ;;  %v1244_v63 = vpack.c.bf16 %v865_v58, %v864_v54 }
 0x101   : > { %v886_v10 = vmul.f32 %v865_v58, %v865_v58 }
 0x102   : > { %v869_v1 = vadd.f32 %v868_v60, %v862_v31  ;;  %v889_v2 = vadd.f32 %v888_v59, %v882_v61  ;;  %1246 = vst [vmem:[%s1501_s14 + $0x8] sm:$0xff] %v1234_v62   ;;  %1248 = vst [vmem:[%s1501_s14 + $0x18] sm:$0xff] %v1244_v63  }
 0x104   : > { %v890_v4 = vadd.f32 %v889_v2, %v883_v0  ;;  %v870_v5 = vadd.f32 %v869_v1, %v863_v36 }
 0x106   : > { %v871_v7 = vadd.f32 %v870_v5, %v864_v54  ;;  %v891_v8 = vadd.f32 %v890_v4, %v884_v3 }
 0x108   : > { %v872_v9 = vadd.f32 %v871_v7, %v865_v58  ;;  %v892_v11 = vadd.f32 %v891_v8, %v885_v6 }
 0x10a   : > { %v873_v12 = vrot.slane %v872_v9, 4  ;;  %v893_v13 = vadd.f32 %v892_v11, %v886_v10 }
 0x10c   : > { %v874_v14 = vadd.f32 %v873_v12, %v872_v9  ;;  %v894_v15 = vrot.slane %v893_v13, 4 }
 0x10e   : > { %v875_v16 = vrot.slane %v874_v14, 2  ;;  %v895_v17 = vadd.f32 %v894_v15, %v893_v13 }
 0x110   : > { %v876_v18 = vadd.f32 %v875_v16, %v874_v14  ;;  %v896_v19 = vrot.slane %v895_v17, 2 }
 0x112   : > { %v877_v20 = vrot.slane %v876_v18, 1  ;;  %v897_v21 = vadd.f32 %v896_v19, %v895_v17 }
 0x114   : > { %v878_v22 = vadd.f32 %v877_v20, %v876_v18  ;;  %v898_v23 = vrot.slane %v897_v21, 1 }
 0x116   : > { %v899_v24 = vadd.f32 %v898_v23, %v897_v21  ;;  %900 = vst [vmem:[%s442_s17] sm:$0xff] %v878_v22 }
 0x118   : > { %901 = vst [vmem:[%s449_s20] sm:$0xff] %v899_v24 }
 0x119 PF: > { %s18_s26 = sadd.s32 1, %s1369_s26   ;;  %s1532_s24 = smov %s1365_s25 }
 0x11a   : > { %p15_p6 = scmp.ge.s32.totalorder %s18_s26, 4   ;;  %s1533_s25 = smov %s1535_s27 }
 0x11c   :  { %17 = sbr.rel (!%p15_p6) target bundleno = 2 (0x2), region = 114 }

// kernel: _lambda_.15
= control target key start
LH: loop header
LB: loop body
LE: loop exit
PB: predicated region body
PF: predicated region fallthrough
CT: control target
= control target key end

     0   :  { %s831_s12 = smov 0   ;;  %s833_s13 = smov 0   ;;  %s904_s0 = inlined_call_operand.vmem [shape: bf16[128,128], index: 0, kind: input, shape index: {}]   ;;  %s905_s1 = inlined_call_operand.vmem [shape: bf16[128,128], index: 1, kind: input, shape index: {}]   ;;  %s906_s2 = inlined_call_operand.vmem [shape: f32[1,128], index: 2, kind: input, shape index: {}]   ;;  %s907_s3 = inlined_call_operand.vmem [shape: bf16[128,128], index: 3, kind: output, shape index: {}]  }
   0x1   :  { %s835_s14 = smov 0  }
   0x2 LB: > { %s32_s15 = sadd.s32 1, %s805_s13  ;;  %p640_p0 = scmp.ge.s32.totalorder %s809_s14, 1  ;;  %s809_s14 = sphi %s835_s14, %s13_s14   ;;  %s805_s13 = sphi %s833_s13, %s909_s13   ;;  %s801_s12 = sphi %s831_s12, %s908_s12  }
   0x3   : > { %p34_p1 = scmp.ge.s32.totalorder %s32_s15, 2  ;;  %p188_p2 = scmp.lt.s32.totalorder %s809_s14, 3 }
   0x5   : > { %s911_s15 = smov (%p34_p1, %s32_s15), 0  ;;  %p189_p3 = pnand %p640_p0, %p188_p2 }
   0x6   : > { %s641_s18 = sshll.u32 (!%p189_p3), %s801_s12, 3 }
   0x7   : > { %192 = sbr.rel (%p189_p3) target bundleno = 249 (0xf9), region = 32  ;;  %p230_p4 = scmp.lt.s32.totalorder (!%p189_p3), %s641_s18, 15 }
   0xc   : > { %v775_v0 = vld [vmem:[%s905_s1 + $0x38] sm:$0xff]   ;;  %v776_v1 = vld [vmem:[%s905_s1 + $0x30] sm:$0xff]   ;;  %s913_s18 = smov (!%p230_p4, %s641_s18), 15  ;;  %v777_v2 = vld [vmem:[%s905_s1 + $0x28] sm:$0xff]  }
   0xd   : > { %711 = vmatprep.subr.bf16.mxu0 %v775_v0  ;;  %735 = vmatprep.subr.bf16.mxu1 %v775_v0  ;;  %s642_s23 = sshll.u32 %s913_s18, 2  ;;  %v778_v3 = vld [vmem:[%s905_s1 + $0x20] sm:$0xff]   ;;  %v779_v6 = vld [vmem:[%s905_s1 + $0x18] sm:$0xff]   ;;  %v780_v7 = vld [vmem:[%s905_s1 + $0x10] sm:$0xff]  }
   0xe   : > { %712 = vmatpush3.bf16.msra.mxu0 %v775_v0  ;;  %743 = vmatpush3.bf16.msra.mxu1 %v775_v0  ;;  %s866_s26 = scalar_lea.vmem %s904_s0, %s642_s23  ;;  %v781_v8 = vld [vmem:[%s905_s1 + $0x8] sm:$0xff]   ;;  %v782_v9 = vld [vmem:[%s905_s1] sm:$0xff]   ;;  %s257_s17 = scalar_lea.vmem %s907_s3, %s642_s23 }
   0xf   : > { %713 = vmatprep.subr.bf16.mxu0 %v776_v1  ;;  %736 = vmatprep.subr.bf16.mxu1 %v776_v1  ;;  %v783_v4 = vld [vmem:[%s866_s26] sm:$0xff]   ;;  %v784_v5 = vld [vmem:[%s866_s26 + $0x10] sm:$0xff]   ;;  %v785_v10 = vld [vmem:[%s866_s26 + $0x8] sm:$0xff]  }
  0x10   : > { %727 = vmatprep.mubr.bf16.mxu0 %v783_v4  ;;  %731 = vmatprep.mubr.bf16.mxu1 %v784_v5  ;;  %v786_v11 = vld [vmem:[%s866_s26 + $0x18] sm:$0xff]   ;;  %v657_v14 = vld [vmem:[%s906_s2] ss:$0 sm:$0xff] }
  0x12   : > { %714 = vmatpush3.bf16.msra.mxu0 %v776_v1  ;;  %744 = vmatpush3.bf16.msra.mxu1 %v776_v1 }
  0x13   : > { %715 = vmatprep.subr.bf16.mxu0 %v777_v2  ;;  %737 = vmatprep.subr.bf16.mxu1 %v777_v2 }
  0x16   : > { %716 = vmatpush3.bf16.msra.mxu0 %v777_v2  ;;  %745 = vmatpush3.bf16.msra.mxu1 %v777_v2 }
  0x17   : > { %717 = vmatprep.subr.bf16.mxu0 %v778_v3  ;;  %738 = vmatprep.subr.bf16.mxu1 %v778_v3 }
  0x1a   : > { %718 = vmatpush3.bf16.msra.mxu0 %v778_v3  ;;  %746 = vmatpush3.bf16.msra.mxu1 %v778_v3 }
  0x1b   : > { %719 = vmatprep.subr.bf16.mxu0 %v779_v6  ;;  %739 = vmatprep.subr.bf16.mxu1 %v779_v6 }
  0x1e   : > { %720 = vmatpush3.bf16.msra.mxu0 %v779_v6  ;;  %747 = vmatpush3.bf16.msra.mxu1 %v779_v6 }
  0x1f   : > { %721 = vmatprep.subr.bf16.mxu0 %v780_v7  ;;  %740 = vmatprep.subr.bf16.mxu1 %v780_v7 }
  0x22   : > { %722 = vmatpush3.bf16.msra.mxu0 %v780_v7  ;;  %748 = vmatpush3.bf16.msra.mxu1 %v780_v7 }
  0x23   : > { %723 = vmatprep.subr.bf16.mxu0 %v781_v8  ;;  %741 = vmatprep.subr.bf16.mxu1 %v781_v8 }
  0x26   : > { %724 = vmatpush3.bf16.msra.mxu0 %v781_v8  ;;  %749 = vmatpush3.bf16.msra.mxu1 %v781_v8 }
  0x27   : > { %725 = vmatprep.subr.bf16.mxu0 %v782_v9  ;;  %742 = vmatprep.subr.bf16.mxu1 %v782_v9 }
  0x2a   : > { %726 = vmatpush3.bf16.msra.mxu0 %v782_v9  ;;  %750 = vmatpush3.bf16.msra.mxu1 %v782_v9 }
  0x2d   : > { %728 = vmatmul.mubr.bf16.vlgmr.msra.gmra.mxu0 %v785_v10  ;;  %732 = vmatmul.mubr.bf16.vlgmr.msra.gmra.mxu1 %v786_v11 }
  0xed   : > { %v729_v12 = vpop.f32.mrf.mxu0  ;;  %v733_v13 = vpop.f32.mrf.mxu1 }
  0xee   : > { %v477_v19 = vadd.f32 %v729_v12, %v657_v14  ;;  %v481_v20 = vadd.f32 %v733_v13, %v657_v14 }
  0xef   : > { %v410_v15 = vpop.f32.mrf.mxu0  ;;  %v426_v16 = vpop.f32.mrf.mxu1 }
  0xf0   : > { %v475_v23 = vadd.f32 %v657_v14, %v410_v15  ;;  %v479_v24 = vadd.f32 %v657_v14, %v426_v16 }
  0xf1   : > { %v730_v17 = vpop.f32.mrf.mxu0  ;;  %v734_v18 = vpop.f32.mrf.mxu1 }
  0xf2   : > { %v478_v21 = vadd.f32 %v730_v17, %v657_v14  ;;  %v482_v22 = vadd.f32 %v734_v18, %v657_v14 }
  0xf3   : > { %v413_v25 = vpop.f32.mrf.mxu0  ;;  %v429_v26 = vpop.f32.mrf.mxu1 }
  0xf4   : > { %v684_v27 = vpack.c.bf16 %v478_v21, %v477_v19  ;;  %v694_v28 = vpack.c.bf16 %v482_v22, %v481_v20  ;;  %v476_v29 = vadd.f32 %v657_v14, %v413_v25  ;;  %v480_v30 = vadd.f32 %v657_v14, %v429_v26 }
  0xf6   : > { %696 = vst [vmem:[%s257_s17 + $0x8] sm:$0xff] %v684_v27   ;;  %698 = vst [vmem:[%s257_s17 + $0x18] sm:$0xff] %v694_v28   ;;  %v679_v31 = vpack.c.bf16 %v476_v29, %v475_v23  ;;  %v689_v32 = vpack.c.bf16 %v480_v30, %v479_v24 }
  0xf8   : > { %680 = vst [vmem:[%s257_s17] sm:$0xff] %v679_v31   ;;  %697 = vst [vmem:[%s257_s17 + $0x10] sm:$0xff] %v689_v32  }
  0xf9 PF: > { %s13_s14 = sadd.s32 1, %s809_s14   ;;  %s908_s12 = smov %s805_s13 }
  0xfa   : > { %p10_p5 = scmp.ge.s32.totalorder %s13_s14, 4   ;;  %s909_s13 = smov %s911_s15 }
  0xfc   :  { %12 = sbr.rel (!%p10_p5) target bundleno = 2 (0x2), region = 76 }

// kernel: tile.113
= control target key start
LH: loop header
LB: loop body
LE: loop exit
PB: predicated region body
PF: predicated region fallthrough
CT: control target
= control target key end

     0   :  { %s36_s0 = inlined_call_operand.vmem [shape: bf16[64], index: 0, kind: input, shape index: {}]   ;;  %s37_s1 = inlined_call_operand.vmem [shape: bf16[9,64], index: 1, kind: output, shape index: {}]  }
   0x1   :  { %v4_v0 = vld [vmem:[%s36_s0] ss:$0 sm:$0xff] }
   0x2   :  { %v5_v1 = vunpack.i.l.bf16 %v4_v0 }
   0x4   :  { %v18_v2 = vpack.c.bf16 %v5_v1, %v5_v1 }
   0x6   :  { %19 = vst [vmem:[%s37_s1] sm:$0xff] %v18_v2  }

// kernel: tile.114
= control target key start
LH: loop header
LB: loop body
LE: loop exit
PB: predicated region body
PF: predicated region fallthrough
CT: control target
= control target key end

     0   :  { %vm35_vm0 = vcmask 523264   ;;  %vm41_vm1 = vcmask 1048064   ;;  %v61_v7 = vmov 0.0   ;;  %s78_s0 = inlined_call_operand.vmem [shape: bf16[9,64], index: 0, kind: input, shape index: {}]   ;;  %s79_s1 = inlined_call_operand.vmem [shape: bf16[576], index: 1, kind: output, shape index: {}]  }
   0x1   :  { %v55_v0 = vld [vmem:[%s78_s0] sm:$0xff]   ;;  %s60_s0 = smov 64  }
   0x2   :  { %v56_v1 = vunpack.c.l.bf16 %v55_v0  ;;  %v57_v2 = vunpack.c.h.bf16 %v55_v0 }
   0x4   :  { %20 = vst [vmem:[#allocation1 + $0x8] sm:$0xff] %v57_v2  ;;  %33 = vst [vmem:[#allocation1] sm:$0xff] %v56_v1 }
   0xb   :  { %v38_v3 = vld [vmem:[#allocation1 + $0x1] ss:$2 sm:$0xf]   ;;  %v34_v4 = vld [vmem:[#allocation1] ss:$2 sm:$0x1f]  }
   0xc   :  { %39 = vrot.lane.b32.xlu0 %v38_v3, %s60_s0  ;;  %36 = vst.msk [vmem:[#allocation0] sm:$0x1f] %vm35_vm0, %v34_v4  }
  0x7e   :  { %v40_v5 = vpop.permute.xlu0 %39  }
  0x7f   :  { %42 = vst.msk [vmem:[#allocation0] sm:$0xf] %vm41_vm1, %v40_v5  }
  0x86   :  { %v48_v6 = vld [vmem:[#allocation0] sm:$0xff] }
  0x87   :  { %v49_v8 = vpack.c.bf16 %v61_v7, %v48_v6 }
  0x89   :  { %52 = vst [vmem:[%s79_s1] sm:$0xf] %v49_v8 }

// kernel: _lambda_.16
= control target key start
LH: loop header
LB: loop body
LE: loop exit
PB: predicated region body
PF: predicated region fallthrough
CT: control target
= control target key end

     0   :  { %s1788_s27 = smov 0   ;;  %s1790_s28 = smov 0   ;;  %s1984_s0 = inlined_call_operand.vmem [shape: bf16[128,384], index: 0, kind: input, shape index: {}]   ;;  %s1985_s1 = inlined_call_operand.vmem [shape: bf16[384,128], index: 1, kind: input, shape index: {}]   ;;  %s1986_s2 = inlined_call_operand.vmem [shape: bf16[1,384], index: 2, kind: input, shape index: {}]   ;;  %s1987_s3 = inlined_call_operand.vmem [shape: bf16[1,384], index: 3, kind: input, shape index: {}]   ;;  %s1988_s4 = inlined_call_operand.vmem [shape: f32[1,128], index: 4, kind: input, shape index: {}]   ;;  %s1989_s5 = inlined_call_operand.vmem [shape: bf16[128,128], index: 5, kind: input, shape index: {}]   ;;  %s1990_s6 = inlined_call_operand.vmem [shape: bf16[128,128], index: 6, kind: output, shape index: {0}]   ;;  %s1991_s7 = inlined_call_operand.vmem [shape: f32[16,128], index: 7, kind: output, shape index: {1}]   ;;  %s1992_s8 = inlined_call_operand.vmem [shape: f32[16,128], index: 8, kind: output, shape index: {2}]  }
   0x1   :  { %s1792_s29 = smov 0  }
   0x2 LB: > { %s38_s30 = sadd.s32 1, %s1735_s28  ;;  %p1478_p0 = scmp.ge.s32.totalorder %s1739_s29, 1  ;;  %s1739_s29 = sphi %s1792_s29, %s19_s29   ;;  %s1735_s28 = sphi %s1790_s28, %s1994_s28   ;;  %s1731_s27 = sphi %s1788_s27, %s1993_s27  }
   0x3   : > { %p40_p1 = scmp.ge.s32.totalorder %s38_s30, 2  ;;  %p361_p2 = scmp.lt.s32.totalorder %s1739_s29, 3 }
   0x5   : > { %s1996_s30 = smov (%p40_p1, %s38_s30), 0  ;;  %p362_p3 = pnand %p1478_p0, %p361_p2 }
   0x6   : > { %s1479_s23 = sshll.u32 (!%p362_p3), %s1731_s27, 3  ;;  %p496_p5 = scmp.lt.s32.totalorder (!%p362_p3), %s1731_s27, 1 }
   0x7   : > { %365 = sbr.rel (%p362_p3) target bundleno = 293 (0x125), region = 44  ;;  %p446_p4 = scmp.lt.s32.totalorder (!%p362_p3), %s1479_s23, 15 }
   0xc   : > { %v1693_v0 = vld [vmem:[%s1985_s1 + $0x78] sm:$0xff]   ;;  %v1696_v3 = vld [vmem:[%s1985_s1 + $0x70] sm:$0xff]   ;;  %v1699_v6 = vld [vmem:[%s1985_s1 + $0x68] sm:$0xff]   ;;  %v552_v20 = vlaneseq  ;;  %s1998_s23 = smov (!%p446_p4, %s1479_s23), 15  ;;  %v1741_v26 = vmov 1966171168  }
   0xd   : > { %v1694_v1 = vld [vmem:[%s1985_s1 + $0x38] sm:$0xff]   ;;  %1590 = vmatprep.subr.bf16.mxu0 %v1693_v0  ;;  %v1697_v4 = vld [vmem:[%s1985_s1 + $0x30] sm:$0xff]   ;;  %v1700_v7 = vld [vmem:[%s1985_s1 + $0x28] sm:$0xff]   ;;  %v550_v27 = vunpack.c.l.s4 %v1741_v26  ;;  %s1666_s9 = smul.u32 12, %s1998_s23  ;;  %s1482_s13 = sshll.u32 %s1998_s23, 2 }
   0xe   : > { %v1695_v2 = vld [vmem:[%s1985_s1 + $0xb8] sm:$0xff]   ;;  %1591 = vmatpush3.bf16.msra.mxu0 %v1694_v1  ;;  %v1698_v5 = vld [vmem:[%s1985_s1 + $0xb0] sm:$0xff]   ;;  %v1701_v8 = vld [vmem:[%s1985_s1 + $0xa8] sm:$0xff]   ;;  %v553_v28 = vshrl.u32 %v552_v20, 7  ;;  %s1937_s16 = scalar_lea.vmem %s1989_s5, %s1482_s13  ;;  %s1953_s21 = scalar_lea.vmem %s1990_s6, %s1482_s13 }
   0xf   : > { %1642 = vmatprep.subr.bf16.mxu1 %v1695_v2  ;;  %1592 = vmatprep.subr.bf16.mxu0 %v1696_v3  ;;  %v1702_v9 = vld [vmem:[%s1985_s1 + $0x60] sm:$0xff]   ;;  %v1705_v12 = vld [vmem:[%s1985_s1 + $0x58] sm:$0xff]   ;;  %v1708_v15 = vld [vmem:[%s1985_s1 + $0x50] sm:$0xff]   ;;  %v551_v31 = vunpack.c.0.s8 %v550_v27  ;;  %s1893_s12 = scalar_lea.vmem %s1984_s0, %s1666_s9  ;;  %s2000_s27 = smov (!%p496_p5, %s1731_s27), 1 }
  0x10   : > { %1643 = vmatpush3.bf16.msra.mxu1 %v1695_v2  ;;  %v1703_v10 = vld [vmem:[%s1985_s1 + $0x20] sm:$0xff]   ;;  %v1707_v13 = vld [vmem:[%s1985_s1 + $0x98] sm:$0xff]   ;;  %v1710_v16 = vld [vmem:[%s1985_s1 + $0x90] sm:$0xff]   ;;  %v569_v34 = vsub.s32 0, %v553_v28  ;;  %s1485_s23 = sshll.u32 %s2000_s27, 3 }
  0x11   : > { %1644 = vmatprep.subr.bf16.mxu1 %v1698_v5  ;;  %v1704_v11 = vld [vmem:[%s1985_s1 + $0xa0] sm:$0xff]   ;;  %v1706_v14 = vld [vmem:[%s1985_s1 + $0x18] sm:$0xff]   ;;  %v1709_v17 = vld [vmem:[%s1985_s1 + $0x10] sm:$0xff]   ;;  %v554_v33 = vsub.s32 %v551_v31, %v553_v28  ;;  %s502_s25 = scalar_lea.vmem %s1991_s7, %s1485_s23  ;;  %s509_s10 = scalar_lea.vmem %s1992_s8, %s1485_s23 }
  0x12   : > { %1593 = vmatpush3.bf16.msra.mxu0 %v1697_v4  ;;  %v1711_v18 = vld [vmem:[%s1985_s1 + $0x48] sm:$0xff]   ;;  %v1714_v22 = vld [vmem:[%s1985_s1 + $0x40] sm:$0xff]   ;;  %v527_v53 = vld [vmem:[%s1893_s12 + $0x18] sm:$0xff] }
  0x13   : > { %1594 = vmatprep.subr.bf16.mxu0 %v1699_v6  ;;  %v1713_v19 = vld [vmem:[%s1985_s1 + $0x88] sm:$0xff]   ;;  %v1487_v23 = vld.sshfl [vmem:[%s1986_s2] sm:$0x13 pattern:$0x75316420]  ;;  %v531_v57 = vld [vmem:[%s1893_s12 + $0x30] sm:$0xff] }
  0x14   : > { %1645 = vmatpush3.bf16.msra.mxu1 %v1698_v5  ;;  %v1712_v21 = vld [vmem:[%s1985_s1 + $0x8] sm:$0xff]   ;;  %v1490_v24 = vld.sshfl [vmem:[%s1987_s3] sm:$0x13 pattern:$0x75316420]  ;;  %v548_v30 = vcombine.high %v1487_v23, %v1487_v23  ;;  %v555_v35 = vrot.slane %v1487_v23, %v554_v33 }
  0x15   : > { %1646 = vmatprep.subr.bf16.mxu1 %v1701_v8  ;;  %v1716_v25 = vld [vmem:[%s1985_s1 + $0x80] sm:$0xff]   ;;  %v620_v32 = vcombine.high %v1490_v24, %v1490_v24  ;;  %v627_v37 = vrot.slane %v1490_v24, %v554_v33  ;;  %v525_v50 = vld [vmem:[%s1893_s12 + $0xc] sm:$0xff]  ;;  %v524_v59 = vld [vmem:[%s1893_s12 + $0x8] sm:$0xf] }
  0x16   : > { %1595 = vmatpush3.bf16.msra.mxu0 %v1700_v7  ;;  %v1715_v29 = vld [vmem:[%s1985_s1] sm:$0xff]   ;;  %v562_v36 = vrot.slane %v548_v30, %v554_v33  ;;  %v565_v39 = vpack.i.b16 %v555_v35, %v555_v35  ;;  %v563_v43 = vcombine.high %v555_v35, %v555_v35  ;;  %v526_v0 = vld [vmem:[%s1893_s12 + $0x14] sm:$0xf]  ;;  %v530_v2 = vld [vmem:[%s1893_s12 + $0x2c] sm:$0xf] }
  0x17   : > { %1596 = vmatprep.subr.bf16.mxu0 %v1702_v9  ;;  %v634_v38 = vrot.slane %v620_v32, %v554_v33  ;;  %v637_v41 = vpack.i.b16 %v627_v37, %v627_v37  ;;  %v635_v44 = vcombine.high %v627_v37, %v627_v37  ;;  %v523_v45 = vld [vmem:[%s1893_s12] sm:$0xff]  ;;  %v532_v26 = vld [vmem:[%s1893_s12 + $0x38] sm:$0xf]  ;;  %v536_v31 = vld [vmem:[%s1893_s12 + $0x50] sm:$0xf] }
  0x18   : > { %1647 = vmatpush3.bf16.msra.mxu1 %v1701_v8  ;;  %v572_v40 = vpack.i.b16 %v562_v36, %v562_v36  ;;  %v570_v46 = vrot.slane %v565_v39, %v569_v34  ;;  %v579_v51 = vpack.i.b16 %v563_v43, %v563_v43  ;;  %v529_v54 = vld [vmem:[%s1893_s12 + $0x24] sm:$0xff]  ;;  %v533_v58 = vld [vmem:[%s1893_s12 + $0x3c] sm:$0xff] }
  0x19   : > { %1648 = vmatprep.subr.bf16.mxu1 %v1704_v11  ;;  %v644_v42 = vpack.i.b16 %v634_v38, %v634_v38  ;;  %v642_v48 = vrot.slane %v637_v41, %v569_v34  ;;  %v651_v52 = vpack.i.b16 %v635_v44, %v635_v44  ;;  %v528_v1 = vld [vmem:[%s1893_s12 + $0x20] sm:$0xf]  ;;  %v534_v27 = vld [vmem:[%s1893_s12 + $0x44] sm:$0xf]  ;;  %v538_v32 = vld [vmem:[%s1893_s12 + $0x5c] sm:$0xf] }
  0x1a   : > { %1597 = vmatpush3.bf16.msra.mxu0 %v1703_v10  ;;  %v577_v47 = vrot.slane %v572_v40, %v569_v34  ;;  %v584_v60 = vrot.slane %v579_v51, %v569_v34  ;;  %v535_v41 = vld [vmem:[%s1893_s12 + $0x48] sm:$0xff] }
  0x1b   : > { %1598 = vmatprep.subr.bf16.mxu0 %v1705_v12  ;;  %v649_v49 = vrot.slane %v644_v42, %v569_v34  ;;  %v656_v61 = vrot.slane %v651_v52, %v569_v34  ;;  %v537_v42 = vld [vmem:[%s1893_s12 + $0x54] sm:$0xff] }
  0x1c   : > { %1649 = vmatpush3.bf16.msra.mxu1 %v1704_v11  ;;  %v1899_v55 = vcombine.low %v570_v46, %v577_v47  ;;  %v1489_v5 = vcombine.low %v584_v60, %v584_v60 }
  0x1d   : > { %1650 = vmatprep.subr.bf16.mxu1 %v1707_v13  ;;  %v1901_v56 = vcombine.low %v642_v48, %v649_v49  ;;  %v1492_v6 = vcombine.low %v656_v61, %v656_v61 }
  0x1e   : > { %1599 = vmatpush3.bf16.msra.mxu0 %v1706_v14  ;;  %v595_v62 = vmul.bf16 %v1899_v55, %v523_v45  ;;  %v597_v63 = vmul.bf16 %v1899_v55, %v525_v50  ;;  %v599_v3 = vmul.bf16 %v1899_v55, %v527_v53  ;;  %v601_v4 = vmul.bf16 %v1899_v55, %v529_v54 }
  0x1f   : > { %1600 = vmatprep.subr.bf16.mxu0 %v1708_v15  ;;  %v603_v7 = vmul.bf16 %v1899_v55, %v531_v57  ;;  %v605_v8 = vmul.bf16 %v1899_v55, %v533_v58  ;;  %v598_v14 = vmul.bf16 %v1489_v5, %v526_v0  ;;  %v600_v15 = vmul.bf16 %v1489_v5, %v528_v1 }
  0x20   : > { %1651 = vmatpush3.bf16.msra.mxu1 %v1707_v13  ;;  %v667_v9 = vadd.bf16 %v1901_v56, %v595_v62  ;;  %v669_v10 = vadd.bf16 %v1901_v56, %v597_v63  ;;  %v671_v11 = vadd.bf16 %v1901_v56, %v599_v3  ;;  %v673_v12 = vadd.bf16 %v1901_v56, %v601_v4 }
  0x21   : > { %1652 = vmatprep.subr.bf16.mxu1 %v1710_v16  ;;  %v596_v13 = vmul.bf16 %v1489_v5, %v524_v59  ;;  %v670_v23 = vadd.bf16 %v1492_v6, %v598_v14  ;;  %v672_v24 = vadd.bf16 %v1492_v6, %v600_v15  ;;  %v675_v37 = vadd.bf16 %v1901_v56, %v603_v7  ;;  %v1942_v14 = vld [vmem:[%s1988_s4] ss:$0 sm:$0xff] }
  0x22   : > { %1601 = vmatpush3.bf16.msra.mxu0 %v1709_v17  ;;  %v1742_v17 = vmov 0   ;;  %v677_v38 = vadd.bf16 %v1901_v56, %v605_v8  ;;  %v604_v39 = vmul.bf16 %v1489_v5, %v532_v26  ;;  %v606_v40 = vmul.bf16 %v1489_v5, %v534_v27  ;;  %v1549_v15 = vld [vmem:[%s1937_s16] sm:$0xff]  }
  0x23   : > { %1602 = vmatprep.subr.bf16.mxu0 %v1711_v18  ;;  %v683_v18 = vmax.bf16 %v1742_v17, %v667_v9  ;;  %v687_v20 = vmax.bf16 %v1742_v17, %v671_v11  ;;  %v686_v34 = vmax.bf16 %v1742_v17, %v670_v23  ;;  %v688_v35 = vmax.bf16 %v1742_v17, %v672_v24 }
  0x24   : > { %1653 = vmatpush3.bf16.msra.mxu1 %v1710_v16  ;;  %v602_v16 = vmul.bf16 %v1489_v5, %v530_v2  ;;  %v608_v45 = vmul.bf16 %v1489_v5, %v536_v31  ;;  %v610_v46 = vmul.bf16 %v1489_v5, %v538_v32  ;;  %v691_v47 = vmax.bf16 %v1742_v17, %v675_v37  ;;  %v1584_v32 = vld [vmem:[%s1937_s16 + $0x8] sm:$0xff]  }
  0x25   : > { %1654 = vmatprep.subr.bf16.mxu1 %v1713_v19  ;;  %v693_v48 = vmax.bf16 %v1742_v17, %v677_v38  ;;  %v676_v49 = vadd.bf16 %v1492_v6, %v604_v39  ;;  %v678_v50 = vadd.bf16 %v1492_v6, %v606_v40  ;;  %v607_v53 = vmul.bf16 %v1899_v55, %v535_v41 }
  0x26   : > { %1603 = vmatpush3.bf16.msra.mxu0 %v1712_v21  ;;  %v689_v21 = vmax.bf16 %v1742_v17, %v673_v12  ;;  %v680_v51 = vadd.bf16 %v1492_v6, %v608_v45  ;;  %v682_v52 = vadd.bf16 %v1492_v6, %v610_v46  ;;  %v609_v54 = vmul.bf16 %v1899_v55, %v537_v42  ;;  %v1585_v45 = vld [vmem:[%s1937_s16 + $0x10] sm:$0xff]  }
  0x27   : > { %1604 = vmatprep.subr.bf16.mxu0 %v1714_v22  ;;  %v668_v22 = vadd.bf16 %v1492_v6, %v596_v13  ;;  %v692_v57 = vmax.bf16 %v1742_v17, %v676_v49  ;;  %v694_v58 = vmax.bf16 %v1742_v17, %v678_v50  ;;  %v1500_v62 = vcombine.high %v691_v47, %v693_v48 }
  0x28   : > { %1655 = vmatpush3.bf16.msra.mxu1 %v1713_v19  ;;  %v685_v19 = vmax.bf16 %v1742_v17, %v669_v10  ;;  %v1497_v30 = vcombine.high %v687_v20, %v689_v21  ;;  %v1496_v59 = vcombine.low %v687_v20, %v689_v21  ;;  %v696_v60 = vmax.bf16 %v1742_v17, %v680_v51 }
  0x29   : > { %1656 = vmatprep.subr.bf16.mxu1 %v1716_v25  ;;  %v684_v33 = vmax.bf16 %v1742_v17, %v668_v22  ;;  %v698_v61 = vmax.bf16 %v1742_v17, %v682_v52  ;;  %v1501_v63 = vcombine.low %v692_v57, %v694_v58  ;;  %v679_v0 = vadd.bf16 %v1901_v56, %v607_v53 }
  0x2a   : > { %1605 = vmatpush3.bf16.msra.mxu0 %v1715_v29  ;;  %v1494_v28 = vcombine.high %v683_v18, %v685_v19  ;;  %v1493_v29 = vcombine.low %v683_v18, %v685_v19  ;;  %v681_v1 = vadd.bf16 %v1901_v56, %v609_v54  ;;  %v1499_v4 = vcombine.low %v691_v47, %v693_v48 }
  0x2b   : > { %v1495_v43 = vcombine.low %v684_v33, %v686_v34  ;;  %v1504_v2 = vcombine.low %v696_v60, %v698_v61  ;;  %v695_v3 = vmax.bf16 %v1742_v17, %v679_v0  ;;  %v1550_v21 = vunpack.c.l.bf16 %v1549_v15 }
  0x2c   : > { %1657 = vmatpush3.bf16.msra.mxu1 %v1716_v25  ;;  %v674_v25 = vadd.bf16 %v1492_v6, %v602_v16  ;;  %995 = vmatprep.mubr.bf16.mxu0 %v1494_v28  ;;  %v697_v55 = vmax.bf16 %v1742_v17, %v681_v1  ;;  %v1551_v23 = vunpack.c.h.bf16 %v1549_v15  ;;  %v1554_v38 = vunpack.c.l.bf16 %v1584_v32 }
  0x2d   : > { %996 = vmatmul.mubr.bf16.vlgmr.msra.gmra.mxu0 %v1493_v29  ;;  %1658 = vmatprep.mubr.bf16.mxu1 %v1495_v43  ;;  %v1555_v40 = vunpack.c.h.bf16 %v1584_v32  ;;  %v1558_v54 = vunpack.c.l.bf16 %v1585_v45  ;;  %v1559_v0 = vunpack.c.h.bf16 %v1585_v45 }
  0x2e   : > { %v690_v36 = vmax.bf16 %v1742_v17, %v674_v25  ;;  %1003 = vmatprep.mubr.bf16.mxu0 %v1497_v30  ;;  %v1503_v5 = vcombine.high %v695_v3, %v697_v55  ;;  %v1502_v6 = vcombine.low %v695_v3, %v697_v55 }
  0x30   : > { %v1498_v44 = vcombine.low %v688_v35, %v690_v36 }
  0x32   : > { %1659 = vmatmul.mubr.bf16.vlgmr.msra.gmra.mxu1 %v1498_v44 }
  0x33   : > { %1662 = vmatprep.mubr.bf16.mxu1 %v1501_v63 }
  0x35   : > { %1004 = vmatmul.mubr.bf16.gmra.mxu0 %v1496_v59 }
  0x36   : > { %1011 = vmatprep.mubr.bf16.mxu0 %v1500_v62 }
  0x3a   : > { %1663 = vmatmul.mubr.bf16.gmra.mxu1 %v1504_v2  ;;  %v1586_v2 = vld [vmem:[%s1937_s16 + $0x18] sm:$0xff]  }
  0x3d   : > { %1012 = vmatmul.mubr.bf16.gmra.mxu0 %v1499_v4 }
  0x3e   : > { %1019 = vmatprep.mubr.bf16.mxu0 %v1503_v5 }
  0x45   : > { %1020 = vmatmul.mubr.bf16.gmra.mxu0 %v1502_v6 }
  0xed   : > { %v1606_v7 = vpop.f32.mrf.mxu0 }
  0xef   : > { %v1607_v8 = vpop.f32.mrf.mxu0 }
  0xf0   : > { %v1608_v9 = vadd.f32 %v1607_v8, %v1606_v7 }
  0xf1   : > { %v1609_v56 = vpop.f32.mrf.mxu0 }
  0xf2   : > { %v1660_v10 = vpop.f32.mrf.mxu1 }
  0xf3   : > { %v1610_v13 = vpop.f32.mrf.mxu0 }
  0xf4   : > { %v1062_v11 = vpop.f32.mrf.mxu1  ;;  %v1611_v16 = vadd.f32 %v1610_v13, %v1609_v56  ;;  %v1562_v56 = vunpack.c.l.bf16 %v1586_v2 }
  0xf5   : > { %v1063_v12 = vadd.f32 %v1608_v9, %v1062_v11  ;;  %v1612_v18 = vpop.f32.mrf.mxu0 }
  0xf6   : > { %v1661_v17 = vpop.f32.mrf.mxu1 }
  0xf7   : > { %v1127_v20 = vadd.f32 %v1942_v14, %v1063_v12  ;;  %v1613_v24 = vpop.f32.mrf.mxu0 }
  0xf8   : > { %v1065_v19 = vpop.f32.mrf.mxu1  ;;  %v1614_v25 = vadd.f32 %v1613_v24, %v1612_v18 }
  0xf9   : > { %v1066_v22 = vadd.f32 %v1611_v16, %v1065_v19  ;;  %v1615_v27 = vpop.f32.mrf.mxu0  ;;  %v1151_v30 = vadd.f32 %v1550_v21, %v1127_v20  ;;  %v1563_v21 = vunpack.c.h.bf16 %v1586_v2 }
  0xfa   : > { %v1071_v28 = vadd.f32 %v1660_v10, %v1614_v25  ;;  %v1664_v29 = vpop.f32.mrf.mxu1 }
  0xfb   : > { %v1128_v26 = vadd.f32 %v1942_v14, %v1066_v22  ;;  %v1616_v33 = vpop.f32.mrf.mxu0  ;;  %v1172_v61 = vmul.f32 %v1151_v30, %v1151_v30 }
  0xfc   : > { %v1617_v34 = vadd.f32 %v1616_v33, %v1615_v27  ;;  %v1129_v37 = vadd.f32 %v1942_v14, %v1071_v28  ;;  %v1078_v41 = vpop.f32.mrf.mxu1 }
  0xfd   : > { %v1152_v31 = vadd.f32 %v1551_v23, %v1128_v26  ;;  %v1618_v36 = vpop.f32.mrf.mxu0 }
  0xfe   : > { %v1074_v39 = vadd.f32 %v1661_v17, %v1617_v34  ;;  %v1153_v47 = vadd.f32 %v1554_v38, %v1129_v37  ;;  %v1665_v50 = vpop.f32.mrf.mxu1 }
  0xff   : > { %v1567_v35 = vpack.c.bf16 %v1152_v31, %v1151_v30  ;;  %v1619_v42 = vpop.f32.mrf.mxu0  ;;  %v1173_v57 = vmul.f32 %v1152_v31, %v1152_v31  ;;  %v1159_v3 = vadd.f32 %v1152_v31, %v1151_v30 }
 0x100   : > { %v1130_v43 = vadd.f32 %v1942_v14, %v1074_v39  ;;  %v1620_v44 = vadd.f32 %v1619_v42, %v1618_v36  ;;  %v1081_v60 = vpop.f32.mrf.mxu1  ;;  %v1174_v62 = vmul.f32 %v1153_v47, %v1153_v47 }
 0x101   : > { %1568 = vst [vmem:[%s1953_s21] sm:$0xff] %v1567_v35   ;;  %v1621_v46 = vpop.f32.mrf.mxu0  ;;  %v1180_v5 = vadd.f32 %v1173_v57, %v1172_v61  ;;  %v1160_v9 = vadd.f32 %v1159_v3, %v1153_v47 }
 0x102   : > { %v1154_v48 = vadd.f32 %v1555_v40, %v1130_v43  ;;  %v1079_v49 = vadd.f32 %v1620_v44, %v1078_v41 }
 0x103   : > { %v1622_v51 = vpop.f32.mrf.mxu0  ;;  %v1181_v11 = vadd.f32 %v1180_v5, %v1174_v62 }
 0x104   : > { %v1572_v52 = vpack.c.bf16 %v1154_v48, %v1153_v47  ;;  %v1131_v53 = vadd.f32 %v1942_v14, %v1079_v49  ;;  %v1623_v58 = vadd.f32 %v1622_v51, %v1621_v46  ;;  %v1175_v6 = vmul.f32 %v1154_v48, %v1154_v48 }
 0x105   : > { %v1624_v59 = vpop.f32.mrf.mxu0  ;;  %v1161_v15 = vadd.f32 %v1160_v9, %v1154_v48 }
 0x106   : > { %1587 = vst [vmem:[%s1953_s21 + $0x8] sm:$0xff] %v1572_v52   ;;  %v1082_v63 = vadd.f32 %v1623_v58, %v1081_v60  ;;  %v1155_v55 = vadd.f32 %v1558_v54, %v1131_v53  ;;  %v1182_v19 = vadd.f32 %v1181_v11, %v1175_v6 }
 0x107   : > { %v1625_v1 = vpop.f32.mrf.mxu0 }
 0x108   : > { %v1626_v4 = vadd.f32 %v1625_v1, %v1624_v59  ;;  %v1132_v7 = vadd.f32 %v1942_v14, %v1082_v63  ;;  %v1176_v16 = vmul.f32 %v1155_v55, %v1155_v55  ;;  %v1162_v22 = vadd.f32 %v1161_v15, %v1155_v55 }
 0x109   : > { %v1627_v8 = vpop.f32.mrf.mxu0 }
 0x10a   : > { %v1087_v10 = vadd.f32 %v1664_v29, %v1626_v4  ;;  %v1156_v12 = vadd.f32 %v1559_v0, %v1132_v7  ;;  %v1183_v26 = vadd.f32 %v1182_v19, %v1176_v16 }
 0x10b   : > { %v1628_v13 = vpop.f32.mrf.mxu0 }
 0x10c   : > { %v1133_v17 = vadd.f32 %v1942_v14, %v1087_v10  ;;  %v1629_v18 = vadd.f32 %v1628_v13, %v1627_v8  ;;  %v1577_v20 = vpack.c.bf16 %v1156_v12, %v1155_v55  ;;  %v1177_v23 = vmul.f32 %v1156_v12, %v1156_v12 }
 0x10d   : > { %v1163_v27 = vadd.f32 %v1162_v22, %v1156_v12 }
 0x10e   : > { %v1157_v24 = vadd.f32 %v1562_v56, %v1133_v17  ;;  %v1090_v25 = vadd.f32 %v1665_v50, %v1629_v18  ;;  %1588 = vst [vmem:[%s1953_s21 + $0x10] sm:$0xff] %v1577_v20   ;;  %v1184_v30 = vadd.f32 %v1183_v26, %v1177_v23 }
 0x110   : > { %v1178_v28 = vmul.f32 %v1157_v24, %v1157_v24  ;;  %v1134_v29 = vadd.f32 %v1942_v14, %v1090_v25  ;;  %v1164_v31 = vadd.f32 %v1163_v27, %v1157_v24 }
 0x112   : > { %v1158_v32 = vadd.f32 %v1563_v21, %v1134_v29  ;;  %v1185_v33 = vadd.f32 %v1184_v30, %v1178_v28 }
 0x114   : > { %v1165_v34 = vadd.f32 %v1164_v31, %v1158_v32  ;;  %v1179_v35 = vmul.f32 %v1158_v32, %v1158_v32  ;;  %v1582_v36 = vpack.c.bf16 %v1158_v32, %v1157_v24 }
 0x116   : > { %v1166_v37 = vrot.slane %v1165_v34, 4  ;;  %v1186_v38 = vadd.f32 %v1185_v33, %v1179_v35  ;;  %1589 = vst [vmem:[%s1953_s21 + $0x18] sm:$0xff] %v1582_v36  }
 0x118   : > { %v1167_v39 = vadd.f32 %v1166_v37, %v1165_v34  ;;  %v1187_v40 = vrot.slane %v1186_v38, 4 }
 0x11a   : > { %v1168_v41 = vrot.slane %v1167_v39, 2  ;;  %v1188_v42 = vadd.f32 %v1187_v40, %v1186_v38 }
 0x11c   : > { %v1169_v43 = vadd.f32 %v1168_v41, %v1167_v39  ;;  %v1189_v44 = vrot.slane %v1188_v42, 2 }
 0x11e   : > { %v1170_v14 = vrot.slane %v1169_v43, 1  ;;  %v1190_v45 = vadd.f32 %v1189_v44, %v1188_v42 }
 0x120   : > { %v1171_v46 = vadd.f32 %v1170_v14, %v1169_v43  ;;  %v1191_v47 = vrot.slane %v1190_v45, 1 }
 0x122   : > { %v1192_v48 = vadd.f32 %v1191_v47, %v1190_v45  ;;  %1193 = vst [vmem:[%s502_s25] sm:$0xff] %v1171_v46 }
 0x124   : > { %1194 = vst [vmem:[%s509_s10] sm:$0xff] %v1192_v48 }
 0x125 PF: > { %s19_s29 = sadd.s32 1, %s1739_s29   ;;  %s1993_s27 = smov %s1735_s28 }
 0x126   : > { %p16_p6 = scmp.ge.s32.totalorder %s19_s29, 4   ;;  %s1994_s28 = smov %s1996_s30 }
 0x128   :  { %18 = sbr.rel (!%p16_p6) target bundleno = 2 (0x2), region = 121 }

// kernel: _lambda_.17
= control target key start
LH: loop header
LB: loop body
LE: loop exit
PB: predicated region body
PF: predicated region fallthrough
CT: control target
= control target key end

     0   :  { %s1375_s24 = smov 0   ;;  %s1377_s25 = smov 0   ;;  %s1504_s0 = inlined_call_operand.vmem [shape: bf16[32,384], index: 0, kind: input, shape index: {}]   ;;  %s1505_s1 = inlined_call_operand.vmem [shape: bf16[384,128], index: 1, kind: input, shape index: {}]   ;;  %s1506_s2 = inlined_call_operand.vmem [shape: bf16[1,384], index: 2, kind: input, shape index: {}]   ;;  %s1507_s3 = inlined_call_operand.vmem [shape: bf16[1,384], index: 3, kind: input, shape index: {}]   ;;  %s1508_s4 = inlined_call_operand.vmem [shape: f32[1,128], index: 4, kind: input, shape index: {}]   ;;  %s1509_s5 = inlined_call_operand.vmem [shape: bf16[32,128], index: 5, kind: output, shape index: {0}]   ;;  %s1510_s6 = inlined_call_operand.vmem [shape: f32[16,128], index: 6, kind: output, shape index: {1}]   ;;  %s1511_s7 = inlined_call_operand.vmem [shape: f32[16,128], index: 7, kind: output, shape index: {2}]  }
   0x1   :  { %s1379_s26 = smov 0  }
   0x2 LB: > { %s37_s27 = sadd.s32 1, %s1325_s25  ;;  %p1151_p0 = scmp.ge.s32.totalorder %s1329_s26, 1  ;;  %s1329_s26 = sphi %s1379_s26, %s18_s26   ;;  %s1325_s25 = sphi %s1377_s25, %s1513_s25   ;;  %s1321_s24 = sphi %s1375_s24, %s1512_s24  }
   0x3   : > { %p39_p1 = scmp.ge.s32.totalorder %s37_s27, 2  ;;  %p320_p2 = scmp.lt.s32.totalorder %s1329_s26, 3 }
   0x5   : > { %s1515_s27 = smov (%p39_p1, %s37_s27), 0  ;;  %p321_p3 = pnand %p1151_p0, %p320_p2 }
   0x6   : > { %s1152_s20 = sshll.u32 (!%p321_p3), %s1321_s24, 1  ;;  %p436_p5 = scmp.lt.s32.totalorder (!%p321_p3), %s1321_s24, 1 }
   0x7   : > { %324 = sbr.rel (%p321_p3) target bundleno = 268 (0x10c), region = 40  ;;  %p395_p4 = scmp.lt.s32.totalorder (!%p321_p3), %s1152_s20, 3 }
   0xc   : > { %v1283_v0 = vld [vmem:[%s1505_s1 + $0x78] sm:$0xff]   ;;  %v1331_v1 = vmov 0.0   ;;  %vm1332_vm0 = vmmov 0   ;;  %v1286_v4 = vld [vmem:[%s1505_s1 + $0x70] sm:$0xff]   ;;  %v1289_v7 = vld [vmem:[%s1505_s1 + $0x68] sm:$0xff]   ;;  %v474_v20 = vlaneseq  ;;  %s1517_s20 = smov (!%p395_p4, %s1152_s20), 3 }
   0xd   : > { %1234 = vmatprep.subr.bf16.mxu1 %v1331_v1  ;;  %v1284_v2 = vld [vmem:[%s1505_s1 + $0xb8] sm:$0xff]   ;;  %1203 = vmatprep.subr.bf16.mxu0 %v1283_v0  ;;  %v1287_v5 = vld [vmem:[%s1505_s1 + $0xb0] sm:$0xff]   ;;  %v1290_v8 = vld [vmem:[%s1505_s1 + $0xa8] sm:$0xff]   ;;  %v1333_v26 = vmov 1966171168   ;;  %s1254_s21 = smul.u32 12, %s1517_s20 }
   0xe   : > { %v1285_v3 = vld [vmem:[%s1505_s1 + $0x38] sm:$0xff]   ;;  %1250 = vmatprep.mubr.msk.bf16.mxu1 %vm1332_vm0, %v1331_v1  ;;  %1235 = vmatpush3.bf16.msra.mxu1 %v1284_v2  ;;  %v1288_v6 = vld [vmem:[%s1505_s1 + $0x30] sm:$0xff]   ;;  %v1291_v9 = vld [vmem:[%s1505_s1 + $0x28] sm:$0xff]   ;;  %v472_v27 = vunpack.c.l.s4 %v1333_v26  ;;  %v475_v28 = vshrl.u32 %v474_v20, 7  ;;  %s1155_s8 = sshll.u32 %s1517_s20, 2  ;;  %s1519_s24 = smov (!%p436_p5, %s1321_s24), 1 }
   0xf   : > { %1204 = vmatpush3.bf16.msra.mxu0 %v1285_v3  ;;  %1236 = vmatprep.subr.bf16.mxu1 %v1331_v1  ;;  %v1292_v10 = vld [vmem:[%s1505_s1 + $0x60] sm:$0xff]   ;;  %v1295_v13 = vld [vmem:[%s1505_s1 + $0x58] sm:$0xff]   ;;  %v1298_v16 = vld [vmem:[%s1505_s1 + $0x50] sm:$0xff]   ;;  %s402_s28 = scalar_lea.vmem %s1504_s0, %s1254_s21  ;;  %s434_s11 = scalar_lea.vmem %s1509_s5, %s1155_s8 }
  0x10   : > { %1205 = vmatprep.subr.bf16.mxu0 %v1286_v4  ;;  %v1293_v11 = vld [vmem:[%s1505_s1 + $0xa0] sm:$0xff]   ;;  %v1296_v14 = vld [vmem:[%s1505_s1 + $0x98] sm:$0xff]   ;;  %v1299_v17 = vld [vmem:[%s1505_s1 + $0x90] sm:$0xff]   ;;  %v473_v32 = vunpack.c.0.s8 %v472_v27  ;;  %v491_v35 = vsub.s32 0, %v475_v28  ;;  %v1334_v4 = vmov 0   ;;  %s1156_s20 = sshll.u32 %s1519_s24, 3 }
  0x11   : > { %v1294_v12 = vld [vmem:[%s1505_s1 + $0x20] sm:$0xff]   ;;  %v1297_v15 = vld [vmem:[%s1505_s1 + $0x18] sm:$0xff]   ;;  %v1300_v18 = vld [vmem:[%s1505_s1 + $0x10] sm:$0xff]   ;;  %s442_s14 = scalar_lea.vmem %s1510_s6, %s1156_s20  ;;  %s449_s17 = scalar_lea.vmem %s1511_s7, %s1156_s20 }
  0x12   : > { %1237 = vmatpush3.bf16.msra.mxu1 %v1287_v5  ;;  %v1301_v19 = vld [vmem:[%s1505_s1 + $0x48] sm:$0xff]   ;;  %v1304_v23 = vld [vmem:[%s1505_s1 + $0x40] sm:$0xff]   ;;  %v476_v34 = vsub.s32 %v473_v32, %v475_v28  ;;  %v460_v61 = vld [vmem:[%s402_s28 + $0x14] sm:$0xf] }
  0x13   : > { %1206 = vmatpush3.bf16.msra.mxu0 %v1288_v6  ;;  %1238 = vmatprep.subr.bf16.mxu1 %v1331_v1  ;;  %v1302_v21 = vld [vmem:[%s1505_s1 + $0x88] sm:$0xff]   ;;  %v1158_v24 = vld.sshfl [vmem:[%s1506_s2] sm:$0x13 pattern:$0x75316420] }
  0x14   : > { %1207 = vmatprep.subr.bf16.mxu0 %v1289_v7  ;;  %v1303_v22 = vld [vmem:[%s1505_s1 + $0x8] sm:$0xff]   ;;  %v1161_v25 = vld.sshfl [vmem:[%s1507_s3] sm:$0x13 pattern:$0x75316420]  ;;  %v470_v31 = vcombine.high %v1158_v24, %v1158_v24  ;;  %v477_v36 = vrot.slane %v1158_v24, %v476_v34 }
  0x15   : > { %v1305_v29 = vld [vmem:[%s1505_s1 + $0x80] sm:$0xff]   ;;  %v530_v33 = vcombine.high %v1161_v25, %v1161_v25  ;;  %v537_v38 = vrot.slane %v1161_v25, %v476_v34  ;;  %v459_v51 = vld [vmem:[%s402_s28 + $0xc] sm:$0xff]  ;;  %v458_v60 = vld [vmem:[%s402_s28 + $0x8] sm:$0xf] }
  0x16   : > { %1239 = vmatpush3.bf16.msra.mxu1 %v1290_v8  ;;  %v1306_v30 = vld [vmem:[%s1505_s1] sm:$0xff]   ;;  %v484_v37 = vrot.slane %v470_v31, %v476_v34  ;;  %v487_v40 = vpack.i.b16 %v477_v36, %v477_v36  ;;  %v485_v44 = vcombine.high %v477_v36, %v477_v36 }
  0x17   : > { %1208 = vmatpush3.bf16.msra.mxu0 %v1291_v9  ;;  %1240 = vmatprep.subr.bf16.mxu1 %v1331_v1  ;;  %v544_v39 = vrot.slane %v530_v33, %v476_v34  ;;  %v547_v42 = vpack.i.b16 %v537_v38, %v537_v38  ;;  %v545_v45 = vcombine.high %v537_v38, %v537_v38  ;;  %v457_v50 = vld [vmem:[%s402_s28] sm:$0xff] }
  0x18   : > { %1209 = vmatprep.subr.bf16.mxu0 %v1292_v10  ;;  %v494_v41 = vpack.i.b16 %v484_v37, %v484_v37  ;;  %v492_v46 = vrot.slane %v487_v40, %v491_v35  ;;  %v501_v52 = vpack.i.b16 %v485_v44, %v485_v44 }
  0x19   : > { %v554_v43 = vpack.i.b16 %v544_v39, %v544_v39  ;;  %v552_v48 = vrot.slane %v547_v42, %v491_v35  ;;  %v561_v53 = vpack.i.b16 %v545_v45, %v545_v45 }
  0x1a   : > { %1241 = vmatpush3.bf16.msra.mxu1 %v1293_v11  ;;  %v499_v47 = vrot.slane %v494_v41, %v491_v35  ;;  %v506_v56 = vrot.slane %v501_v52, %v491_v35 }
  0x1b   : > { %1210 = vmatpush3.bf16.msra.mxu0 %v1294_v12  ;;  %1242 = vmatprep.subr.bf16.mxu1 %v1331_v1  ;;  %v559_v49 = vrot.slane %v554_v43, %v491_v35  ;;  %v566_v57 = vrot.slane %v561_v53, %v491_v35 }
  0x1c   : > { %1211 = vmatprep.subr.bf16.mxu0 %v1295_v13  ;;  %v1159_v54 = vcombine.low %v492_v46, %v499_v47  ;;  %v1160_v62 = vcombine.low %v506_v56, %v506_v56 }
  0x1d   : > { %v1162_v55 = vcombine.low %v552_v48, %v559_v49  ;;  %v1163_v63 = vcombine.low %v566_v57, %v566_v57 }
  0x1e   : > { %1243 = vmatpush3.bf16.msra.mxu1 %v1296_v14  ;;  %v517_v58 = vmul.bf16 %v1159_v54, %v457_v50  ;;  %v519_v59 = vmul.bf16 %v1159_v54, %v459_v51  ;;  %v518_v2 = vmul.bf16 %v1160_v62, %v458_v60  ;;  %v520_v3 = vmul.bf16 %v1160_v62, %v460_v61 }
  0x1f   : > { %1212 = vmatpush3.bf16.msra.mxu0 %v1297_v15  ;;  %1244 = vmatprep.subr.bf16.mxu1 %v1331_v1 }
  0x20   : > { %1213 = vmatprep.subr.bf16.mxu0 %v1298_v16  ;;  %v577_v0 = vadd.bf16 %v1162_v55, %v517_v58  ;;  %v578_v7 = vadd.bf16 %v1163_v63, %v518_v2  ;;  %v580_v8 = vadd.bf16 %v1163_v63, %v520_v3 }
  0x22   : > { %1245 = vmatpush3.bf16.msra.mxu1 %v1299_v17  ;;  %v581_v5 = vmax.bf16 %v1334_v4, %v577_v0  ;;  %v582_v11 = vmax.bf16 %v1334_v4, %v578_v7  ;;  %v584_v12 = vmax.bf16 %v1334_v4, %v580_v8 }
  0x23   : > { %1214 = vmatpush3.bf16.msra.mxu0 %v1300_v18  ;;  %1246 = vmatprep.subr.bf16.mxu1 %v1331_v1 }
  0x24   : > { %1215 = vmatprep.subr.bf16.mxu0 %v1301_v19  ;;  %v1166_v13 = vcombine.low %v582_v11, %v584_v12 }
  0x26   : > { %1247 = vmatpush3.bf16.msra.mxu1 %v1302_v21  ;;  %v1191_v21 = vld [vmem:[%s1508_s4] ss:$0 sm:$0xff] }
  0x27   : > { %1216 = vmatpush3.bf16.msra.mxu0 %v1303_v22  ;;  %1248 = vmatprep.subr.bf16.mxu1 %v1331_v1  ;;  %v579_v1 = vadd.bf16 %v1162_v55, %v519_v59 }
  0x28   : > { %1217 = vmatprep.subr.bf16.mxu0 %v1304_v23 }
  0x29   : > { %v583_v6 = vmax.bf16 %v1334_v4, %v579_v1 }
  0x2a   : > { %1249 = vmatpush3.bf16.msra.mxu1 %v1305_v29 }
  0x2b   : > { %1218 = vmatpush3.bf16.msra.mxu0 %v1306_v30  ;;  %v1165_v9 = vcombine.high %v581_v5, %v583_v6  ;;  %v1164_v10 = vcombine.low %v581_v5, %v583_v6 }
  0x2d   : > { %827 = vmatprep.mubr.bf16.mxu0 %v1165_v9  ;;  %1251 = vmatmul.mubr.bf16.vlgmr.msra.gmra.mxu1 %v1166_v13 }
  0x2e   : > { %828 = vmatmul.mubr.bf16.vlgmr.msra.gmra.mxu0 %v1164_v10 }
  0xed   : > { %v870_v15 = vpop.f32.mrf.mxu1 }
  0xee   : > { %v1219_v14 = vpop.f32.mrf.mxu0 }
  0xef   : > { %v1252_v18 = vpop.f32.mrf.mxu1 }
  0xf0   : > { %v1220_v16 = vpop.f32.mrf.mxu0 }
  0xf1   : > { %v1221_v17 = vadd.f32 %v1220_v16, %v1219_v14  ;;  %v873_v22 = vpop.f32.mrf.mxu1 }
  0xf2   : > { %v1222_v19 = vpop.f32.mrf.mxu0 }
  0xf3   : > { %v871_v20 = vadd.f32 %v1221_v17, %v870_v15  ;;  %v1253_v25 = vpop.f32.mrf.mxu1 }
  0xf4   : > { %v1223_v23 = vpop.f32.mrf.mxu0 }
  0xf5   : > { %v1224_v24 = vadd.f32 %v1223_v23, %v1222_v19  ;;  %v893_v26 = vadd.f32 %v1191_v21, %v871_v20 }
  0xf7   : > { %v874_v27 = vadd.f32 %v1224_v24, %v873_v22  ;;  %v902_v29 = vmul.f32 %v893_v26, %v893_v26 }
  0xf9   : > { %v894_v28 = vadd.f32 %v1191_v21, %v874_v27 }
  0xfb   : > { %v895_v30 = vadd.f32 %v894_v28, %v893_v26  ;;  %v903_v31 = vmul.f32 %v894_v28, %v894_v28  ;;  %v1201_v32 = vpack.c.bf16 %v894_v28, %v893_v26 }
  0xfd   : > { %v896_v33 = vrot.slane %v895_v30, 4  ;;  %v904_v34 = vadd.f32 %v903_v31, %v902_v29  ;;  %1202 = vst [vmem:[%s434_s11] sm:$0xff] %v1201_v32  }
  0xff   : > { %v897_v35 = vadd.f32 %v896_v33, %v895_v30  ;;  %v905_v36 = vrot.slane %v904_v34, 4 }
 0x101   : > { %v898_v37 = vrot.slane %v897_v35, 2  ;;  %v906_v38 = vadd.f32 %v905_v36, %v904_v34 }
 0x103   : > { %v899_v39 = vadd.f32 %v898_v37, %v897_v35  ;;  %v907_v40 = vrot.slane %v906_v38, 2 }
 0x105   : > { %v900_v41 = vrot.slane %v899_v39, 1  ;;  %v908_v42 = vadd.f32 %v907_v40, %v906_v38 }
 0x107   : > { %v901_v43 = vadd.f32 %v900_v41, %v899_v39  ;;  %v909_v44 = vrot.slane %v908_v42, 1 }
 0x109   : > { %v910_v45 = vadd.f32 %v909_v44, %v908_v42  ;;  %911 = vst [vmem:[%s442_s14] sm:$0xff] %v901_v43 }
 0x10b   : > { %912 = vst [vmem:[%s449_s17] sm:$0xff] %v910_v45 }
 0x10c PF: > { %s18_s26 = sadd.s32 1, %s1329_s26   ;;  %s1512_s24 = smov %s1325_s25 }
 0x10d   : > { %p15_p6 = scmp.ge.s32.totalorder %s18_s26, 4   ;;  %s1513_s25 = smov %s1515_s27 }
 0x10f   :  { %17 = sbr.rel (!%p15_p6) target bundleno = 2 (0x2), region = 114 }

// kernel: _lambda_.18
= control target key start
LH: loop header
LB: loop body
LE: loop exit
PB: predicated region body
PF: predicated region fallthrough
CT: control target
= control target key end

     0   :  { %s662_s12 = smov 0   ;;  %s664_s13 = smov 0   ;;  %s725_s0 = inlined_call_operand.vmem [shape: bf16[32,128], index: 0, kind: input, shape index: {}]   ;;  %s726_s1 = inlined_call_operand.vmem [shape: bf16[128,128], index: 1, kind: input, shape index: {}]   ;;  %s727_s2 = inlined_call_operand.vmem [shape: f32[1,128], index: 2, kind: input, shape index: {}]   ;;  %s728_s3 = inlined_call_operand.vmem [shape: bf16[32,128], index: 3, kind: output, shape index: {}]  }
   0x1   :  { %s666_s14 = smov 0  }
   0x2 LB: > { %s32_s15 = sadd.s32 1, %s634_s13  ;;  %p526_p0 = scmp.ge.s32.totalorder %s638_s14, 1  ;;  %s638_s14 = sphi %s666_s14, %s13_s14   ;;  %s634_s13 = sphi %s664_s13, %s730_s13   ;;  %s630_s12 = sphi %s662_s12, %s729_s12  }
   0x3   : > { %p34_p1 = scmp.ge.s32.totalorder %s32_s15, 2  ;;  %p188_p2 = scmp.lt.s32.totalorder %s638_s14, 3 }
   0x5   : > { %s732_s15 = smov (%p34_p1, %s32_s15), 0  ;;  %p189_p3 = pnand %p526_p0, %p188_p2 }
   0x6   : > { %s527_s20 = sshll.u32 (!%p189_p3), %s630_s12, 1 }
   0x7   : > { %192 = sbr.rel (%p189_p3) target bundleno = 247 (0xf7), region = 32  ;;  %p230_p4 = scmp.lt.s32.totalorder (!%p189_p3), %s527_s20, 3 }
   0xc   : > { %v607_v0 = vld [vmem:[%s726_s1 + $0x38] sm:$0xff]   ;;  %v640_v1 = vmov 0.0   ;;  %v608_v2 = vld [vmem:[%s726_s1 + $0x30] sm:$0xff]   ;;  %vm641_vm0 = vmmov 0   ;;  %s734_s20 = smov (!%p230_p4, %s527_s20), 3  ;;  %v609_v3 = vld [vmem:[%s726_s1 + $0x28] sm:$0xff]  }
   0xd   : > { %561 = vmatprep.subr.bf16.mxu0 %v640_v1  ;;  %577 = vmatprep.mubr.msk.bf16.mxu0 %vm641_vm0, %v640_v1  ;;  %s528_s23 = sshll.u32 %s734_s20, 2  ;;  %v610_v4 = vld [vmem:[%s726_s1 + $0x20] sm:$0xff]   ;;  %v611_v5 = vld [vmem:[%s726_s1 + $0x18] sm:$0xff]   ;;  %v612_v6 = vld [vmem:[%s726_s1 + $0x10] sm:$0xff]  }
   0xe   : > { %562 = vmatpush3.bf16.msra.mxu0 %v607_v0  ;;  %s236_s26 = scalar_lea.vmem %s725_s0, %s528_s23  ;;  %v613_v7 = vld [vmem:[%s726_s1 + $0x8] sm:$0xff]   ;;  %v614_v8 = vld [vmem:[%s726_s1] sm:$0xff]   ;;  %s257_s17 = scalar_lea.vmem %s728_s3, %s528_s23 }
   0xf   : > { %563 = vmatprep.subr.bf16.mxu0 %v640_v1  ;;  %v615_v9 = vld [vmem:[%s236_s26] sm:$0xff]  }
  0x10   : > { %v540_v11 = vld [vmem:[%s727_s2] ss:$0 sm:$0xff] }
  0x12   : > { %564 = vmatpush3.bf16.msra.mxu0 %v608_v2 }
  0x13   : > { %565 = vmatprep.subr.bf16.mxu0 %v640_v1 }
  0x16   : > { %566 = vmatpush3.bf16.msra.mxu0 %v609_v3 }
  0x17   : > { %567 = vmatprep.subr.bf16.mxu0 %v640_v1 }
  0x1a   : > { %568 = vmatpush3.bf16.msra.mxu0 %v610_v4 }
  0x1b   : > { %569 = vmatprep.subr.bf16.mxu0 %v640_v1 }
  0x1e   : > { %570 = vmatpush3.bf16.msra.mxu0 %v611_v5 }
  0x1f   : > { %571 = vmatprep.subr.bf16.mxu0 %v640_v1 }
  0x22   : > { %572 = vmatpush3.bf16.msra.mxu0 %v612_v6 }
  0x23   : > { %573 = vmatprep.subr.bf16.mxu0 %v640_v1 }
  0x26   : > { %574 = vmatpush3.bf16.msra.mxu0 %v613_v7 }
  0x27   : > { %575 = vmatprep.subr.bf16.mxu0 %v640_v1 }
  0x2a   : > { %576 = vmatpush3.bf16.msra.mxu0 %v614_v8 }
  0x2d   : > { %578 = vmatmul.mubr.bf16.vlgmr.msra.gmra.mxu0 %v615_v9 }
  0xed   : > { %v374_v10 = vpop.f32.mrf.mxu0 }
  0xee   : > { %v397_v14 = vadd.f32 %v540_v11, %v374_v10 }
  0xef   : > { %v579_v12 = vpop.f32.mrf.mxu0 }
  0xf1   : > { %v377_v13 = vpop.f32.mrf.mxu0 }
  0xf2   : > { %v398_v15 = vadd.f32 %v540_v11, %v377_v13 }
  0xf3   : > { %v580_v16 = vpop.f32.mrf.mxu0 }
  0xf4   : > { %v550_v17 = vpack.c.bf16 %v398_v15, %v397_v14 }
  0xf6   : > { %551 = vst [vmem:[%s257_s17] sm:$0xff] %v550_v17  }
  0xf7 PF: > { %s13_s14 = sadd.s32 1, %s638_s14   ;;  %s729_s12 = smov %s634_s13 }
  0xf8   : > { %p10_p5 = scmp.ge.s32.totalorder %s13_s14, 4   ;;  %s730_s13 = smov %s732_s15 }
  0xfa   :  { %12 = sbr.rel (!%p10_p5) target bundleno = 2 (0x2), region = 76 }

// kernel: _lambda_.19
= control target key start
LH: loop header
LB: loop body
LE: loop exit
PB: predicated region body
PF: predicated region fallthrough
CT: control target
= control target key end

     0   :  { %s1581_s21 = smov 0   ;;  %s1583_s22 = smov 0   ;;  %s1799_s0 = inlined_call_operand.vmem [shape: bf16[32,640], index: 0, kind: input, shape index: {}]   ;;  %s1800_s1 = inlined_call_operand.vmem [shape: bf16[640,128], index: 1, kind: input, shape index: {}]   ;;  %s1801_s2 = inlined_call_operand.vmem [shape: bf16[1,640], index: 2, kind: input, shape index: {}]   ;;  %s1802_s3 = inlined_call_operand.vmem [shape: bf16[1,640], index: 3, kind: input, shape index: {}]   ;;  %s1803_s4 = inlined_call_operand.vmem [shape: f32[1,128], index: 4, kind: input, shape index: {}]   ;;  %s1804_s5 = inlined_call_operand.vmem [shape: bf16[32,128], index: 5, kind: input, shape index: {}]   ;;  %s1805_s6 = inlined_call_operand.vmem [shape: bf16[32,128], index: 6, kind: output, shape index: {}]  }
   0x1   :  { %s1585_s23 = smov 0  }
   0x2 LB: > { %s35_s24 = sadd.s32 1, %s1536_s22  ;;  %p1300_p0 = scmp.ge.s32.totalorder %s1540_s23, 1  ;;  %s1540_s23 = sphi %s1585_s23, %s16_s23   ;;  %s1536_s22 = sphi %s1583_s22, %s1807_s22   ;;  %s1532_s21 = sphi %s1581_s21, %s1806_s21  }
   0x3   : > { %p37_p1 = scmp.ge.s32.totalorder %s35_s24, 2  ;;  %p302_p2 = scmp.lt.s32.totalorder %s1540_s23, 3 }
   0x5   : > { %s1809_s24 = smov (%p37_p1, %s35_s24), 0  ;;  %p303_p3 = pnand %p1300_p0, %p302_p2 }
   0x6   : > { %s1301_s25 = sshll.u32 (!%p303_p3), %s1532_s21, 1 }
   0x7   : > { %306 = sbr.rel (%p303_p3) target bundleno = 284 (0x11c), region = 44  ;;  %p369_p4 = scmp.lt.s32.totalorder (!%p303_p3), %s1301_s25, 3 }
   0xc   : > { %v1476_v0 = vld [vmem:[%s1800_s1 + $0x78] sm:$0xff]   ;;  %v1480_v4 = vld [vmem:[%s1800_s1 + $0x70] sm:$0xff]   ;;  %v1484_v8 = vld [vmem:[%s1800_s1 + $0x68] sm:$0xff]   ;;  %v438_v30 = vlaneseq  ;;  %v1542_v33 = vmov 1966171168   ;;  %v1543_v36 = vmov 0.0  }
   0xd   : > { %v1477_v1 = vld [vmem:[%s1800_s1 + $0xf8] sm:$0xff]   ;;  %1374 = vmatprep.subr.bf16.mxu0 %v1476_v0  ;;  %v1481_v5 = vld [vmem:[%s1800_s1 + $0xf0] sm:$0xff]   ;;  %v1485_v9 = vld [vmem:[%s1800_s1 + $0xe8] sm:$0xff]   ;;  %v436_v34 = vunpack.c.l.s4 %v1542_v33  ;;  %s1811_s25 = smov (!%p369_p4, %s1301_s25), 3  ;;  %vm1545_vm0 = vmmov 0  }
   0xe   : > { %v1478_v2 = vld [vmem:[%s1800_s1 + $0x38] sm:$0xff]   ;;  %1396 = vmatprep.subr.bf16.mxu1 %v1477_v1  ;;  %v1482_v6 = vld [vmem:[%s1800_s1 + $0x30] sm:$0xff]   ;;  %v1486_v10 = vld [vmem:[%s1800_s1 + $0x28] sm:$0xff]   ;;  %v439_v35 = vshrl.u32 %v438_v30, 7  ;;  %s1447_s9 = smul.u32 20, %s1811_s25 }
   0xf   : > { %v1479_v3 = vld [vmem:[%s1800_s1 + $0xb8] sm:$0xff]   ;;  %1375 = vmatpush3.bf16.msra.mxu0 %v1478_v2  ;;  %v1483_v7 = vld [vmem:[%s1800_s1 + $0xb0] sm:$0xff]   ;;  %v1487_v11 = vld [vmem:[%s1800_s1 + $0xa8] sm:$0xff]   ;;  %v437_v38 = vunpack.c.0.s8 %v436_v34 }
  0x10   : > { %1397 = vmatpush3.bf16.msra.mxu1 %v1479_v3  ;;  %1376 = vmatprep.subr.bf16.mxu0 %v1480_v4  ;;  %v1488_v12 = vld [vmem:[%s1800_s1 + $0x60] sm:$0xff]   ;;  %v1492_v16 = vld [vmem:[%s1800_s1 + $0x58] sm:$0xff]   ;;  %v1496_v20 = vld [vmem:[%s1800_s1 + $0x50] sm:$0xff]   ;;  %v1714_v43 = vsub.s32 0, %v439_v35  ;;  %s1724_s12 = scalar_lea.vmem %s1799_s0, %s1447_s9  ;;  %s1304_s9 = sshll.u32 %s1811_s25, 2 }
  0x11   : > { %1398 = vmatprep.subr.bf16.mxu1 %v1481_v5  ;;  %v1489_v13 = vld [vmem:[%s1800_s1 + $0xe0] sm:$0xff]   ;;  %v1493_v17 = vld [vmem:[%s1800_s1 + $0xd8] sm:$0xff]   ;;  %v1497_v21 = vld [vmem:[%s1800_s1 + $0xd0] sm:$0xff]   ;;  %v1709_v40 = vsub.s32 %v437_v38, %v439_v35  ;;  %s417_s16 = scalar_lea.vmem %s1805_s6, %s1304_s9 }
  0x12   : > { %v1490_v14 = vld [vmem:[%s1800_s1 + $0x20] sm:$0xff]   ;;  %v1494_v18 = vld [vmem:[%s1800_s1 + $0x18] sm:$0xff]   ;;  %v1498_v22 = vld [vmem:[%s1800_s1 + $0x10] sm:$0xff]  }
  0x13   : > { %1377 = vmatpush3.bf16.msra.mxu0 %v1482_v6  ;;  %v1491_v15 = vld [vmem:[%s1800_s1 + $0xa0] sm:$0xff]   ;;  %v1495_v19 = vld [vmem:[%s1800_s1 + $0x98] sm:$0xff]   ;;  %v1499_v23 = vld [vmem:[%s1800_s1 + $0x90] sm:$0xff]  }
  0x14   : > { %1399 = vmatpush3.bf16.msra.mxu1 %v1483_v7  ;;  %1378 = vmatprep.subr.bf16.mxu0 %v1484_v8  ;;  %v1500_v24 = vld [vmem:[%s1800_s1 + $0x48] sm:$0xff]   ;;  %v1504_v28 = vld [vmem:[%s1800_s1 + $0x40] sm:$0xff]   ;;  %v429_v1 = vld [vmem:[%s1724_s12 + $0x14] sm:$0xff] }
  0x15   : > { %1400 = vmatprep.subr.bf16.mxu1 %v1485_v9  ;;  %v1501_v25 = vld [vmem:[%s1800_s1 + $0xc8] sm:$0xff]   ;;  %v1505_v29 = vld [vmem:[%s1800_s1 + $0xc0] sm:$0xff]   ;;  %v1510_v30 = vld [vmem:[%s1800_s1 + $0x138] sm:$0xff]  }
  0x16   : > { %v1502_v26 = vld [vmem:[%s1800_s1 + $0x8] sm:$0xff]   ;;  %v1506_v31 = vld [vmem:[%s1800_s1] sm:$0xff]   ;;  %v1511_v38 = vld [vmem:[%s1800_s1 + $0x130] sm:$0xff]  }
  0x17   : > { %1379 = vmatpush3.bf16.msra.mxu0 %v1486_v10  ;;  %v1503_v27 = vld [vmem:[%s1800_s1 + $0x88] sm:$0xff]   ;;  %v1507_v32 = vld [vmem:[%s1800_s1 + $0x80] sm:$0xff]  }
  0x18   : > { %1401 = vmatpush3.bf16.msra.mxu1 %v1487_v11  ;;  %1380 = vmatprep.subr.bf16.mxu0 %v1488_v12  ;;  %v432_v37 = vld [vmem:[%s1801_s2] sm:$0x1f]  ;;  %v427_v12 = vld [vmem:[%s1724_s12 + $0x8] sm:$0xff] }
  0x19   : > { %1402 = vmatprep.subr.bf16.mxu1 %v1489_v13  ;;  %v1705_v39 = vld [vmem:[%s1802_s3] sm:$0x1f]  ;;  %v441_v41 = vrot.slane %v432_v37, %v1709_v40 }
  0x1a   : > { %v539_v42 = vrot.slane %v1705_v39, %v1709_v40  ;;  %v426_v0 = vld [vmem:[%s1724_s12] sm:$0xff] }
  0x1b   : > { %1381 = vmatpush3.bf16.msra.mxu0 %v1490_v14  ;;  %v449_v44 = vcombine.high %v441_v41, %v441_v41  ;;  %v456_v45 = vrot.slane %v441_v41, %v1709_v40  ;;  %v430_v13 = vld [vmem:[%s1724_s12 + $0x1c] sm:$0xff]  ;;  %v434_v14 = vcombine.high %v432_v37, %v432_v37 }
  0x1c   : > { %1403 = vmatpush3.bf16.msra.mxu1 %v1491_v15  ;;  %1382 = vmatprep.subr.bf16.mxu0 %v1492_v16  ;;  %v547_v46 = vcombine.high %v539_v42, %v539_v42  ;;  %v554_v47 = vrot.slane %v539_v42, %v1709_v40  ;;  %v1512_v42 = vld [vmem:[%s1800_s1 + $0x128] sm:$0xff]  }
  0x1d   : > { %1404 = vmatprep.subr.bf16.mxu1 %v1493_v17  ;;  %v470_v48 = vrot.slane %v449_v44, %v1709_v40  ;;  %v474_v49 = vpack.i.b16 %v456_v45, %v456_v45  ;;  %v471_v52 = vcombine.high %v456_v45, %v456_v45 }
  0x1e   : > { %v568_v50 = vrot.slane %v547_v46, %v1709_v40  ;;  %v572_v51 = vpack.i.b16 %v554_v47, %v554_v47  ;;  %v569_v53 = vcombine.high %v554_v47, %v554_v47  ;;  %v1513_v46 = vld [vmem:[%s1800_s1 + $0x120] sm:$0xff]  }
  0x1f   : > { %1383 = vmatpush3.bf16.msra.mxu0 %v1494_v18  ;;  %v479_v54 = vrot.slane %v474_v49, %v1714_v43  ;;  %v481_v55 = vpack.i.b16 %v470_v48, %v470_v48  ;;  %v472_v58 = vcombine.high %v470_v48, %v470_v48  ;;  %v488_v59 = vpack.i.b16 %v471_v52, %v471_v52  ;;  %v1514_v48 = vld [vmem:[%s1800_s1 + $0x118] sm:$0xff]   ;;  %v428_v49 = vld [vmem:[%s1724_s12 + $0x10] sm:$0xf] }
  0x20   : > { %1405 = vmatpush3.bf16.msra.mxu1 %v1495_v19  ;;  %1384 = vmatprep.subr.bf16.mxu0 %v1496_v20  ;;  %v577_v56 = vrot.slane %v572_v51, %v1714_v43  ;;  %v579_v57 = vpack.i.b16 %v568_v50, %v568_v50  ;;  %v570_v60 = vcombine.high %v568_v50, %v568_v50  ;;  %v431_v50 = vld [vmem:[%s1724_s12 + $0x24] sm:$0xf]  ;;  %s408_s12 = scalar_lea.vmem %s1804_s5, %s1304_s9 }
  0x21   : > { %1406 = vmatprep.subr.bf16.mxu1 %v1497_v21  ;;  %v586_v61 = vpack.i.b16 %v569_v53, %v569_v53  ;;  %v486_v62 = vrot.slane %v481_v55, %v1714_v43  ;;  %v493_v2 = vrot.slane %v488_v59, %v1714_v43  ;;  %v495_v3 = vpack.i.b16 %v472_v58, %v472_v58  ;;  %v1517_v59 = vld [vmem:[%s1800_s1 + $0x100] sm:$0xff]  }
  0x22   : > { %v584_v63 = vrot.slane %v579_v57, %v1714_v43  ;;  %v593_v5 = vpack.i.b16 %v570_v60, %v570_v60  ;;  %v1544_v21 = vmov 0  }
  0x23   : > { %1385 = vmatpush3.bf16.msra.mxu0 %v1498_v22  ;;  %v591_v4 = vrot.slane %v586_v61, %v1714_v43  ;;  %v1307_v6 = vcombine.low %v479_v54, %v486_v62  ;;  %v500_v8 = vrot.slane %v495_v3, %v1714_v43  ;;  %v1515_v54 = vld [vmem:[%s1800_s1 + $0x110] sm:$0xff]  }
  0x24   : > { %1407 = vmatpush3.bf16.msra.mxu1 %v1499_v23  ;;  %1386 = vmatprep.subr.bf16.mxu0 %v1500_v24  ;;  %v1310_v7 = vcombine.low %v577_v56, %v584_v63  ;;  %v598_v9 = vrot.slane %v593_v5, %v1714_v43  ;;  %v448_v24 = vrot.slane %v434_v14, %v1709_v40  ;;  %v1516_v56 = vld [vmem:[%s1800_s1 + $0x108] sm:$0xff]  }
  0x25   : > { %1408 = vmatprep.subr.bf16.mxu1 %v1501_v25  ;;  %v524_v10 = vmul.bf16 %v1307_v6, %v426_v0  ;;  %v527_v11 = vmul.bf16 %v1307_v6, %v429_v1  ;;  %v1308_v15 = vcombine.low %v493_v2, %v500_v8  ;;  %v532_v25 = vcombine.high %v1705_v39, %v1705_v39 }
  0x26   : > { %v1311_v16 = vcombine.low %v591_v4, %v598_v9  ;;  %v463_v37 = vrot.slane %v448_v24, %v1709_v40 }
  0x27   : > { %1387 = vmatpush3.bf16.msra.mxu0 %v1502_v26  ;;  %v622_v17 = vadd.bf16 %v1310_v7, %v524_v10  ;;  %v625_v18 = vadd.bf16 %v1310_v7, %v527_v11  ;;  %v525_v19 = vmul.bf16 %v1308_v15, %v427_v12  ;;  %v528_v20 = vmul.bf16 %v1308_v15, %v430_v13  ;;  %v1358_v11 = vld [vmem:[%s1803_s4] ss:$0 sm:$0xff] }
  0x28   : > { %1409 = vmatpush3.bf16.msra.mxu1 %v1503_v27  ;;  %1388 = vmatprep.subr.bf16.mxu0 %v1504_v28  ;;  %v546_v33 = vrot.slane %v532_v25, %v1709_v40  ;;  %v502_v39 = vpack.i.b16 %v463_v37, %v463_v37  ;;  %v1366_v12 = vld [vmem:[%s408_s12] sm:$0xff]  }
  0x29   : > { %1410 = vmatprep.subr.bf16.mxu1 %v1505_v29  ;;  %v628_v22 = vmax.bf16 %v1544_v21, %v622_v17  ;;  %v631_v23 = vmax.bf16 %v1544_v21, %v625_v18  ;;  %v623_v26 = vadd.bf16 %v1311_v16, %v525_v19  ;;  %v626_v27 = vadd.bf16 %v1311_v16, %v528_v20 }
  0x2a   : > { %v561_v41 = vrot.slane %v546_v33, %v1709_v40  ;;  %v507_v44 = vrot.slane %v502_v39, %v1714_v43  ;;  %v1367_v17 = vunpack.c.l.bf16 %v1366_v12  ;;  %v1368_v19 = vunpack.c.h.bf16 %v1366_v12 }
  0x2b   : > { %1389 = vmatpush3.bf16.msra.mxu0 %v1506_v31  ;;  %v1314_v28 = vcombine.high %v628_v22, %v631_v23  ;;  %v1313_v29 = vcombine.low %v628_v22, %v631_v23  ;;  %v629_v31 = vmax.bf16 %v1544_v21, %v623_v26 }
  0x2c   : > { %1411 = vmatpush3.bf16.msra.mxu1 %v1507_v32  ;;  %1427 = vmatprep.subr.bf16.mxu0 %v1543_v36  ;;  %v632_v32 = vmax.bf16 %v1544_v21, %v626_v27  ;;  %v600_v45 = vpack.i.b16 %v561_v41, %v561_v41  ;;  %v1309_v47 = vcombine.low %v507_v44, %v507_v44 }
  0x2d   : > { %1014 = vmatprep.mubr.bf16.mxu0 %v1314_v28 }
  0x2e   : > { %v1316_v34 = vcombine.high %v629_v31, %v632_v32  ;;  %1015 = vmatmul.mubr.bf16.vlgmr.msra.gmra.mxu0 %v1313_v29  ;;  %v1315_v35 = vcombine.low %v629_v31, %v632_v32  ;;  %v605_v40 = vrot.slane %v600_v45, %v1714_v43  ;;  %v526_v51 = vmul.bf16 %v1309_v47, %v428_v49 }
  0x2f   : > { %1428 = vmatpush3.bf16.msra.mxu0 %v1510_v30  ;;  %1443 = vmatprep.mubr.msk.bf16.mxu0 %vm1545_vm0, %v1543_v36  ;;  %v529_v52 = vmul.bf16 %v1309_v47, %v431_v50 }
  0x30   : > { %1055 = vmatprep.mubr.bf16.mxu1 %v1316_v34  ;;  %1429 = vmatprep.subr.bf16.mxu0 %v1543_v36  ;;  %v1312_v53 = vcombine.low %v605_v40, %v605_v40 }
  0x31   : > { %1056 = vmatmul.mubr.bf16.vlgmr.msra.gmra.mxu1 %v1315_v35 }
  0x32   : > { %v624_v43 = vadd.bf16 %v1312_v53, %v526_v51  ;;  %v627_v55 = vadd.bf16 %v1312_v53, %v529_v52 }
  0x33   : > { %1430 = vmatpush3.bf16.msra.mxu0 %v1511_v38 }
  0x34   : > { %1431 = vmatprep.subr.bf16.mxu0 %v1543_v36  ;;  %v630_v57 = vmax.bf16 %v1544_v21, %v624_v43  ;;  %v633_v58 = vmax.bf16 %v1544_v21, %v627_v55 }
  0x36   : > { %v1317_v60 = vcombine.low %v630_v57, %v633_v58 }
  0x37   : > { %1432 = vmatpush3.bf16.msra.mxu0 %v1512_v42 }
  0x38   : > { %1433 = vmatprep.subr.bf16.mxu0 %v1543_v36 }
  0x3b   : > { %1434 = vmatpush3.bf16.msra.mxu0 %v1513_v46 }
  0x3c   : > { %1435 = vmatprep.subr.bf16.mxu0 %v1543_v36 }
  0x3f   : > { %1436 = vmatpush3.bf16.msra.mxu0 %v1514_v48 }
  0x40   : > { %1437 = vmatprep.subr.bf16.mxu0 %v1543_v36 }
  0x43   : > { %1438 = vmatpush3.bf16.msra.mxu0 %v1515_v54 }
  0x44   : > { %1439 = vmatprep.subr.bf16.mxu0 %v1543_v36 }
  0x47   : > { %1440 = vmatpush3.bf16.msra.mxu0 %v1516_v56 }
  0x48   : > { %1441 = vmatprep.subr.bf16.mxu0 %v1543_v36 }
  0x4b   : > { %1442 = vmatpush3.bf16.msra.mxu0 %v1517_v59 }
  0x4e   : > { %1444 = vmatmul.mubr.bf16.vlgmr.msra.gmra.mxu0 %v1317_v60 }
  0xee   : > { %v1390_v61 = vpop.f32.mrf.mxu0 }
  0xf0   : > { %v1391_v63 = vpop.f32.mrf.mxu0 }
  0xf1   : > { %v1412_v62 = vpop.f32.mrf.mxu1  ;;  %v1392_v3 = vadd.f32 %v1391_v63, %v1390_v61 }
  0xf2   : > { %v1393_v1 = vpop.f32.mrf.mxu0 }
  0xf3   : > { %v1413_v0 = vpop.f32.mrf.mxu1 }
  0xf4   : > { %v1414_v4 = vadd.f32 %v1413_v0, %v1412_v62  ;;  %v1394_v5 = vpop.f32.mrf.mxu0 }
  0xf5   : > { %v1415_v2 = vpop.f32.mrf.mxu1  ;;  %v1395_v7 = vadd.f32 %v1394_v5, %v1393_v1 }
  0xf6   : > { %v1058_v36 = vadd.f32 %v1414_v4, %v1392_v3 }
  0xf7   : > { %v1416_v6 = vpop.f32.mrf.mxu1 }
  0xf8   : > { %v1417_v8 = vadd.f32 %v1416_v6, %v1415_v2 }
  0xfa   : > { %v1061_v14 = vadd.f32 %v1417_v8, %v1395_v7 }
 0x10e   : > { %v1098_v9 = vpop.f32.mrf.mxu0 }
 0x10f   : > { %v1099_v10 = vadd.f32 %v1098_v9, %v1058_v36 }
 0x110   : > { %v1445_v13 = vpop.f32.mrf.mxu0 }
 0x111   : > { %v1121_v16 = vadd.f32 %v1358_v11, %v1099_v10 }
 0x112   : > { %v1101_v15 = vpop.f32.mrf.mxu0 }
 0x113   : > { %v1102_v18 = vadd.f32 %v1101_v15, %v1061_v14  ;;  %v1127_v22 = vadd.f32 %v1367_v17, %v1121_v16 }
 0x114   : > { %v1446_v20 = vpop.f32.mrf.mxu0 }
 0x115   : > { %v1122_v21 = vadd.f32 %v1358_v11, %v1102_v18 }
 0x117   : > { %v1128_v23 = vadd.f32 %v1368_v19, %v1122_v21 }
 0x119   : > { %v1372_v24 = vpack.c.bf16 %v1128_v23, %v1127_v22 }
 0x11b   : > { %1373 = vst [vmem:[%s417_s16] sm:$0xff] %v1372_v24  }
 0x11c PF: > { %s16_s23 = sadd.s32 1, %s1540_s23   ;;  %s1806_s21 = smov %s1536_s22 }
 0x11d   : > { %p13_p5 = scmp.ge.s32.totalorder %s16_s23, 4   ;;  %s1807_s22 = smov %s1809_s24 }
 0x11f   :  { %15 = sbr.rel (!%p13_p5) target bundleno = 2 (0x2), region = 97 }

</bundles_post_ra>
